<compile_context>
chip_gen: v7x
topology: tpu7x:2x2x1
jax: 0.10.0
libtpu: 0.0.40
codegen_flags: <defaults>
</compile_context>

<pallas_src>
import jax
import jax.numpy as jnp
from jax import lax
from jax.experimental import pallas as pl
from jax.experimental.pallas import tpu as pltpu

_EPS = 1e-5        # torch BatchNorm1d default eps
_LANE = 128
_HID = 400         # fc hidden width in the PyTorch module


def _round_up(x, m):
    return ((x + m - 1) // m) * m


def _vmem_limit_bytes():
    """Per-generation VMEM budget (v5e/v6e: 128 MiB physical, v7x: 64 MiB)."""
    try:
        cap = int(pltpu.get_tpu_info().vmem_capacity_bytes)
    except Exception:
        cap = 64 * 1024 * 1024              # conservative fallback (v7x-sized)
    return min((cap * 3) // 4, 112 * 1024 * 1024)


# ---------------------------------------------------------------------------
# Call 1: conv/BN/ReLU front-end  ->  dense bf16 flatten
# ---------------------------------------------------------------------------
def _make_conv_kernel(B, Bp, dim_input, Kp):
    """Conv1d(1->3,k5,p1)+BN+ReLU, Conv1d(3->6,k5,p1)+BN+ReLU, Flatten (bf16).

    cv1 output is produced directly at the cv2-padded width W = dim_input
    (lanes 0 and W-1 are the structural conv-padding zeros, enforced by the
    validity mask), so cv2's shifted taps are plain in-bounds value slices and
    no padded VMEM scratch / memset is needed.
    """
    W = dim_input                 # cv1 padded output width  (= L1 + 2)
    L1 = dim_input - 2            # cv1 valid output length
    L2 = dim_input - 4            # cv2 output length
    Kd = 6 * L2                   # dense flatten width (before lane padding)
    inv1 = 1.0 / float(B * L1)    # BN statistics over the *real* batch
    inv2 = 1.0 / float(B * L2)

    def kernel(x_ref,                               # VMEM (Bp, dim_input + 4)
               w1_ref, b1_ref, g1_ref, be1_ref,     # SMEM (3,5)(3,)(3,)(3,)
               w2_ref, b2_ref, g2_ref, be2_ref,     # SMEM (6,15)(6,)(6,)(6,)
               flat_ref):                           # VMEM (Bp, Kp) bf16
        xp = x_ref[...]

        # Single combined row/lane validity mask, built once and reused.
        lane = lax.broadcasted_iota(jnp.int32, (Bp, W), 1)
        row = lax.broadcasted_iota(jnp.int32, (Bp, W), 0)
        mask1 = jnp.where((row < B) & (lane >= 1) & (lane <= L1), 1.0, 0.0)
        rmask2 = mask1[:, 2:2 + L2]                 # pure row mask, (Bp, L2)

        # ---- cv1: 5 shifted input views shared by the 3 output channels ----
        xs = [xp[:, k:k + W] for k in range(5)]

        h1 = []                                     # cv1 outputs stay in vregs
        for c in range(3):
            acc = xs[0] * w1_ref[c, 0]
            for k in range(1, 5):
                acc = acc + xs[k] * w1_ref[c, k]
            acc = acc + b1_ref[c]
            am = acc * mask1                        # exact stats over B * L1
            s1 = jnp.sum(am, keepdims=True)
            s2 = jnp.sum(am * am, keepdims=True)
            mean = s1 * inv1
            var = jnp.maximum(s2 * inv1 - mean * mean, 0.0)
            scale = lax.rsqrt(var + _EPS) * g1_ref[c]
            # boundary lanes / padded rows forced to exactly 0 for cv2
            h1.append(mask1 * jnp.maximum((am - mean) * scale + be1_ref[c], 0.0))

        # ---- cv2: hoist the 15 (channel, tap) register-level views once ----
        taps = [[h1[c][:, k:k + L2] for k in range(5)] for c in range(3)]

        for o in range(6):
            acc = taps[0][0] * w2_ref[o, 0] + b2_ref[o]
            for c in range(3):
                for k in range(5):
                    if c == 0 and k == 0:
                        continue
                    acc = acc + taps[c][k] * w2_ref[o, c * 5 + k]
            am = acc * rmask2                       # exact stats over B * L2
            s1 = jnp.sum(am, keepdims=True)
            s2 = jnp.sum(am * am, keepdims=True)
            mean = s1 * inv2
            var = jnp.maximum(s2 * inv2 - mean * mean, 0.0)
            scale = lax.rsqrt(var + _EPS) * g2_ref[o]
            h = jnp.maximum((am - mean) * scale + be2_ref[o], 0.0)
            # nn.Flatten(): dense packing, channel o -> columns [o*L2,(o+1)*L2)
            flat_ref[:, o * L2:(o + 1) * L2] = h.astype(jnp.bfloat16)

        if Kp > Kd:                                 # zero only the small tail
            flat_ref[:, Kd:Kp] = jnp.zeros((Bp, Kp - Kd), jnp.bfloat16)

    return kernel


# ---------------------------------------------------------------------------
# Call 2: batch-gridded FC encoder / decoder + row-wise L2 normalisation
# ---------------------------------------------------------------------------
def _make_fc_kernel(fuse23):
    def kernel(flat_ref, *refs):
        if fuse23:
            (w1_ref, b1_ref, w23_ref, b23_ref, w4_ref, b4_ref, out_ref) = refs
        else:
            (w1_ref, b1_ref, w2_ref, b2_ref, w3_ref, b3_ref,
             w4_ref, b4_ref, out_ref) = refs

        h2 = jnp.dot(flat_ref[...], w1_ref[...],
                     preferred_element_type=jnp.float32) + b1_ref[...]
        h2 = jnp.maximum(h2, 0.0).astype(jnp.bfloat16)           # fc1 + relu

        if fuse23:                                               # (fc2·fc3)
            h3 = jnp.dot(h2, w23_ref[...],
                         preferred_element_type=jnp.float32) + b23_ref[...]
        else:
            z = jnp.dot(h2, w2_ref[...],
                        preferred_element_type=jnp.float32) + b2_ref[...]
            h3 = jnp.dot(z.astype(jnp.bfloat16), w3_ref[...],
                         preferred_element_type=jnp.float32) + b3_ref[...]
        h3 = jnp.maximum(h3, 0.0).astype(jnp.bfloat16)           # relu

        out = jnp.dot(h3, w4_ref[...],
                      preferred_element_type=jnp.float32) + b4_ref[...]

        # out / ||out||_2 per row (padded output lanes are exactly 0)
        ss = jnp.sum(out * out, axis=1, keepdims=True)
        out_ref[...] = out * lax.rsqrt(jnp.maximum(ss, 1e-30))

    return kernel


def aev3_forward(x, prep):
    """x: (B, dim_input) float32; prep: dict from prepare_params.
    Returns (B, dim_input) float32."""
    B, dim_input = x.shape
    assert dim_input >= 5, "Conv1d stack needs dim_input >= 5"
    L2 = dim_input - 4
    Kp = _round_up(6 * L2, _LANE)
    din_p = prep["wfc4"].shape[1]

    # Batch tile / padding: multiples of 16 (bf16 sublane packing).
    tb = min(_round_up(max(B, 16), 16), 256)
    Bp = _round_up(B, tb)
    vmem_limit = _vmem_limit_bytes()

    # 2 zeros each side: cv1 output is computed directly at padded width.
    xpad = jnp.pad(x.astype(jnp.float32), ((0, Bp - B), (2, 2)))

    vmem = pl.BlockSpec(memory_space=pltpu.MemorySpace.VMEM)
    smem = pl.BlockSpec(memory_space=pltpu.MemorySpace.SMEM)

    # ---- call 1: conv/BN/ReLU (needs whole-batch BN stats) -----------------
    # TODO(synk): for very large B*dim_input add a BN-stats pre-pass and batch
    # tile this call as well; at the target sizes it fits VMEM comfortably.
    flat = pl.pallas_call(
        _make_conv_kernel(B, Bp, dim_input, Kp),
        out_shape=jax.ShapeDtypeStruct((Bp, Kp), jnp.bfloat16),
        in_specs=[vmem] + [smem] * 8,
        out_specs=vmem,
        compiler_params=pltpu.CompilerParams(vmem_limit_bytes=vmem_limit),
    )(xpad, prep["w1"], prep["b1"], prep["g1"], prep["be1"],
      prep["w2"], prep["b2"], prep["g2"], prep["be2"])

    # ---- call 2: batch-gridded FC stack ------------------------------------
    fuse23 = prep["fuse23"]
    if fuse23:
        fc_args = (prep["wfc1"], prep["bfc1"], prep["w23"], prep["b23"],
                   prep["wfc4"], prep["bfc4"])
    else:
        fc_args = (prep["wfc1"], prep["bfc1"], prep["wfc2"], prep["bfc2"],
                   prep["wfc3"], prep["bfc3"], prep["wfc4"], prep["bfc4"])

    def _resident(a):        # whole array, stays resident across the grid
        return pl.BlockSpec(a.shape, lambda i: (0, 0))

    out = pl.pallas_call(
        _make_fc_kernel(fuse23),
        grid=(Bp // tb,),
        out_shape=jax.ShapeDtypeStruct((Bp, din_p), jnp.float32),
        in_specs=[pl.BlockSpec((tb, Kp), lambda i: (i, 0))]
                 + [_resident(a) for a in fc_args],
        out_specs=pl.BlockSpec((tb, din_p), lambda i: (i, 0)),
        compiler_params=pltpu.CompilerParams(
            dimension_semantics=("parallel",),
            vmem_limit_bytes=vmem_limit),
    )(flat, *fc_args)

    return out[:B, :dim_input]


# ---------------------------------------------------------------------------
# Parameter construction / offline packing
# ---------------------------------------------------------------------------
def init_params(key, dim_input, dim_output):
    """PyTorch-style init (uniform +/-1/sqrt(fan_in)); Linear weights already
    transposed to (in, out)."""
    L2 = dim_input - 4
    ks = jax.random.split(key, 12)

    def unif(k, shape, fan_in):
        bound = 1.0 / (float(fan_in) ** 0.5)
        return jax.random.uniform(k, shape, jnp.float32, -bound, bound)

    p = {}
    p["w1"] = unif(ks[0], (3, 5), 5)          # Conv1d(1,3,5): (3,1,5) -> (3,5)
    p["b1"] = unif(ks[1], (3,), 5)
    p["g1"] = jnp.ones((3,), jnp.float32)     # BatchNorm1d(3) affine
    p["be1"] = jnp.zeros((3,), jnp.float32)
    p["w2"] = unif(ks[2], (6, 15), 15)        # Conv1d(3,6,5): (6,3,5) -> (6,15)
    p["b2"] = unif(ks[3], (6,), 15)
    p["g2"] = jnp.ones((6,), jnp.float32)
    p["be2"] = jnp.zeros((6,), jnp.float32)
    p["wfc1"] = unif(ks[4], (6 * L2, _HID), 6 * L2)
    p["bfc1"] = unif(ks[5], (_HID,), 6 * L2)
    p["wfc2"] = unif(ks[6], (_HID, dim_output), _HID)
    p["bfc2"] = unif(ks[7], (dim_output,), _HID)
    p["wfc3"] = unif(ks[8], (dim_output, _HID), dim_output)
    p["bfc3"] = unif(ks[9], (_HID,), dim_output)
    p["wfc4"] = unif(ks[10], (_HID, dim_input), _HID)
    p["bfc4"] = unif(ks[11], (dim_input,), _HID)
    return p


def prepare_params(params, dim_input, dim_output, fuse23=None):
    """Offline packing for the kernels:
      * fc1's K densely packed (round_up(6*L2, 128) total, channel-major as in
        nn.Flatten); all FC weights zero-padded to lane/MXU grain and cast to
        bfloat16 (zero padding keeps the math exact; the bf16 cast is the only
        approximation).  Biases stay f32 as (1, padded_out).
      * fc2/fc3 fused into W23 = W2 @ W3 (no nonlinearity between them) when
        2*dim_output >= 400, halving the serial skinny matmuls."""
    L2 = dim_input - 4
    Kp = _round_up(6 * L2, _LANE)
    hp = _round_up(_HID, _LANE)
    dout_p = _round_up(dim_output, _LANE)
    din_p = _round_up(dim_input, _LANE)
    if fuse23 is None:
        fuse23 = (2 * dim_output) >= _HID

    def pad2(a, r, c):
        return jnp.zeros((r, c), jnp.float32).at[:a.shape[0], :a.shape[1]].set(a)

    def pad_bias(b, c):
        return jnp.zeros((1, c), jnp.float32).at[0, :b.shape[0]].set(b)

    p = {k: params[k] for k in
         ("w1", "b1", "g1", "be1", "w2", "b2", "g2", "be2")}
    p["fuse23"] = bool(fuse23)

    p["wfc1"] = pad2(params["wfc1"], Kp, hp).astype(jnp.bfloat16)
    p["bfc1"] = pad_bias(params["bfc1"], hp)
    p["wfc4"] = pad2(params["wfc4"], hp, din_p).astype(jnp.bfloat16)
    p["bfc4"] = pad_bias(params["bfc4"], din_p)

    if fuse23:
        w23 = params["wfc2"] @ params["wfc3"]                    # (400, 400)
        b23 = params["bfc2"] @ params["wfc3"] + params["bfc3"]   # (400,)
        p["w23"] = pad2(w23, hp, hp).astype(jnp.bfloat16)
        p["b23"] = pad_bias(b23, hp)
    else:
        p["wfc2"] = pad2(params["wfc2"], hp, dout_p).astype(jnp.bfloat16)
        p["bfc2"] = pad_bias(params["bfc2"], dout_p)
        p["wfc3"] = pad2(params["wfc3"], dout_p, hp).astype(jnp.bfloat16)
        p["bfc3"] = pad_bias(params["bfc3"], hp)
    return p


if __name__ == "__main__":
    B, dim_input, dim_output = 4, 16, 8
    key = jax.random.PRNGKey(0)
    kx, kp = jax.random.split(key)
    x = jax.random.normal(kx, (B, dim_input), jnp.float32)
    params = init_params(kp, dim_input, dim_output)
    prep = prepare_params(params, dim_input, dim_output)

    y = jax.block_until_ready(aev3_forward(x, prep))
    assert y.shape == (B, dim_input), y.shape
    assert bool(jnp.all(jnp.isfinite(y)))
    # rows are unit-norm after the final normalisation
    assert bool(jnp.allclose(jnp.linalg.norm(y, axis=1), 1.0, atol=1e-3))
    print("KERNEL_OK")
</pallas_src>

<mosaic_0001>
module attributes {stable_mosaic.version = 11 : i64} {
  func.func @kernel(%arg0: memref<16x20xf32, #tpu.memory_space<vmem>>, %arg1: memref<3x5xf32, #tpu.memory_space<smem>>, %arg2: memref<3xf32, #tpu.memory_space<smem>>, %arg3: memref<3xf32, #tpu.memory_space<smem>>, %arg4: memref<3xf32, #tpu.memory_space<smem>>, %arg5: memref<6x15xf32, #tpu.memory_space<smem>>, %arg6: memref<6xf32, #tpu.memory_space<smem>>, %arg7: memref<6xf32, #tpu.memory_space<smem>>, %arg8: memref<6xf32, #tpu.memory_space<smem>>, %arg9: memref<16x128xbf16, #tpu.memory_space<vmem>>) attributes {dimension_semantics = [], scalar_prefetch = 0 : i64, scratch_operands = 0 : i64, tpu.core_type = #tpu.core_type<tc>} {
    %c0 = arith.constant 0 : index
    %c0_0 = arith.constant 0 : index
    %0 = vector.load %arg0[%c0, %c0_0] : memref<16x20xf32, #tpu.memory_space<vmem>>, vector<16x20xf32>
    %1 = tpu.iota {dimensions = array<i32: 1>} : vector<16x16xi32>
    %2 = tpu.iota {dimensions = array<i32: 0>} : vector<16x16xi32>
    %c4_i32 = arith.constant 4 : i32
    %3 = vector.broadcast %c4_i32 : i32 to vector<16x16xi32>
    %4 = arith.cmpi slt, %2, %3 : vector<16x16xi32>
    %c1_i32 = arith.constant 1 : i32
    %5 = vector.broadcast %c1_i32 : i32 to vector<16x16xi32>
    %6 = arith.cmpi sge, %1, %5 : vector<16x16xi32>
    %7 = arith.andi %4, %6 : vector<16x16xi1>
    %c14_i32 = arith.constant 14 : i32
    %8 = vector.broadcast %c14_i32 : i32 to vector<16x16xi32>
    %9 = arith.cmpi sle, %1, %8 : vector<16x16xi32>
    %10 = arith.andi %7, %9 : vector<16x16xi1>
    %cst = arith.constant 1.000000e+00 : f32
    %cst_1 = arith.constant 0.000000e+00 : f32
    %11 = vector.broadcast %cst : f32 to vector<16x16xf32>
    %12 = vector.broadcast %cst_1 : f32 to vector<16x16xf32>
    %13 = arith.select %10, %11, %12 : vector<16x16xi1>, vector<16x16xf32>
    %14 = vector.extract_strided_slice %13 {offsets = [0, 2], sizes = [16, 12], strides = [1, 1]} : vector<16x16xf32> to vector<16x12xf32>
    %15 = vector.extract_strided_slice %0 {offsets = [0, 0], sizes = [16, 16], strides = [1, 1]} : vector<16x20xf32> to vector<16x16xf32>
    %16 = vector.extract_strided_slice %0 {offsets = [0, 1], sizes = [16, 16], strides = [1, 1]} : vector<16x20xf32> to vector<16x16xf32>
    %17 = vector.extract_strided_slice %0 {offsets = [0, 2], sizes = [16, 16], strides = [1, 1]} : vector<16x20xf32> to vector<16x16xf32>
    %18 = vector.extract_strided_slice %0 {offsets = [0, 3], sizes = [16, 16], strides = [1, 1]} : vector<16x20xf32> to vector<16x16xf32>
    %19 = vector.extract_strided_slice %0 {offsets = [0, 4], sizes = [16, 16], strides = [1, 1]} : vector<16x20xf32> to vector<16x16xf32>
    %c0_2 = arith.constant 0 : index
    %c0_3 = arith.constant 0 : index
    %20 = memref.load %arg1[%c0_2, %c0_3] : memref<3x5xf32, #tpu.memory_space<smem>>
    %21 = vector.broadcast %20 : f32 to vector<16x16xf32>
    %22 = arith.mulf %15, %21 : vector<16x16xf32>
    %c0_4 = arith.constant 0 : index
    %c1 = arith.constant 1 : index
    %23 = memref.load %arg1[%c0_4, %c1] : memref<3x5xf32, #tpu.memory_space<smem>>
    %24 = vector.broadcast %23 : f32 to vector<16x16xf32>
    %25 = arith.mulf %16, %24 : vector<16x16xf32>
    %26 = arith.addf %22, %25 : vector<16x16xf32>
    %c0_5 = arith.constant 0 : index
    %c2 = arith.constant 2 : index
    %27 = memref.load %arg1[%c0_5, %c2] : memref<3x5xf32, #tpu.memory_space<smem>>
    %28 = vector.broadcast %27 : f32 to vector<16x16xf32>
    %29 = arith.mulf %17, %28 : vector<16x16xf32>
    %30 = arith.addf %26, %29 : vector<16x16xf32>
    %c0_6 = arith.constant 0 : index
    %c3 = arith.constant 3 : index
    %31 = memref.load %arg1[%c0_6, %c3] : memref<3x5xf32, #tpu.memory_space<smem>>
    %32 = vector.broadcast %31 : f32 to vector<16x16xf32>
    %33 = arith.mulf %18, %32 : vector<16x16xf32>
    %34 = arith.addf %30, %33 : vector<16x16xf32>
    %c0_7 = arith.constant 0 : index
    %c4 = arith.constant 4 : index
    %35 = memref.load %arg1[%c0_7, %c4] : memref<3x5xf32, #tpu.memory_space<smem>>
    %36 = vector.broadcast %35 : f32 to vector<16x16xf32>
    %37 = arith.mulf %19, %36 : vector<16x16xf32>
    %38 = arith.addf %34, %37 : vector<16x16xf32>
    %c0_8 = arith.constant 0 : index
    %39 = memref.load %arg2[%c0_8] : memref<3xf32, #tpu.memory_space<smem>>
    %40 = vector.broadcast %39 : f32 to vector<16x16xf32>
    %41 = arith.addf %38, %40 : vector<16x16xf32>
    %42 = arith.mulf %41, %13 : vector<16x16xf32>
    %43 = vector.shape_cast %42 : vector<16x16xf32> to vector<1x16x16xf32>
    %cst_9 = arith.constant dense<0.000000e+00> : vector<1xf32>
    %44 = vector.multi_reduction <add>, %43, %cst_9 [1, 2] : vector<1x16x16xf32> to vector<1xf32>
    %45 = vector.shape_cast %44 : vector<1xf32> to vector<1x1x1xf32>
    %46 = vector.extract %45[0, 0, 0] : f32 from vector<1x1x1xf32>
    %47 = vector.broadcast %46 : f32 to vector<1x1xf32>
    %48 = arith.mulf %42, %42 : vector<16x16xf32>
    %49 = vector.shape_cast %48 : vector<16x16xf32> to vector<1x16x16xf32>
    %cst_10 = arith.constant dense<0.000000e+00> : vector<1xf32>
    %50 = vector.multi_reduction <add>, %49, %cst_10 [1, 2] : vector<1x16x16xf32> to vector<1xf32>
    %51 = vector.shape_cast %50 : vector<1xf32> to vector<1x1x1xf32>
    %52 = vector.extract %51[0, 0, 0] : f32 from vector<1x1x1xf32>
    %53 = vector.broadcast %52 : f32 to vector<1x1xf32>
    %cst_11 = arith.constant 0.0178571437 : f32
    %54 = vector.broadcast %cst_11 : f32 to vector<1x1xf32>
    %55 = arith.mulf %47, %54 : vector<1x1xf32>
    %cst_12 = arith.constant 0.0178571437 : f32
    %56 = vector.broadcast %cst_12 : f32 to vector<1x1xf32>
    %57 = arith.mulf %53, %56 : vector<1x1xf32>
    %58 = arith.mulf %55, %55 : vector<1x1xf32>
    %59 = arith.subf %57, %58 : vector<1x1xf32>
    %cst_13 = arith.constant 0.000000e+00 : f32
    %60 = vector.broadcast %cst_13 : f32 to vector<1x1xf32>
    %61 = arith.maximumf %59, %60 : vector<1x1xf32>
    %cst_14 = arith.constant 9.99999974E-6 : f32
    %62 = vector.broadcast %cst_14 : f32 to vector<1x1xf32>
    %63 = arith.addf %61, %62 : vector<1x1xf32>
    %64 = math.rsqrt %63 : vector<1x1xf32>
    %c0_15 = arith.constant 0 : index
    %65 = memref.load %arg3[%c0_15] : memref<3xf32, #tpu.memory_space<smem>>
    %66 = vector.broadcast %65 : f32 to vector<1x1xf32>
    %67 = arith.mulf %64, %66 : vector<1x1xf32>
    %68 = vector.broadcast %55 : vector<1x1xf32> to vector<16x16xf32>
    %69 = arith.subf %42, %68 : vector<16x16xf32>
    %70 = vector.broadcast %67 : vector<1x1xf32> to vector<16x16xf32>
    %71 = arith.mulf %69, %70 : vector<16x16xf32>
    %c0_16 = arith.constant 0 : index
    %72 = memref.load %arg4[%c0_16] : memref<3xf32, #tpu.memory_space<smem>>
    %73 = vector.broadcast %72 : f32 to vector<16x16xf32>
    %74 = arith.addf %71, %73 : vector<16x16xf32>
    %cst_17 = arith.constant 0.000000e+00 : f32
    %75 = vector.broadcast %cst_17 : f32 to vector<16x16xf32>
    %76 = arith.maximumf %74, %75 : vector<16x16xf32>
    %77 = arith.mulf %13, %76 : vector<16x16xf32>
    %c1_18 = arith.constant 1 : index
    %c0_19 = arith.constant 0 : index
    %78 = memref.load %arg1[%c1_18, %c0_19] : memref<3x5xf32, #tpu.memory_space<smem>>
    %79 = vector.broadcast %78 : f32 to vector<16x16xf32>
    %80 = arith.mulf %15, %79 : vector<16x16xf32>
    %c1_20 = arith.constant 1 : index
    %c1_21 = arith.constant 1 : index
    %81 = memref.load %arg1[%c1_20, %c1_21] : memref<3x5xf32, #tpu.memory_space<smem>>
    %82 = vector.broadcast %81 : f32 to vector<16x16xf32>
    %83 = arith.mulf %16, %82 : vector<16x16xf32>
    %84 = arith.addf %80, %83 : vector<16x16xf32>
    %c1_22 = arith.constant 1 : index
    %c2_23 = arith.constant 2 : index
    %85 = memref.load %arg1[%c1_22, %c2_23] : memref<3x5xf32, #tpu.memory_space<smem>>
    %86 = vector.broadcast %85 : f32 to vector<16x16xf32>
    %87 = arith.mulf %17, %86 : vector<16x16xf32>
    %88 = arith.addf %84, %87 : vector<16x16xf32>
    %c1_24 = arith.constant 1 : index
    %c3_25 = arith.constant 3 : index
    %89 = memref.load %arg1[%c1_24, %c3_25] : memref<3x5xf32, #tpu.memory_space<smem>>
    %90 = vector.broadcast %89 : f32 to vector<16x16xf32>
    %91 = arith.mulf %18, %90 : vector<16x16xf32>
    %92 = arith.addf %88, %91 : vector<16x16xf32>
    %c1_26 = arith.constant 1 : index
    %c4_27 = arith.constant 4 : index
    %93 = memref.load %arg1[%c1_26, %c4_27] : memref<3x5xf32, #tpu.memory_space<smem>>
    %94 = vector.broadcast %93 : f32 to vector<16x16xf32>
    %95 = arith.mulf %19, %94 : vector<16x16xf32>
    %96 = arith.addf %92, %95 : vector<16x16xf32>
    %c1_28 = arith.constant 1 : index
    %97 = memref.load %arg2[%c1_28] : memref<3xf32, #tpu.memory_space<smem>>
    %98 = vector.broadcast %97 : f32 to vector<16x16xf32>
    %99 = arith.addf %96, %98 : vector<16x16xf32>
    %100 = arith.mulf %99, %13 : vector<16x16xf32>
    %101 = vector.shape_cast %100 : vector<16x16xf32> to vector<1x16x16xf32>
    %cst_29 = arith.constant dense<0.000000e+00> : vector<1xf32>
    %102 = vector.multi_reduction <add>, %101, %cst_29 [1, 2] : vector<1x16x16xf32> to vector<1xf32>
    %103 = vector.shape_cast %102 : vector<1xf32> to vector<1x1x1xf32>
    %104 = vector.extract %103[0, 0, 0] : f32 from vector<1x1x1xf32>
    %105 = vector.broadcast %104 : f32 to vector<1x1xf32>
    %106 = arith.mulf %100, %100 : vector<16x16xf32>
    %107 = vector.shape_cast %106 : vector<16x16xf32> to vector<1x16x16xf32>
    %cst_30 = arith.constant dense<0.000000e+00> : vector<1xf32>
    %108 = vector.multi_reduction <add>, %107, %cst_30 [1, 2] : vector<1x16x16xf32> to vector<1xf32>
    %109 = vector.shape_cast %108 : vector<1xf32> to vector<1x1x1xf32>
    %110 = vector.extract %109[0, 0, 0] : f32 from vector<1x1x1xf32>
    %111 = vector.broadcast %110 : f32 to vector<1x1xf32>
    %cst_31 = arith.constant 0.0178571437 : f32
    %112 = vector.broadcast %cst_31 : f32 to vector<1x1xf32>
    %113 = arith.mulf %105, %112 : vector<1x1xf32>
    %cst_32 = arith.constant 0.0178571437 : f32
    %114 = vector.broadcast %cst_32 : f32 to vector<1x1xf32>
    %115 = arith.mulf %111, %114 : vector<1x1xf32>
    %116 = arith.mulf %113, %113 : vector<1x1xf32>
    %117 = arith.subf %115, %116 : vector<1x1xf32>
    %cst_33 = arith.constant 0.000000e+00 : f32
    %118 = vector.broadcast %cst_33 : f32 to vector<1x1xf32>
    %119 = arith.maximumf %117, %118 : vector<1x1xf32>
    %cst_34 = arith.constant 9.99999974E-6 : f32
    %120 = vector.broadcast %cst_34 : f32 to vector<1x1xf32>
    %121 = arith.addf %119, %120 : vector<1x1xf32>
    %122 = math.rsqrt %121 : vector<1x1xf32>
    %c1_35 = arith.constant 1 : index
    %123 = memref.load %arg3[%c1_35] : memref<3xf32, #tpu.memory_space<smem>>
    %124 = vector.broadcast %123 : f32 to vector<1x1xf32>
    %125 = arith.mulf %122, %124 : vector<1x1xf32>
    %126 = vector.broadcast %113 : vector<1x1xf32> to vector<16x16xf32>
    %127 = arith.subf %100, %126 : vector<16x16xf32>
    %128 = vector.broadcast %125 : vector<1x1xf32> to vector<16x16xf32>
    %129 = arith.mulf %127, %128 : vector<16x16xf32>
    %c1_36 = arith.constant 1 : index
    %130 = memref.load %arg4[%c1_36] : memref<3xf32, #tpu.memory_space<smem>>
    %131 = vector.broadcast %130 : f32 to vector<16x16xf32>
    %132 = arith.addf %129, %131 : vector<16x16xf32>
    %cst_37 = arith.constant 0.000000e+00 : f32
    %133 = vector.broadcast %cst_37 : f32 to vector<16x16xf32>
    %134 = arith.maximumf %132, %133 : vector<16x16xf32>
    %135 = arith.mulf %13, %134 : vector<16x16xf32>
    %c2_38 = arith.constant 2 : index
    %c0_39 = arith.constant 0 : index
    %136 = memref.load %arg1[%c2_38, %c0_39] : memref<3x5xf32, #tpu.memory_space<smem>>
    %137 = vector.broadcast %136 : f32 to vector<16x16xf32>
    %138 = arith.mulf %15, %137 : vector<16x16xf32>
    %c2_40 = arith.constant 2 : index
    %c1_41 = arith.constant 1 : index
    %139 = memref.load %arg1[%c2_40, %c1_41] : memref<3x5xf32, #tpu.memory_space<smem>>
    %140 = vector.broadcast %139 : f32 to vector<16x16xf32>
    %141 = arith.mulf %16, %140 : vector<16x16xf32>
    %142 = arith.addf %138, %141 : vector<16x16xf32>
    %c2_42 = arith.constant 2 : index
    %c2_43 = arith.constant 2 : index
    %143 = memref.load %arg1[%c2_42, %c2_43] : memref<3x5xf32, #tpu.memory_space<smem>>
    %144 = vector.broadcast %143 : f32 to vector<16x16xf32>
    %145 = arith.mulf %17, %144 : vector<16x16xf32>
    %146 = arith.addf %142, %145 : vector<16x16xf32>
    %c2_44 = arith.constant 2 : index
    %c3_45 = arith.constant 3 : index
    %147 = memref.load %arg1[%c2_44, %c3_45] : memref<3x5xf32, #tpu.memory_space<smem>>
    %148 = vector.broadcast %147 : f32 to vector<16x16xf32>
    %149 = arith.mulf %18, %148 : vector<16x16xf32>
    %150 = arith.addf %146, %149 : vector<16x16xf32>
    %c2_46 = arith.constant 2 : index
    %c4_47 = arith.constant 4 : index
    %151 = memref.load %arg1[%c2_46, %c4_47] : memref<3x5xf32, #tpu.memory_space<smem>>
    %152 = vector.broadcast %151 : f32 to vector<16x16xf32>
    %153 = arith.mulf %19, %152 : vector<16x16xf32>
    %154 = arith.addf %150, %153 : vector<16x16xf32>
    %c2_48 = arith.constant 2 : index
    %155 = memref.load %arg2[%c2_48] : memref<3xf32, #tpu.memory_space<smem>>
    %156 = vector.broadcast %155 : f32 to vector<16x16xf32>
    %157 = arith.addf %154, %156 : vector<16x16xf32>
    %158 = arith.mulf %157, %13 : vector<16x16xf32>
    %159 = vector.shape_cast %158 : vector<16x16xf32> to vector<1x16x16xf32>
    %cst_49 = arith.constant dense<0.000000e+00> : vector<1xf32>
    %160 = vector.multi_reduction <add>, %159, %cst_49 [1, 2] : vector<1x16x16xf32> to vector<1xf32>
    %161 = vector.shape_cast %160 : vector<1xf32> to vector<1x1x1xf32>
    %162 = vector.extract %161[0, 0, 0] : f32 from vector<1x1x1xf32>
    %163 = vector.broadcast %162 : f32 to vector<1x1xf32>
    %164 = arith.mulf %158, %158 : vector<16x16xf32>
    %165 = vector.shape_cast %164 : vector<16x16xf32> to vector<1x16x16xf32>
    %cst_50 = arith.constant dense<0.000000e+00> : vector<1xf32>
    %166 = vector.multi_reduction <add>, %165, %cst_50 [1, 2] : vector<1x16x16xf32> to vector<1xf32>
    %167 = vector.shape_cast %166 : vector<1xf32> to vector<1x1x1xf32>
    %168 = vector.extract %167[0, 0, 0] : f32 from vector<1x1x1xf32>
    %169 = vector.broadcast %168 : f32 to vector<1x1xf32>
    %cst_51 = arith.constant 0.0178571437 : f32
    %170 = vector.broadcast %cst_51 : f32 to vector<1x1xf32>
    %171 = arith.mulf %163, %170 : vector<1x1xf32>
    %cst_52 = arith.constant 0.0178571437 : f32
    %172 = vector.broadcast %cst_52 : f32 to vector<1x1xf32>
    %173 = arith.mulf %169, %172 : vector<1x1xf32>
    %174 = arith.mulf %171, %171 : vector<1x1xf32>
    %175 = arith.subf %173, %174 : vector<1x1xf32>
    %cst_53 = arith.constant 0.000000e+00 : f32
    %176 = vector.broadcast %cst_53 : f32 to vector<1x1xf32>
    %177 = arith.maximumf %175, %176 : vector<1x1xf32>
    %cst_54 = arith.constant 9.99999974E-6 : f32
    %178 = vector.broadcast %cst_54 : f32 to vector<1x1xf32>
    %179 = arith.addf %177, %178 : vector<1x1xf32>
    %180 = math.rsqrt %179 : vector<1x1xf32>
    %c2_55 = arith.constant 2 : index
    %181 = memref.load %arg3[%c2_55] : memref<3xf32, #tpu.memory_space<smem>>
    %182 = vector.broadcast %181 : f32 to vector<1x1xf32>
    %183 = arith.mulf %180, %182 : vector<1x1xf32>
    %184 = vector.broadcast %171 : vector<1x1xf32> to vector<16x16xf32>
    %185 = arith.subf %158, %184 : vector<16x16xf32>
    %186 = vector.broadcast %183 : vector<1x1xf32> to vector<16x16xf32>
    %187 = arith.mulf %185, %186 : vector<16x16xf32>
    %c2_56 = arith.constant 2 : index
    %188 = memref.load %arg4[%c2_56] : memref<3xf32, #tpu.memory_space<smem>>
    %189 = vector.broadcast %188 : f32 to vector<16x16xf32>
    %190 = arith.addf %187, %189 : vector<16x16xf32>
    %cst_57 = arith.constant 0.000000e+00 : f32
    %191 = vector.broadcast %cst_57 : f32 to vector<16x16xf32>
    %192 = arith.maximumf %190, %191 : vector<16x16xf32>
    %193 = arith.mulf %13, %192 : vector<16x16xf32>
    %194 = vector.extract_strided_slice %77 {offsets = [0, 0], sizes = [16, 12], strides = [1, 1]} : vector<16x16xf32> to vector<16x12xf32>
    %195 = vector.extract_strided_slice %77 {offsets = [0, 1], sizes = [16, 12], strides = [1, 1]} : vector<16x16xf32> to vector<16x12xf32>
    %196 = vector.extract_strided_slice %77 {offsets = [0, 2], sizes = [16, 12], strides = [1, 1]} : vector<16x16xf32> to vector<16x12xf32>
    %197 = vector.extract_strided_slice %77 {offsets = [0, 3], sizes = [16, 12], strides = [1, 1]} : vector<16x16xf32> to vector<16x12xf32>
    %198 = vector.extract_strided_slice %77 {offsets = [0, 4], sizes = [16, 12], strides = [1, 1]} : vector<16x16xf32> to vector<16x12xf32>
    %199 = vector.extract_strided_slice %135 {offsets = [0, 0], sizes = [16, 12], strides = [1, 1]} : vector<16x16xf32> to vector<16x12xf32>
    %200 = vector.extract_strided_slice %135 {offsets = [0, 1], sizes = [16, 12], strides = [1, 1]} : vector<16x16xf32> to vector<16x12xf32>
    %201 = vector.extract_strided_slice %135 {offsets = [0, 2], sizes = [16, 12], strides = [1, 1]} : vector<16x16xf32> to vector<16x12xf32>
    %202 = vector.extract_strided_slice %135 {offsets = [0, 3], sizes = [16, 12], strides = [1, 1]} : vector<16x16xf32> to vector<16x12xf32>
    %203 = vector.extract_strided_slice %135 {offsets = [0, 4], sizes = [16, 12], strides = [1, 1]} : vector<16x16xf32> to vector<16x12xf32>
    %204 = vector.extract_strided_slice %193 {offsets = [0, 0], sizes = [16, 12], strides = [1, 1]} : vector<16x16xf32> to vector<16x12xf32>
    %205 = vector.extract_strided_slice %193 {offsets = [0, 1], sizes = [16, 12], strides = [1, 1]} : vector<16x16xf32> to vector<16x12xf32>
    %206 = vector.extract_strided_slice %193 {offsets = [0, 2], sizes = [16, 12], strides = [1, 1]} : vector<16x16xf32> to vector<16x12xf32>
    %207 = vector.extract_strided_slice %193 {offsets = [0, 3], sizes = [16, 12], strides = [1, 1]} : vector<16x16xf32> to vector<16x12xf32>
    %208 = vector.extract_strided_slice %193 {offsets = [0, 4], sizes = [16, 12], strides = [1, 1]} : vector<16x16xf32> to vector<16x12xf32>
    %c0_58 = arith.constant 0 : index
    %c0_59 = arith.constant 0 : index
    %209 = memref.load %arg5[%c0_58, %c0_59] : memref<6x15xf32, #tpu.memory_space<smem>>
    %210 = vector.broadcast %209 : f32 to vector<16x12xf32>
    %211 = arith.mulf %194, %210 : vector<16x12xf32>
    %c0_60 = arith.constant 0 : index
    %212 = memref.load %arg6[%c0_60] : memref<6xf32, #tpu.memory_space<smem>>
    %213 = vector.broadcast %212 : f32 to vector<16x12xf32>
    %214 = arith.addf %211, %213 : vector<16x12xf32>
    %c0_61 = arith.constant 0 : index
    %c1_62 = arith.constant 1 : index
    %215 = memref.load %arg5[%c0_61, %c1_62] : memref<6x15xf32, #tpu.memory_space<smem>>
    %216 = vector.broadcast %215 : f32 to vector<16x12xf32>
    %217 = arith.mulf %195, %216 : vector<16x12xf32>
    %218 = arith.addf %214, %217 : vector<16x12xf32>
    %c0_63 = arith.constant 0 : index
    %c2_64 = arith.constant 2 : index
    %219 = memref.load %arg5[%c0_63, %c2_64] : memref<6x15xf32, #tpu.memory_space<smem>>
    %220 = vector.broadcast %219 : f32 to vector<16x12xf32>
    %221 = arith.mulf %196, %220 : vector<16x12xf32>
    %222 = arith.addf %218, %221 : vector<16x12xf32>
    %c0_65 = arith.constant 0 : index
    %c3_66 = arith.constant 3 : index
    %223 = memref.load %arg5[%c0_65, %c3_66] : memref<6x15xf32, #tpu.memory_space<smem>>
    %224 = vector.broadcast %223 : f32 to vector<16x12xf32>
    %225 = arith.mulf %197, %224 : vector<16x12xf32>
    %226 = arith.addf %222, %225 : vector<16x12xf32>
    %c0_67 = arith.constant 0 : index
    %c4_68 = arith.constant 4 : index
    %227 = memref.load %arg5[%c0_67, %c4_68] : memref<6x15xf32, #tpu.memory_space<smem>>
    %228 = vector.broadcast %227 : f32 to vector<16x12xf32>
    %229 = arith.mulf %198, %228 : vector<16x12xf32>
    %230 = arith.addf %226, %229 : vector<16x12xf32>
    %c0_69 = arith.constant 0 : index
    %c5 = arith.constant 5 : index
    %231 = memref.load %arg5[%c0_69, %c5] : memref<6x15xf32, #tpu.memory_space<smem>>
    %232 = vector.broadcast %231 : f32 to vector<16x12xf32>
    %233 = arith.mulf %199, %232 : vector<16x12xf32>
    %234 = arith.addf %230, %233 : vector<16x12xf32>
    %c0_70 = arith.constant 0 : index
    %c6 = arith.constant 6 : index
    %235 = memref.load %arg5[%c0_70, %c6] : memref<6x15xf32, #tpu.memory_space<smem>>
    %236 = vector.broadcast %235 : f32 to vector<16x12xf32>
    %237 = arith.mulf %200, %236 : vector<16x12xf32>
    %238 = arith.addf %234, %237 : vector<16x12xf32>
    %c0_71 = arith.constant 0 : index
    %c7 = arith.constant 7 : index
    %239 = memref.load %arg5[%c0_71, %c7] : memref<6x15xf32, #tpu.memory_space<smem>>
    %240 = vector.broadcast %239 : f32 to vector<16x12xf32>
    %241 = arith.mulf %201, %240 : vector<16x12xf32>
    %242 = arith.addf %238, %241 : vector<16x12xf32>
    %c0_72 = arith.constant 0 : index
    %c8 = arith.constant 8 : index
    %243 = memref.load %arg5[%c0_72, %c8] : memref<6x15xf32, #tpu.memory_space<smem>>
    %244 = vector.broadcast %243 : f32 to vector<16x12xf32>
    %245 = arith.mulf %202, %244 : vector<16x12xf32>
    %246 = arith.addf %242, %245 : vector<16x12xf32>
    %c0_73 = arith.constant 0 : index
    %c9 = arith.constant 9 : index
    %247 = memref.load %arg5[%c0_73, %c9] : memref<6x15xf32, #tpu.memory_space<smem>>
    %248 = vector.broadcast %247 : f32 to vector<16x12xf32>
    %249 = arith.mulf %203, %248 : vector<16x12xf32>
    %250 = arith.addf %246, %249 : vector<16x12xf32>
    %c0_74 = arith.constant 0 : index
    %c10 = arith.constant 10 : index
    %251 = memref.load %arg5[%c0_74, %c10] : memref<6x15xf32, #tpu.memory_space<smem>>
    %252 = vector.broadcast %251 : f32 to vector<16x12xf32>
    %253 = arith.mulf %204, %252 : vector<16x12xf32>
    %254 = arith.addf %250, %253 : vector<16x12xf32>
    %c0_75 = arith.constant 0 : index
    %c11 = arith.constant 11 : index
    %255 = memref.load %arg5[%c0_75, %c11] : memref<6x15xf32, #tpu.memory_space<smem>>
    %256 = vector.broadcast %255 : f32 to vector<16x12xf32>
    %257 = arith.mulf %205, %256 : vector<16x12xf32>
    %258 = arith.addf %254, %257 : vector<16x12xf32>
    %c0_76 = arith.constant 0 : index
    %c12 = arith.constant 12 : index
    %259 = memref.load %arg5[%c0_76, %c12] : memref<6x15xf32, #tpu.memory_space<smem>>
    %260 = vector.broadcast %259 : f32 to vector<16x12xf32>
    %261 = arith.mulf %206, %260 : vector<16x12xf32>
    %262 = arith.addf %258, %261 : vector<16x12xf32>
    %c0_77 = arith.constant 0 : index
    %c13 = arith.constant 13 : index
    %263 = memref.load %arg5[%c0_77, %c13] : memref<6x15xf32, #tpu.memory_space<smem>>
    %264 = vector.broadcast %263 : f32 to vector<16x12xf32>
    %265 = arith.mulf %207, %264 : vector<16x12xf32>
    %266 = arith.addf %262, %265 : vector<16x12xf32>
    %c0_78 = arith.constant 0 : index
    %c14 = arith.constant 14 : index
    %267 = memref.load %arg5[%c0_78, %c14] : memref<6x15xf32, #tpu.memory_space<smem>>
    %268 = vector.broadcast %267 : f32 to vector<16x12xf32>
    %269 = arith.mulf %208, %268 : vector<16x12xf32>
    %270 = arith.addf %266, %269 : vector<16x12xf32>
    %271 = arith.mulf %270, %14 : vector<16x12xf32>
    %272 = vector.shape_cast %271 : vector<16x12xf32> to vector<1x16x12xf32>
    %cst_79 = arith.constant dense<0.000000e+00> : vector<1xf32>
    %273 = vector.multi_reduction <add>, %272, %cst_79 [1, 2] : vector<1x16x12xf32> to vector<1xf32>
    %274 = vector.shape_cast %273 : vector<1xf32> to vector<1x1x1xf32>
    %275 = vector.extract %274[0, 0, 0] : f32 from vector<1x1x1xf32>
    %276 = vector.broadcast %275 : f32 to vector<1x1xf32>
    %277 = arith.mulf %271, %271 : vector<16x12xf32>
    %278 = vector.shape_cast %277 : vector<16x12xf32> to vector<1x16x12xf32>
    %cst_80 = arith.constant dense<0.000000e+00> : vector<1xf32>
    %279 = vector.multi_reduction <add>, %278, %cst_80 [1, 2] : vector<1x16x12xf32> to vector<1xf32>
    %280 = vector.shape_cast %279 : vector<1xf32> to vector<1x1x1xf32>
    %281 = vector.extract %280[0, 0, 0] : f32 from vector<1x1x1xf32>
    %282 = vector.broadcast %281 : f32 to vector<1x1xf32>
    %cst_81 = arith.constant 0.020833334 : f32
    %283 = vector.broadcast %cst_81 : f32 to vector<1x1xf32>
    %284 = arith.mulf %276, %283 : vector<1x1xf32>
    %cst_82 = arith.constant 0.020833334 : f32
    %285 = vector.broadcast %cst_82 : f32 to vector<1x1xf32>
    %286 = arith.mulf %282, %285 : vector<1x1xf32>
    %287 = arith.mulf %284, %284 : vector<1x1xf32>
    %288 = arith.subf %286, %287 : vector<1x1xf32>
    %cst_83 = arith.constant 0.000000e+00 : f32
    %289 = vector.broadcast %cst_83 : f32 to vector<1x1xf32>
    %290 = arith.maximumf %288, %289 : vector<1x1xf32>
    %cst_84 = arith.constant 9.99999974E-6 : f32
    %291 = vector.broadcast %cst_84 : f32 to vector<1x1xf32>
    %292 = arith.addf %290, %291 : vector<1x1xf32>
    %293 = math.rsqrt %292 : vector<1x1xf32>
    %c0_85 = arith.constant 0 : index
    %294 = memref.load %arg7[%c0_85] : memref<6xf32, #tpu.memory_space<smem>>
    %295 = vector.broadcast %294 : f32 to vector<1x1xf32>
    %296 = arith.mulf %293, %295 : vector<1x1xf32>
    %297 = vector.broadcast %284 : vector<1x1xf32> to vector<16x12xf32>
    %298 = arith.subf %271, %297 : vector<16x12xf32>
    %299 = vector.broadcast %296 : vector<1x1xf32> to vector<16x12xf32>
    %300 = arith.mulf %298, %299 : vector<16x12xf32>
    %c0_86 = arith.constant 0 : index
    %301 = memref.load %arg8[%c0_86] : memref<6xf32, #tpu.memory_space<smem>>
    %302 = vector.broadcast %301 : f32 to vector<16x12xf32>
    %303 = arith.addf %300, %302 : vector<16x12xf32>
    %cst_87 = arith.constant 0.000000e+00 : f32
    %304 = vector.broadcast %cst_87 : f32 to vector<16x12xf32>
    %305 = arith.maximumf %303, %304 : vector<16x12xf32>
    %306 = arith.truncf %305 : vector<16x12xf32> to vector<16x12xbf16>
    %c0_88 = arith.constant 0 : index
    %c0_89 = arith.constant 0 : index
    %307 = vector.load %arg9[%c0_88, %c0_89] : memref<16x128xbf16, #tpu.memory_space<vmem>>, vector<16x12xbf16>
    tpu.vector_store %arg9[%c0_88, %c0_89], %306 {strides = array<i32>} : memref<16x128xbf16, #tpu.memory_space<vmem>>, vector<16x12xbf16>,
    %c1_90 = arith.constant 1 : index
    %c0_91 = arith.constant 0 : index
    %308 = memref.load %arg5[%c1_90, %c0_91] : memref<6x15xf32, #tpu.memory_space<smem>>
    %309 = vector.broadcast %308 : f32 to vector<16x12xf32>
    %310 = arith.mulf %194, %309 : vector<16x12xf32>
    %c1_92 = arith.constant 1 : index
    %311 = memref.load %arg6[%c1_92] : memref<6xf32, #tpu.memory_space<smem>>
    %312 = vector.broadcast %311 : f32 to vector<16x12xf32>
    %313 = arith.addf %310, %312 : vector<16x12xf32>
    %c1_93 = arith.constant 1 : index
    %c1_94 = arith.constant 1 : index
    %314 = memref.load %arg5[%c1_93, %c1_94] : memref<6x15xf32, #tpu.memory_space<smem>>
    %315 = vector.broadcast %314 : f32 to vector<16x12xf32>
    %316 = arith.mulf %195, %315 : vector<16x12xf32>
    %317 = arith.addf %313, %316 : vector<16x12xf32>
    %c1_95 = arith.constant 1 : index
    %c2_96 = arith.constant 2 : index
    %318 = memref.load %arg5[%c1_95, %c2_96] : memref<6x15xf32, #tpu.memory_space<smem>>
    %319 = vector.broadcast %318 : f32 to vector<16x12xf32>
    %320 = arith.mulf %196, %319 : vector<16x12xf32>
    %321 = arith.addf %317, %320 : vector<16x12xf32>
    %c1_97 = arith.constant 1 : index
    %c3_98 = arith.constant 3 : index
    %322 = memref.load %arg5[%c1_97, %c3_98] : memref<6x15xf32, #tpu.memory_space<smem>>
    %323 = vector.broadcast %322 : f32 to vector<16x12xf32>
    %324 = arith.mulf %197, %323 : vector<16x12xf32>
    %325 = arith.addf %321, %324 : vector<16x12xf32>
    %c1_99 = arith.constant 1 : index
    %c4_100 = arith.constant 4 : index
    %326 = memref.load %arg5[%c1_99, %c4_100] : memref<6x15xf32, #tpu.memory_space<smem>>
    %327 = vector.broadcast %326 : f32 to vector<16x12xf32>
    %328 = arith.mulf %198, %327 : vector<16x12xf32>
    %329 = arith.addf %325, %328 : vector<16x12xf32>
    %c1_101 = arith.constant 1 : index
    %c5_102 = arith.constant 5 : index
    %330 = memref.load %arg5[%c1_101, %c5_102] : memref<6x15xf32, #tpu.memory_space<smem>>
    %331 = vector.broadcast %330 : f32 to vector<16x12xf32>
    %332 = arith.mulf %199, %331 : vector<16x12xf32>
    %333 = arith.addf %329, %332 : vector<16x12xf32>
    %c1_103 = arith.constant 1 : index
    %c6_104 = arith.constant 6 : index
    %334 = memref.load %arg5[%c1_103, %c6_104] : memref<6x15xf32, #tpu.memory_space<smem>>
    %335 = vector.broadcast %334 : f32 to vector<16x12xf32>
    %336 = arith.mulf %200, %335 : vector<16x12xf32>
    %337 = arith.addf %333, %336 : vector<16x12xf32>
    %c1_105 = arith.constant 1 : index
    %c7_106 = arith.constant 7 : index
    %338 = memref.load %arg5[%c1_105, %c7_106] : memref<6x15xf32, #tpu.memory_space<smem>>
    %339 = vector.broadcast %338 : f32 to vector<16x12xf32>
    %340 = arith.mulf %201, %339 : vector<16x12xf32>
    %341 = arith.addf %337, %340 : vector<16x12xf32>
    %c1_107 = arith.constant 1 : index
    %c8_108 = arith.constant 8 : index
    %342 = memref.load %arg5[%c1_107, %c8_108] : memref<6x15xf32, #tpu.memory_space<smem>>
    %343 = vector.broadcast %342 : f32 to vector<16x12xf32>
    %344 = arith.mulf %202, %343 : vector<16x12xf32>
    %345 = arith.addf %341, %344 : vector<16x12xf32>
    %c1_109 = arith.constant 1 : index
    %c9_110 = arith.constant 9 : index
    %346 = memref.load %arg5[%c1_109, %c9_110] : memref<6x15xf32, #tpu.memory_space<smem>>
    %347 = vector.broadcast %346 : f32 to vector<16x12xf32>
    %348 = arith.mulf %203, %347 : vector<16x12xf32>
    %349 = arith.addf %345, %348 : vector<16x12xf32>
    %c1_111 = arith.constant 1 : index
    %c10_112 = arith.constant 10 : index
    %350 = memref.load %arg5[%c1_111, %c10_112] : memref<6x15xf32, #tpu.memory_space<smem>>
    %351 = vector.broadcast %350 : f32 to vector<16x12xf32>
    %352 = arith.mulf %204, %351 : vector<16x12xf32>
    %353 = arith.addf %349, %352 : vector<16x12xf32>
    %c1_113 = arith.constant 1 : index
    %c11_114 = arith.constant 11 : index
    %354 = memref.load %arg5[%c1_113, %c11_114] : memref<6x15xf32, #tpu.memory_space<smem>>
    %355 = vector.broadcast %354 : f32 to vector<16x12xf32>
    %356 = arith.mulf %205, %355 : vector<16x12xf32>
    %357 = arith.addf %353, %356 : vector<16x12xf32>
    %c1_115 = arith.constant 1 : index
    %c12_116 = arith.constant 12 : index
    %358 = memref.load %arg5[%c1_115, %c12_116] : memref<6x15xf32, #tpu.memory_space<smem>>
    %359 = vector.broadcast %358 : f32 to vector<16x12xf32>
    %360 = arith.mulf %206, %359 : vector<16x12xf32>
    %361 = arith.addf %357, %360 : vector<16x12xf32>
    %c1_117 = arith.constant 1 : index
    %c13_118 = arith.constant 13 : index
    %362 = memref.load %arg5[%c1_117, %c13_118] : memref<6x15xf32, #tpu.memory_space<smem>>
    %363 = vector.broadcast %362 : f32 to vector<16x12xf32>
    %364 = arith.mulf %207, %363 : vector<16x12xf32>
    %365 = arith.addf %361, %364 : vector<16x12xf32>
    %c1_119 = arith.constant 1 : index
    %c14_120 = arith.constant 14 : index
    %366 = memref.load %arg5[%c1_119, %c14_120] : memref<6x15xf32, #tpu.memory_space<smem>>
    %367 = vector.broadcast %366 : f32 to vector<16x12xf32>
    %368 = arith.mulf %208, %367 : vector<16x12xf32>
    %369 = arith.addf %365, %368 : vector<16x12xf32>
    %370 = arith.mulf %369, %14 : vector<16x12xf32>
    %371 = vector.shape_cast %370 : vector<16x12xf32> to vector<1x16x12xf32>
    %cst_121 = arith.constant dense<0.000000e+00> : vector<1xf32>
    %372 = vector.multi_reduction <add>, %371, %cst_121 [1, 2] : vector<1x16x12xf32> to vector<1xf32>
    %373 = vector.shape_cast %372 : vector<1xf32> to vector<1x1x1xf32>
    %374 = vector.extract %373[0, 0, 0] : f32 from vector<1x1x1xf32>
    %375 = vector.broadcast %374 : f32 to vector<1x1xf32>
    %376 = arith.mulf %370, %370 : vector<16x12xf32>
    %377 = vector.shape_cast %376 : vector<16x12xf32> to vector<1x16x12xf32>
    %cst_122 = arith.constant dense<0.000000e+00> : vector<1xf32>
    %378 = vector.multi_reduction <add>, %377, %cst_122 [1, 2] : vector<1x16x12xf32> to vector<1xf32>
    %379 = vector.shape_cast %378 : vector<1xf32> to vector<1x1x1xf32>
    %380 = vector.extract %379[0, 0, 0] : f32 from vector<1x1x1xf32>
    %381 = vector.broadcast %380 : f32 to vector<1x1xf32>
    %cst_123 = arith.constant 0.020833334 : f32
    %382 = vector.broadcast %cst_123 : f32 to vector<1x1xf32>
    %383 = arith.mulf %375, %382 : vector<1x1xf32>
    %cst_124 = arith.constant 0.020833334 : f32
    %384 = vector.broadcast %cst_124 : f32 to vector<1x1xf32>
    %385 = arith.mulf %381, %384 : vector<1x1xf32>
    %386 = arith.mulf %383, %383 : vector<1x1xf32>
    %387 = arith.subf %385, %386 : vector<1x1xf32>
    %cst_125 = arith.constant 0.000000e+00 : f32
    %388 = vector.broadcast %cst_125 : f32 to vector<1x1xf32>
    %389 = arith.maximumf %387, %388 : vector<1x1xf32>
    %cst_126 = arith.constant 9.99999974E-6 : f32
    %390 = vector.broadcast %cst_126 : f32 to vector<1x1xf32>
    %391 = arith.addf %389, %390 : vector<1x1xf32>
    %392 = math.rsqrt %391 : vector<1x1xf32>
    %c1_127 = arith.constant 1 : index
    %393 = memref.load %arg7[%c1_127] : memref<6xf32, #tpu.memory_space<smem>>
    %394 = vector.broadcast %393 : f32 to vector<1x1xf32>
    %395 = arith.mulf %392, %394 : vector<1x1xf32>
    %396 = vector.broadcast %383 : vector<1x1xf32> to vector<16x12xf32>
    %397 = arith.subf %370, %396 : vector<16x12xf32>
    %398 = vector.broadcast %395 : vector<1x1xf32> to vector<16x12xf32>
    %399 = arith.mulf %397, %398 : vector<16x12xf32>
    %c1_128 = arith.constant 1 : index
    %400 = memref.load %arg8[%c1_128] : memref<6xf32, #tpu.memory_space<smem>>
    %401 = vector.broadcast %400 : f32 to vector<16x12xf32>
    %402 = arith.addf %399, %401 : vector<16x12xf32>
    %cst_129 = arith.constant 0.000000e+00 : f32
    %403 = vector.broadcast %cst_129 : f32 to vector<16x12xf32>
    %404 = arith.maximumf %402, %403 : vector<16x12xf32>
    %405 = arith.truncf %404 : vector<16x12xf32> to vector<16x12xbf16>
    %c0_130 = arith.constant 0 : index
    %c12_131 = arith.constant 12 : index
    %406 = vector.load %arg9[%c0_130, %c12_131] : memref<16x128xbf16, #tpu.memory_space<vmem>>, vector<16x12xbf16>
    tpu.vector_store %arg9[%c0_130, %c12_131], %405 {strides = array<i32>} : memref<16x128xbf16, #tpu.memory_space<vmem>>, vector<16x12xbf16>,
    %c2_132 = arith.constant 2 : index
    %c0_133 = arith.constant 0 : index
    %407 = memref.load %arg5[%c2_132, %c0_133] : memref<6x15xf32, #tpu.memory_space<smem>>
    %408 = vector.broadcast %407 : f32 to vector<16x12xf32>
    %409 = arith.mulf %194, %408 : vector<16x12xf32>
    %c2_134 = arith.constant 2 : index
    %410 = memref.load %arg6[%c2_134] : memref<6xf32, #tpu.memory_space<smem>>
    %411 = vector.broadcast %410 : f32 to vector<16x12xf32>
    %412 = arith.addf %409, %411 : vector<16x12xf32>
    %c2_135 = arith.constant 2 : index
    %c1_136 = arith.constant 1 : index
    %413 = memref.load %arg5[%c2_135, %c1_136] : memref<6x15xf32, #tpu.memory_space<smem>>
    %414 = vector.broadcast %413 : f32 to vector<16x12xf32>
    %415 = arith.mulf %195, %414 : vector<16x12xf32>
    %416 = arith.addf %412, %415 : vector<16x12xf32>
    %c2_137 = arith.constant 2 : index
    %c2_138 = arith.constant 2 : index
    %417 = memref.load %arg5[%c2_137, %c2_138] : memref<6x15xf32, #tpu.memory_space<smem>>
    %418 = vector.broadcast %417 : f32 to vector<16x12xf32>
    %419 = arith.mulf %196, %418 : vector<16x12xf32>
    %420 = arith.addf %416, %419 : vector<16x12xf32>
    %c2_139 = arith.constant 2 : index
    %c3_140 = arith.constant 3 : index
    %421 = memref.load %arg5[%c2_139, %c3_140] : memref<6x15xf32, #tpu.memory_space<smem>>
    %422 = vector.broadcast %421 : f32 to vector<16x12xf32>
    %423 = arith.mulf %197, %422 : vector<16x12xf32>
    %424 = arith.addf %420, %423 : vector<16x12xf32>
    %c2_141 = arith.constant 2 : index
    %c4_142 = arith.constant 4 : index
    %425 = memref.load %arg5[%c2_141, %c4_142] : memref<6x15xf32, #tpu.memory_space<smem>>
    %426 = vector.broadcast %425 : f32 to vector<16x12xf32>
    %427 = arith.mulf %198, %426 : vector<16x12xf32>
    %428 = arith.addf %424, %427 : vector<16x12xf32>
    %c2_143 = arith.constant 2 : index
    %c5_144 = arith.constant 5 : index
    %429 = memref.load %arg5[%c2_143, %c5_144] : memref<6x15xf32, #tpu.memory_space<smem>>
    %430 = vector.broadcast %429 : f32 to vector<16x12xf32>
    %431 = arith.mulf %199, %430 : vector<16x12xf32>
    %432 = arith.addf %428, %431 : vector<16x12xf32>
    %c2_145 = arith.constant 2 : index
    %c6_146 = arith.constant 6 : index
    %433 = memref.load %arg5[%c2_145, %c6_146] : memref<6x15xf32, #tpu.memory_space<smem>>
    %434 = vector.broadcast %433 : f32 to vector<16x12xf32>
    %435 = arith.mulf %200, %434 : vector<16x12xf32>
    %436 = arith.addf %432, %435 : vector<16x12xf32>
    %c2_147 = arith.constant 2 : index
    %c7_148 = arith.constant 7 : index
    %437 = memref.load %arg5[%c2_147, %c7_148] : memref<6x15xf32, #tpu.memory_space<smem>>
    %438 = vector.broadcast %437 : f32 to vector<16x12xf32>
    %439 = arith.mulf %201, %438 : vector<16x12xf32>
    %440 = arith.addf %436, %439 : vector<16x12xf32>
    %c2_149 = arith.constant 2 : index
    %c8_150 = arith.constant 8 : index
    %441 = memref.load %arg5[%c2_149, %c8_150] : memref<6x15xf32, #tpu.memory_space<smem>>
    %442 = vector.broadcast %441 : f32 to vector<16x12xf32>
    %443 = arith.mulf %202, %442 : vector<16x12xf32>
    %444 = arith.addf %440, %443 : vector<16x12xf32>
    %c2_151 = arith.constant 2 : index
    %c9_152 = arith.constant 9 : index
    %445 = memref.load %arg5[%c2_151, %c9_152] : memref<6x15xf32, #tpu.memory_space<smem>>
    %446 = vector.broadcast %445 : f32 to vector<16x12xf32>
    %447 = arith.mulf %203, %446 : vector<16x12xf32>
    %448 = arith.addf %444, %447 : vector<16x12xf32>
    %c2_153 = arith.constant 2 : index
    %c10_154 = arith.constant 10 : index
    %449 = memref.load %arg5[%c2_153, %c10_154] : memref<6x15xf32, #tpu.memory_space<smem>>
    %450 = vector.broadcast %449 : f32 to vector<16x12xf32>
    %451 = arith.mulf %204, %450 : vector<16x12xf32>
    %452 = arith.addf %448, %451 : vector<16x12xf32>
    %c2_155 = arith.constant 2 : index
    %c11_156 = arith.constant 11 : index
    %453 = memref.load %arg5[%c2_155, %c11_156] : memref<6x15xf32, #tpu.memory_space<smem>>
    %454 = vector.broadcast %453 : f32 to vector<16x12xf32>
    %455 = arith.mulf %205, %454 : vector<16x12xf32>
    %456 = arith.addf %452, %455 : vector<16x12xf32>
    %c2_157 = arith.constant 2 : index
    %c12_158 = arith.constant 12 : index
    %457 = memref.load %arg5[%c2_157, %c12_158] : memref<6x15xf32, #tpu.memory_space<smem>>
    %458 = vector.broadcast %457 : f32 to vector<16x12xf32>
    %459 = arith.mulf %206, %458 : vector<16x12xf32>
    %460 = arith.addf %456, %459 : vector<16x12xf32>
    %c2_159 = arith.constant 2 : index
    %c13_160 = arith.constant 13 : index
    %461 = memref.load %arg5[%c2_159, %c13_160] : memref<6x15xf32, #tpu.memory_space<smem>>
    %462 = vector.broadcast %461 : f32 to vector<16x12xf32>
    %463 = arith.mulf %207, %462 : vector<16x12xf32>
    %464 = arith.addf %460, %463 : vector<16x12xf32>
    %c2_161 = arith.constant 2 : index
    %c14_162 = arith.constant 14 : index
    %465 = memref.load %arg5[%c2_161, %c14_162] : memref<6x15xf32, #tpu.memory_space<smem>>
    %466 = vector.broadcast %465 : f32 to vector<16x12xf32>
    %467 = arith.mulf %208, %466 : vector<16x12xf32>
    %468 = arith.addf %464, %467 : vector<16x12xf32>
    %469 = arith.mulf %468, %14 : vector<16x12xf32>
    %470 = vector.shape_cast %469 : vector<16x12xf32> to vector<1x16x12xf32>
    %cst_163 = arith.constant dense<0.000000e+00> : vector<1xf32>
    %471 = vector.multi_reduction <add>, %470, %cst_163 [1, 2] : vector<1x16x12xf32> to vector<1xf32>
    %472 = vector.shape_cast %471 : vector<1xf32> to vector<1x1x1xf32>
    %473 = vector.extract %472[0, 0, 0] : f32 from vector<1x1x1xf32>
    %474 = vector.broadcast %473 : f32 to vector<1x1xf32>
    %475 = arith.mulf %469, %469 : vector<16x12xf32>
    %476 = vector.shape_cast %475 : vector<16x12xf32> to vector<1x16x12xf32>
    %cst_164 = arith.constant dense<0.000000e+00> : vector<1xf32>
    %477 = vector.multi_reduction <add>, %476, %cst_164 [1, 2] : vector<1x16x12xf32> to vector<1xf32>
    %478 = vector.shape_cast %477 : vector<1xf32> to vector<1x1x1xf32>
    %479 = vector.extract %478[0, 0, 0] : f32 from vector<1x1x1xf32>
    %480 = vector.broadcast %479 : f32 to vector<1x1xf32>
    %cst_165 = arith.constant 0.020833334 : f32
    %481 = vector.broadcast %cst_165 : f32 to vector<1x1xf32>
    %482 = arith.mulf %474, %481 : vector<1x1xf32>
    %cst_166 = arith.constant 0.020833334 : f32
    %483 = vector.broadcast %cst_166 : f32 to vector<1x1xf32>
    %484 = arith.mulf %480, %483 : vector<1x1xf32>
    %485 = arith.mulf %482, %482 : vector<1x1xf32>
    %486 = arith.subf %484, %485 : vector<1x1xf32>
    %cst_167 = arith.constant 0.000000e+00 : f32
    %487 = vector.broadcast %cst_167 : f32 to vector<1x1xf32>
    %488 = arith.maximumf %486, %487 : vector<1x1xf32>
    %cst_168 = arith.constant 9.99999974E-6 : f32
    %489 = vector.broadcast %cst_168 : f32 to vector<1x1xf32>
    %490 = arith.addf %488, %489 : vector<1x1xf32>
    %491 = math.rsqrt %490 : vector<1x1xf32>
    %c2_169 = arith.constant 2 : index
    %492 = memref.load %arg7[%c2_169] : memref<6xf32, #tpu.memory_space<smem>>
    %493 = vector.broadcast %492 : f32 to vector<1x1xf32>
    %494 = arith.mulf %491, %493 : vector<1x1xf32>
    %495 = vector.broadcast %482 : vector<1x1xf32> to vector<16x12xf32>
    %496 = arith.subf %469, %495 : vector<16x12xf32>
    %497 = vector.broadcast %494 : vector<1x1xf32> to vector<16x12xf32>
    %498 = arith.mulf %496, %497 : vector<16x12xf32>
    %c2_170 = arith.constant 2 : index
    %499 = memref.load %arg8[%c2_170] : memref<6xf32, #tpu.memory_space<smem>>
    %500 = vector.broadcast %499 : f32 to vector<16x12xf32>
    %501 = arith.addf %498, %500 : vector<16x12xf32>
    %cst_171 = arith.constant 0.000000e+00 : f32
    %502 = vector.broadcast %cst_171 : f32 to vector<16x12xf32>
    %503 = arith.maximumf %501, %502 : vector<16x12xf32>
    %504 = arith.truncf %503 : vector<16x12xf32> to vector<16x12xbf16>
    %c0_172 = arith.constant 0 : index
    %c24 = arith.constant 24 : index
    %505 = vector.load %arg9[%c0_172, %c24] : memref<16x128xbf16, #tpu.memory_space<vmem>>, vector<16x12xbf16>
    tpu.vector_store %arg9[%c0_172, %c24], %504 {strides = array<i32>} : memref<16x128xbf16, #tpu.memory_space<vmem>>, vector<16x12xbf16>,
    %c3_173 = arith.constant 3 : index
    %c0_174 = arith.constant 0 : index
    %506 = memref.load %arg5[%c3_173, %c0_174] : memref<6x15xf32, #tpu.memory_space<smem>>
    %507 = vector.broadcast %506 : f32 to vector<16x12xf32>
    %508 = arith.mulf %194, %507 : vector<16x12xf32>
    %c3_175 = arith.constant 3 : index
    %509 = memref.load %arg6[%c3_175] : memref<6xf32, #tpu.memory_space<smem>>
    %510 = vector.broadcast %509 : f32 to vector<16x12xf32>
    %511 = arith.addf %508, %510 : vector<16x12xf32>
    %c3_176 = arith.constant 3 : index
    %c1_177 = arith.constant 1 : index
    %512 = memref.load %arg5[%c3_176, %c1_177] : memref<6x15xf32, #tpu.memory_space<smem>>
    %513 = vector.broadcast %512 : f32 to vector<16x12xf32>
    %514 = arith.mulf %195, %513 : vector<16x12xf32>
    %515 = arith.addf %511, %514 : vector<16x12xf32>
    %c3_178 = arith.constant 3 : index
    %c2_179 = arith.constant 2 : index
    %516 = memref.load %arg5[%c3_178, %c2_179] : memref<6x15xf32, #tpu.memory_space<smem>>
    %517 = vector.broadcast %516 : f32 to vector<16x12xf32>
    %518 = arith.mulf %196, %517 : vector<16x12xf32>
    %519 = arith.addf %515, %518 : vector<16x12xf32>
    %c3_180 = arith.constant 3 : index
    %c3_181 = arith.constant 3 : index
    %520 = memref.load %arg5[%c3_180, %c3_181] : memref<6x15xf32, #tpu.memory_space<smem>>
    %521 = vector.broadcast %520 : f32 to vector<16x12xf32>
    %522 = arith.mulf %197, %521 : vector<16x12xf32>
    %523 = arith.addf %519, %522 : vector<16x12xf32>
    %c3_182 = arith.constant 3 : index
    %c4_183 = arith.constant 4 : index
    %524 = memref.load %arg5[%c3_182, %c4_183] : memref<6x15xf32, #tpu.memory_space<smem>>
    %525 = vector.broadcast %524 : f32 to vector<16x12xf32>
    %526 = arith.mulf %198, %525 : vector<16x12xf32>
    %527 = arith.addf %523, %526 : vector<16x12xf32>
    %c3_184 = arith.constant 3 : index
    %c5_185 = arith.constant 5 : index
    %528 = memref.load %arg5[%c3_184, %c5_185] : memref<6x15xf32, #tpu.memory_space<smem>>
    %529 = vector.broadcast %528 : f32 to vector<16x12xf32>
    %530 = arith.mulf %199, %529 : vector<16x12xf32>
    %531 = arith.addf %527, %530 : vector<16x12xf32>
    %c3_186 = arith.constant 3 : index
    %c6_187 = arith.constant 6 : index
    %532 = memref.load %arg5[%c3_186, %c6_187] : memref<6x15xf32, #tpu.memory_space<smem>>
    %533 = vector.broadcast %532 : f32 to vector<16x12xf32>
    %534 = arith.mulf %200, %533 : vector<16x12xf32>
    %535 = arith.addf %531, %534 : vector<16x12xf32>
    %c3_188 = arith.constant 3 : index
    %c7_189 = arith.constant 7 : index
    %536 = memref.load %arg5[%c3_188, %c7_189] : memref<6x15xf32, #tpu.memory_space<smem>>
    %537 = vector.broadcast %536 : f32 to vector<16x12xf32>
    %538 = arith.mulf %201, %537 : vector<16x12xf32>
    %539 = arith.addf %535, %538 : vector<16x12xf32>
    %c3_190 = arith.constant 3 : index
    %c8_191 = arith.constant 8 : index
    %540 = memref.load %arg5[%c3_190, %c8_191] : memref<6x15xf32, #tpu.memory_space<smem>>
    %541 = vector.broadcast %540 : f32 to vector<16x12xf32>
    %542 = arith.mulf %202, %541 : vector<16x12xf32>
    %543 = arith.addf %539, %542 : vector<16x12xf32>
    %c3_192 = arith.constant 3 : index
    %c9_193 = arith.constant 9 : index
    %544 = memref.load %arg5[%c3_192, %c9_193] : memref<6x15xf32, #tpu.memory_space<smem>>
    %545 = vector.broadcast %544 : f32 to vector<16x12xf32>
    %546 = arith.mulf %203, %545 : vector<16x12xf32>
    %547 = arith.addf %543, %546 : vector<16x12xf32>
    %c3_194 = arith.constant 3 : index
    %c10_195 = arith.constant 10 : index
    %548 = memref.load %arg5[%c3_194, %c10_195] : memref<6x15xf32, #tpu.memory_space<smem>>
    %549 = vector.broadcast %548 : f32 to vector<16x12xf32>
    %550 = arith.mulf %204, %549 : vector<16x12xf32>
    %551 = arith.addf %547, %550 : vector<16x12xf32>
    %c3_196 = arith.constant 3 : index
    %c11_197 = arith.constant 11 : index
    %552 = memref.load %arg5[%c3_196, %c11_197] : memref<6x15xf32, #tpu.memory_space<smem>>
    %553 = vector.broadcast %552 : f32 to vector<16x12xf32>
    %554 = arith.mulf %205, %553 : vector<16x12xf32>
    %555 = arith.addf %551, %554 : vector<16x12xf32>
    %c3_198 = arith.constant 3 : index
    %c12_199 = arith.constant 12 : index
    %556 = memref.load %arg5[%c3_198, %c12_199] : memref<6x15xf32, #tpu.memory_space<smem>>
    %557 = vector.broadcast %556 : f32 to vector<16x12xf32>
    %558 = arith.mulf %206, %557 : vector<16x12xf32>
    %559 = arith.addf %555, %558 : vector<16x12xf32>
    %c3_200 = arith.constant 3 : index
    %c13_201 = arith.constant 13 : index
    %560 = memref.load %arg5[%c3_200, %c13_201] : memref<6x15xf32, #tpu.memory_space<smem>>
    %561 = vector.broadcast %560 : f32 to vector<16x12xf32>
    %562 = arith.mulf %207, %561 : vector<16x12xf32>
    %563 = arith.addf %559, %562 : vector<16x12xf32>
    %c3_202 = arith.constant 3 : index
    %c14_203 = arith.constant 14 : index
    %564 = memref.load %arg5[%c3_202, %c14_203] : memref<6x15xf32, #tpu.memory_space<smem>>
    %565 = vector.broadcast %564 : f32 to vector<16x12xf32>
    %566 = arith.mulf %208, %565 : vector<16x12xf32>
    %567 = arith.addf %563, %566 : vector<16x12xf32>
    %568 = arith.mulf %567, %14 : vector<16x12xf32>
    %569 = vector.shape_cast %568 : vector<16x12xf32> to vector<1x16x12xf32>
    %cst_204 = arith.constant dense<0.000000e+00> : vector<1xf32>
    %570 = vector.multi_reduction <add>, %569, %cst_204 [1, 2] : vector<1x16x12xf32> to vector<1xf32>
    %571 = vector.shape_cast %570 : vector<1xf32> to vector<1x1x1xf32>
    %572 = vector.extract %571[0, 0, 0] : f32 from vector<1x1x1xf32>
    %573 = vector.broadcast %572 : f32 to vector<1x1xf32>
    %574 = arith.mulf %568, %568 : vector<16x12xf32>
    %575 = vector.shape_cast %574 : vector<16x12xf32> to vector<1x16x12xf32>
    %cst_205 = arith.constant dense<0.000000e+00> : vector<1xf32>
    %576 = vector.multi_reduction <add>, %575, %cst_205 [1, 2] : vector<1x16x12xf32> to vector<1xf32>
    %577 = vector.shape_cast %576 : vector<1xf32> to vector<1x1x1xf32>
    %578 = vector.extract %577[0, 0, 0] : f32 from vector<1x1x1xf32>
    %579 = vector.broadcast %578 : f32 to vector<1x1xf32>
    %cst_206 = arith.constant 0.020833334 : f32
    %580 = vector.broadcast %cst_206 : f32 to vector<1x1xf32>
    %581 = arith.mulf %573, %580 : vector<1x1xf32>
    %cst_207 = arith.constant 0.020833334 : f32
    %582 = vector.broadcast %cst_207 : f32 to vector<1x1xf32>
    %583 = arith.mulf %579, %582 : vector<1x1xf32>
    %584 = arith.mulf %581, %581 : vector<1x1xf32>
    %585 = arith.subf %583, %584 : vector<1x1xf32>
    %cst_208 = arith.constant 0.000000e+00 : f32
    %586 = vector.broadcast %cst_208 : f32 to vector<1x1xf32>
    %587 = arith.maximumf %585, %586 : vector<1x1xf32>
    %cst_209 = arith.constant 9.99999974E-6 : f32
    %588 = vector.broadcast %cst_209 : f32 to vector<1x1xf32>
    %589 = arith.addf %587, %588 : vector<1x1xf32>
    %590 = math.rsqrt %589 : vector<1x1xf32>
    %c3_210 = arith.constant 3 : index
    %591 = memref.load %arg7[%c3_210] : memref<6xf32, #tpu.memory_space<smem>>
    %592 = vector.broadcast %591 : f32 to vector<1x1xf32>
    %593 = arith.mulf %590, %592 : vector<1x1xf32>
    %594 = vector.broadcast %581 : vector<1x1xf32> to vector<16x12xf32>
    %595 = arith.subf %568, %594 : vector<16x12xf32>
    %596 = vector.broadcast %593 : vector<1x1xf32> to vector<16x12xf32>
    %597 = arith.mulf %595, %596 : vector<16x12xf32>
    %c3_211 = arith.constant 3 : index
    %598 = memref.load %arg8[%c3_211] : memref<6xf32, #tpu.memory_space<smem>>
    %599 = vector.broadcast %598 : f32 to vector<16x12xf32>
    %600 = arith.addf %597, %599 : vector<16x12xf32>
    %cst_212 = arith.constant 0.000000e+00 : f32
    %601 = vector.broadcast %cst_212 : f32 to vector<16x12xf32>
    %602 = arith.maximumf %600, %601 : vector<16x12xf32>
    %603 = arith.truncf %602 : vector<16x12xf32> to vector<16x12xbf16>
    %c0_213 = arith.constant 0 : index
    %c36 = arith.constant 36 : index
    %604 = vector.load %arg9[%c0_213, %c36] : memref<16x128xbf16, #tpu.memory_space<vmem>>, vector<16x12xbf16>
    tpu.vector_store %arg9[%c0_213, %c36], %603 {strides = array<i32>} : memref<16x128xbf16, #tpu.memory_space<vmem>>, vector<16x12xbf16>,
    %c4_214 = arith.constant 4 : index
    %c0_215 = arith.constant 0 : index
    %605 = memref.load %arg5[%c4_214, %c0_215] : memref<6x15xf32, #tpu.memory_space<smem>>
    %606 = vector.broadcast %605 : f32 to vector<16x12xf32>
    %607 = arith.mulf %194, %606 : vector<16x12xf32>
    %c4_216 = arith.constant 4 : index
    %608 = memref.load %arg6[%c4_216] : memref<6xf32, #tpu.memory_space<smem>>
    %609 = vector.broadcast %608 : f32 to vector<16x12xf32>
    %610 = arith.addf %607, %609 : vector<16x12xf32>
    %c4_217 = arith.constant 4 : index
    %c1_218 = arith.constant 1 : index
    %611 = memref.load %arg5[%c4_217, %c1_218] : memref<6x15xf32, #tpu.memory_space<smem>>
    %612 = vector.broadcast %611 : f32 to vector<16x12xf32>
    %613 = arith.mulf %195, %612 : vector<16x12xf32>
    %614 = arith.addf %610, %613 : vector<16x12xf32>
    %c4_219 = arith.constant 4 : index
    %c2_220 = arith.constant 2 : index
    %615 = memref.load %arg5[%c4_219, %c2_220] : memref<6x15xf32, #tpu.memory_space<smem>>
    %616 = vector.broadcast %615 : f32 to vector<16x12xf32>
    %617 = arith.mulf %196, %616 : vector<16x12xf32>
    %618 = arith.addf %614, %617 : vector<16x12xf32>
    %c4_221 = arith.constant 4 : index
    %c3_222 = arith.constant 3 : index
    %619 = memref.load %arg5[%c4_221, %c3_222] : memref<6x15xf32, #tpu.memory_space<smem>>
    %620 = vector.broadcast %619 : f32 to vector<16x12xf32>
    %621 = arith.mulf %197, %620 : vector<16x12xf32>
    %622 = arith.addf %618, %621 : vector<16x12xf32>
    %c4_223 = arith.constant 4 : index
    %c4_224 = arith.constant 4 : index
    %623 = memref.load %arg5[%c4_223, %c4_224] : memref<6x15xf32, #tpu.memory_space<smem>>
    %624 = vector.broadcast %623 : f32 to vector<16x12xf32>
    %625 = arith.mulf %198, %624 : vector<16x12xf32>
    %626 = arith.addf %622, %625 : vector<16x12xf32>
    %c4_225 = arith.constant 4 : index
    %c5_226 = arith.constant 5 : index
    %627 = memref.load %arg5[%c4_225, %c5_226] : memref<6x15xf32, #tpu.memory_space<smem>>
    %628 = vector.broadcast %627 : f32 to vector<16x12xf32>
    %629 = arith.mulf %199, %628 : vector<16x12xf32>
    %630 = arith.addf %626, %629 : vector<16x12xf32>
    %c4_227 = arith.constant 4 : index
    %c6_228 = arith.constant 6 : index
    %631 = memref.load %arg5[%c4_227, %c6_228] : memref<6x15xf32, #tpu.memory_space<smem>>
    %632 = vector.broadcast %631 : f32 to vector<16x12xf32>
    %633 = arith.mulf %200, %632 : vector<16x12xf32>
    %634 = arith.addf %630, %633 : vector<16x12xf32>
    %c4_229 = arith.constant 4 : index
    %c7_230 = arith.constant 7 : index
    %635 = memref.load %arg5[%c4_229, %c7_230] : memref<6x15xf32, #tpu.memory_space<smem>>
    %636 = vector.broadcast %635 : f32 to vector<16x12xf32>
    %637 = arith.mulf %201, %636 : vector<16x12xf32>
    %638 = arith.addf %634, %637 : vector<16x12xf32>
    %c4_231 = arith.constant 4 : index
    %c8_232 = arith.constant 8 : index
    %639 = memref.load %arg5[%c4_231, %c8_232] : memref<6x15xf32, #tpu.memory_space<smem>>
    %640 = vector.broadcast %639 : f32 to vector<16x12xf32>
    %641 = arith.mulf %202, %640 : vector<16x12xf32>
    %642 = arith.addf %638, %641 : vector<16x12xf32>
    %c4_233 = arith.constant 4 : index
    %c9_234 = arith.constant 9 : index
    %643 = memref.load %arg5[%c4_233, %c9_234] : memref<6x15xf32, #tpu.memory_space<smem>>
    %644 = vector.broadcast %643 : f32 to vector<16x12xf32>
    %645 = arith.mulf %203, %644 : vector<16x12xf32>
    %646 = arith.addf %642, %645 : vector<16x12xf32>
    %c4_235 = arith.constant 4 : index
    %c10_236 = arith.constant 10 : index
    %647 = memref.load %arg5[%c4_235, %c10_236] : memref<6x15xf32, #tpu.memory_space<smem>>
    %648 = vector.broadcast %647 : f32 to vector<16x12xf32>
    %649 = arith.mulf %204, %648 : vector<16x12xf32>
    %650 = arith.addf %646, %649 : vector<16x12xf32>
    %c4_237 = arith.constant 4 : index
    %c11_238 = arith.constant 11 : index
    %651 = memref.load %arg5[%c4_237, %c11_238] : memref<6x15xf32, #tpu.memory_space<smem>>
    %652 = vector.broadcast %651 : f32 to vector<16x12xf32>
    %653 = arith.mulf %205, %652 : vector<16x12xf32>
    %654 = arith.addf %650, %653 : vector<16x12xf32>
    %c4_239 = arith.constant 4 : index
    %c12_240 = arith.constant 12 : index
    %655 = memref.load %arg5[%c4_239, %c12_240] : memref<6x15xf32, #tpu.memory_space<smem>>
    %656 = vector.broadcast %655 : f32 to vector<16x12xf32>
    %657 = arith.mulf %206, %656 : vector<16x12xf32>
    %658 = arith.addf %654, %657 : vector<16x12xf32>
    %c4_241 = arith.constant 4 : index
    %c13_242 = arith.constant 13 : index
    %659 = memref.load %arg5[%c4_241, %c13_242] : memref<6x15xf32, #tpu.memory_space<smem>>
    %660 = vector.broadcast %659 : f32 to vector<16x12xf32>
    %661 = arith.mulf %207, %660 : vector<16x12xf32>
    %662 = arith.addf %658, %661 : vector<16x12xf32>
    %c4_243 = arith.constant 4 : index
    %c14_244 = arith.constant 14 : index
    %663 = memref.load %arg5[%c4_243, %c14_244] : memref<6x15xf32, #tpu.memory_space<smem>>
    %664 = vector.broadcast %663 : f32 to vector<16x12xf32>
    %665 = arith.mulf %208, %664 : vector<16x12xf32>
    %666 = arith.addf %662, %665 : vector<16x12xf32>
    %667 = arith.mulf %666, %14 : vector<16x12xf32>
    %668 = vector.shape_cast %667 : vector<16x12xf32> to vector<1x16x12xf32>
    %cst_245 = arith.constant dense<0.000000e+00> : vector<1xf32>
    %669 = vector.multi_reduction <add>, %668, %cst_245 [1, 2] : vector<1x16x12xf32> to vector<1xf32>
    %670 = vector.shape_cast %669 : vector<1xf32> to vector<1x1x1xf32>
    %671 = vector.extract %670[0, 0, 0] : f32 from vector<1x1x1xf32>
    %672 = vector.broadcast %671 : f32 to vector<1x1xf32>
    %673 = arith.mulf %667, %667 : vector<16x12xf32>
    %674 = vector.shape_cast %673 : vector<16x12xf32> to vector<1x16x12xf32>
    %cst_246 = arith.constant dense<0.000000e+00> : vector<1xf32>
    %675 = vector.multi_reduction <add>, %674, %cst_246 [1, 2] : vector<1x16x12xf32> to vector<1xf32>
    %676 = vector.shape_cast %675 : vector<1xf32> to vector<1x1x1xf32>
    %677 = vector.extract %676[0, 0, 0] : f32 from vector<1x1x1xf32>
    %678 = vector.broadcast %677 : f32 to vector<1x1xf32>
    %cst_247 = arith.constant 0.020833334 : f32
    %679 = vector.broadcast %cst_247 : f32 to vector<1x1xf32>
    %680 = arith.mulf %672, %679 : vector<1x1xf32>
    %cst_248 = arith.constant 0.020833334 : f32
    %681 = vector.broadcast %cst_248 : f32 to vector<1x1xf32>
    %682 = arith.mulf %678, %681 : vector<1x1xf32>
    %683 = arith.mulf %680, %680 : vector<1x1xf32>
    %684 = arith.subf %682, %683 : vector<1x1xf32>
    %cst_249 = arith.constant 0.000000e+00 : f32
    %685 = vector.broadcast %cst_249 : f32 to vector<1x1xf32>
    %686 = arith.maximumf %684, %685 : vector<1x1xf32>
    %cst_250 = arith.constant 9.99999974E-6 : f32
    %687 = vector.broadcast %cst_250 : f32 to vector<1x1xf32>
    %688 = arith.addf %686, %687 : vector<1x1xf32>
    %689 = math.rsqrt %688 : vector<1x1xf32>
    %c4_251 = arith.constant 4 : index
    %690 = memref.load %arg7[%c4_251] : memref<6xf32, #tpu.memory_space<smem>>
    %691 = vector.broadcast %690 : f32 to vector<1x1xf32>
    %692 = arith.mulf %689, %691 : vector<1x1xf32>
    %693 = vector.broadcast %680 : vector<1x1xf32> to vector<16x12xf32>
    %694 = arith.subf %667, %693 : vector<16x12xf32>
    %695 = vector.broadcast %692 : vector<1x1xf32> to vector<16x12xf32>
    %696 = arith.mulf %694, %695 : vector<16x12xf32>
    %c4_252 = arith.constant 4 : index
    %697 = memref.load %arg8[%c4_252] : memref<6xf32, #tpu.memory_space<smem>>
    %698 = vector.broadcast %697 : f32 to vector<16x12xf32>
    %699 = arith.addf %696, %698 : vector<16x12xf32>
    %cst_253 = arith.constant 0.000000e+00 : f32
    %700 = vector.broadcast %cst_253 : f32 to vector<16x12xf32>
    %701 = arith.maximumf %699, %700 : vector<16x12xf32>
    %702 = arith.truncf %701 : vector<16x12xf32> to vector<16x12xbf16>
    %c0_254 = arith.constant 0 : index
    %c48 = arith.constant 48 : index
    %703 = vector.load %arg9[%c0_254, %c48] : memref<16x128xbf16, #tpu.memory_space<vmem>>, vector<16x12xbf16>
    tpu.vector_store %arg9[%c0_254, %c48], %702 {strides = array<i32>} : memref<16x128xbf16, #tpu.memory_space<vmem>>, vector<16x12xbf16>,
    %c5_255 = arith.constant 5 : index
    %c0_256 = arith.constant 0 : index
    %704 = memref.load %arg5[%c5_255, %c0_256] : memref<6x15xf32, #tpu.memory_space<smem>>
    %705 = vector.broadcast %704 : f32 to vector<16x12xf32>
    %706 = arith.mulf %194, %705 : vector<16x12xf32>
    %c5_257 = arith.constant 5 : index
    %707 = memref.load %arg6[%c5_257] : memref<6xf32, #tpu.memory_space<smem>>
    %708 = vector.broadcast %707 : f32 to vector<16x12xf32>
    %709 = arith.addf %706, %708 : vector<16x12xf32>
    %c5_258 = arith.constant 5 : index
    %c1_259 = arith.constant 1 : index
    %710 = memref.load %arg5[%c5_258, %c1_259] : memref<6x15xf32, #tpu.memory_space<smem>>
    %711 = vector.broadcast %710 : f32 to vector<16x12xf32>
    %712 = arith.mulf %195, %711 : vector<16x12xf32>
    %713 = arith.addf %709, %712 : vector<16x12xf32>
    %c5_260 = arith.constant 5 : index
    %c2_261 = arith.constant 2 : index
    %714 = memref.load %arg5[%c5_260, %c2_261] : memref<6x15xf32, #tpu.memory_space<smem>>
    %715 = vector.broadcast %714 : f32 to vector<16x12xf32>
    %716 = arith.mulf %196, %715 : vector<16x12xf32>
    %717 = arith.addf %713, %716 : vector<16x12xf32>
    %c5_262 = arith.constant 5 : index
    %c3_263 = arith.constant 3 : index
    %718 = memref.load %arg5[%c5_262, %c3_263] : memref<6x15xf32, #tpu.memory_space<smem>>
    %719 = vector.broadcast %718 : f32 to vector<16x12xf32>
    %720 = arith.mulf %197, %719 : vector<16x12xf32>
    %721 = arith.addf %717, %720 : vector<16x12xf32>
    %c5_264 = arith.constant 5 : index
    %c4_265 = arith.constant 4 : index
    %722 = memref.load %arg5[%c5_264, %c4_265] : memref<6x15xf32, #tpu.memory_space<smem>>
    %723 = vector.broadcast %722 : f32 to vector<16x12xf32>
    %724 = arith.mulf %198, %723 : vector<16x12xf32>
    %725 = arith.addf %721, %724 : vector<16x12xf32>
    %c5_266 = arith.constant 5 : index
    %c5_267 = arith.constant 5 : index
    %726 = memref.load %arg5[%c5_266, %c5_267] : memref<6x15xf32, #tpu.memory_space<smem>>
    %727 = vector.broadcast %726 : f32 to vector<16x12xf32>
    %728 = arith.mulf %199, %727 : vector<16x12xf32>
    %729 = arith.addf %725, %728 : vector<16x12xf32>
    %c5_268 = arith.constant 5 : index
    %c6_269 = arith.constant 6 : index
    %730 = memref.load %arg5[%c5_268, %c6_269] : memref<6x15xf32, #tpu.memory_space<smem>>
    %731 = vector.broadcast %730 : f32 to vector<16x12xf32>
    %732 = arith.mulf %200, %731 : vector<16x12xf32>
    %733 = arith.addf %729, %732 : vector<16x12xf32>
    %c5_270 = arith.constant 5 : index
    %c7_271 = arith.constant 7 : index
    %734 = memref.load %arg5[%c5_270, %c7_271] : memref<6x15xf32, #tpu.memory_space<smem>>
    %735 = vector.broadcast %734 : f32 to vector<16x12xf32>
    %736 = arith.mulf %201, %735 : vector<16x12xf32>
    %737 = arith.addf %733, %736 : vector<16x12xf32>
    %c5_272 = arith.constant 5 : index
    %c8_273 = arith.constant 8 : index
    %738 = memref.load %arg5[%c5_272, %c8_273] : memref<6x15xf32, #tpu.memory_space<smem>>
    %739 = vector.broadcast %738 : f32 to vector<16x12xf32>
    %740 = arith.mulf %202, %739 : vector<16x12xf32>
    %741 = arith.addf %737, %740 : vector<16x12xf32>
    %c5_274 = arith.constant 5 : index
    %c9_275 = arith.constant 9 : index
    %742 = memref.load %arg5[%c5_274, %c9_275] : memref<6x15xf32, #tpu.memory_space<smem>>
    %743 = vector.broadcast %742 : f32 to vector<16x12xf32>
    %744 = arith.mulf %203, %743 : vector<16x12xf32>
    %745 = arith.addf %741, %744 : vector<16x12xf32>
    %c5_276 = arith.constant 5 : index
    %c10_277 = arith.constant 10 : index
    %746 = memref.load %arg5[%c5_276, %c10_277] : memref<6x15xf32, #tpu.memory_space<smem>>
    %747 = vector.broadcast %746 : f32 to vector<16x12xf32>
    %748 = arith.mulf %204, %747 : vector<16x12xf32>
    %749 = arith.addf %745, %748 : vector<16x12xf32>
    %c5_278 = arith.constant 5 : index
    %c11_279 = arith.constant 11 : index
    %750 = memref.load %arg5[%c5_278, %c11_279] : memref<6x15xf32, #tpu.memory_space<smem>>
    %751 = vector.broadcast %750 : f32 to vector<16x12xf32>
    %752 = arith.mulf %205, %751 : vector<16x12xf32>
    %753 = arith.addf %749, %752 : vector<16x12xf32>
    %c5_280 = arith.constant 5 : index
    %c12_281 = arith.constant 12 : index
    %754 = memref.load %arg5[%c5_280, %c12_281] : memref<6x15xf32, #tpu.memory_space<smem>>
    %755 = vector.broadcast %754 : f32 to vector<16x12xf32>
    %756 = arith.mulf %206, %755 : vector<16x12xf32>
    %757 = arith.addf %753, %756 : vector<16x12xf32>
    %c5_282 = arith.constant 5 : index
    %c13_283 = arith.constant 13 : index
    %758 = memref.load %arg5[%c5_282, %c13_283] : memref<6x15xf32, #tpu.memory_space<smem>>
    %759 = vector.broadcast %758 : f32 to vector<16x12xf32>
    %760 = arith.mulf %207, %759 : vector<16x12xf32>
    %761 = arith.addf %757, %760 : vector<16x12xf32>
    %c5_284 = arith.constant 5 : index
    %c14_285 = arith.constant 14 : index
    %762 = memref.load %arg5[%c5_284, %c14_285] : memref<6x15xf32, #tpu.memory_space<smem>>
    %763 = vector.broadcast %762 : f32 to vector<16x12xf32>
    %764 = arith.mulf %208, %763 : vector<16x12xf32>
    %765 = arith.addf %761, %764 : vector<16x12xf32>
    %766 = arith.mulf %765, %14 : vector<16x12xf32>
    %767 = vector.shape_cast %766 : vector<16x12xf32> to vector<1x16x12xf32>
    %cst_286 = arith.constant dense<0.000000e+00> : vector<1xf32>
    %768 = vector.multi_reduction <add>, %767, %cst_286 [1, 2] : vector<1x16x12xf32> to vector<1xf32>
    %769 = vector.shape_cast %768 : vector<1xf32> to vector<1x1x1xf32>
    %770 = vector.extract %769[0, 0, 0] : f32 from vector<1x1x1xf32>
    %771 = vector.broadcast %770 : f32 to vector<1x1xf32>
    %772 = arith.mulf %766, %766 : vector<16x12xf32>
    %773 = vector.shape_cast %772 : vector<16x12xf32> to vector<1x16x12xf32>
    %cst_287 = arith.constant dense<0.000000e+00> : vector<1xf32>
    %774 = vector.multi_reduction <add>, %773, %cst_287 [1, 2] : vector<1x16x12xf32> to vector<1xf32>
    %775 = vector.shape_cast %774 : vector<1xf32> to vector<1x1x1xf32>
    %776 = vector.extract %775[0, 0, 0] : f32 from vector<1x1x1xf32>
    %777 = vector.broadcast %776 : f32 to vector<1x1xf32>
    %cst_288 = arith.constant 0.020833334 : f32
    %778 = vector.broadcast %cst_288 : f32 to vector<1x1xf32>
    %779 = arith.mulf %771, %778 : vector<1x1xf32>
    %cst_289 = arith.constant 0.020833334 : f32
    %780 = vector.broadcast %cst_289 : f32 to vector<1x1xf32>
    %781 = arith.mulf %777, %780 : vector<1x1xf32>
    %782 = arith.mulf %779, %779 : vector<1x1xf32>
    %783 = arith.subf %781, %782 : vector<1x1xf32>
    %cst_290 = arith.constant 0.000000e+00 : f32
    %784 = vector.broadcast %cst_290 : f32 to vector<1x1xf32>
    %785 = arith.maximumf %783, %784 : vector<1x1xf32>
    %cst_291 = arith.constant 9.99999974E-6 : f32
    %786 = vector.broadcast %cst_291 : f32 to vector<1x1xf32>
    %787 = arith.addf %785, %786 : vector<1x1xf32>
    %788 = math.rsqrt %787 : vector<1x1xf32>
    %c5_292 = arith.constant 5 : index
    %789 = memref.load %arg7[%c5_292] : memref<6xf32, #tpu.memory_space<smem>>
    %790 = vector.broadcast %789 : f32 to vector<1x1xf32>
    %791 = arith.mulf %788, %790 : vector<1x1xf32>
    %792 = vector.broadcast %779 : vector<1x1xf32> to vector<16x12xf32>
    %793 = arith.subf %766, %792 : vector<16x12xf32>
    %794 = vector.broadcast %791 : vector<1x1xf32> to vector<16x12xf32>
    %795 = arith.mulf %793, %794 : vector<16x12xf32>
    %c5_293 = arith.constant 5 : index
    %796 = memref.load %arg8[%c5_293] : memref<6xf32, #tpu.memory_space<smem>>
    %797 = vector.broadcast %796 : f32 to vector<16x12xf32>
    %798 = arith.addf %795, %797 : vector<16x12xf32>
    %cst_294 = arith.constant 0.000000e+00 : f32
    %799 = vector.broadcast %cst_294 : f32 to vector<16x12xf32>
    %800 = arith.maximumf %798, %799 : vector<16x12xf32>
    %801 = arith.truncf %800 : vector<16x12xf32> to vector<16x12xbf16>
    %c0_295 = arith.constant 0 : index
    %c60 = arith.constant 60 : index
    %802 = vector.load %arg9[%c0_295, %c60] : memref<16x128xbf16, #tpu.memory_space<vmem>>, vector<16x12xbf16>
    tpu.vector_store %arg9[%c0_295, %c60], %801 {strides = array<i32>} : memref<16x128xbf16, #tpu.memory_space<vmem>>, vector<16x12xbf16>,
    %cst_296 = arith.constant 0.000000e+00 : bf16
    %803 = vector.broadcast %cst_296 : bf16 to vector<16x56xbf16>
    %c0_297 = arith.constant 0 : index
    %c72 = arith.constant 72 : index
    %804 = vector.load %arg9[%c0_297, %c72] : memref<16x128xbf16, #tpu.memory_space<vmem>>, vector<16x56xbf16>
    tpu.vector_store %arg9[%c0_297, %c72], %803 {strides = array<i32>} : memref<16x128xbf16, #tpu.memory_space<vmem>>, vector<16x56xbf16>,
    return
  }
}

</mosaic_0001>

<bundles_post_ra>
// kernel: tpu_custom_call.1
= control target key start
LH: loop header
LB: loop body
LE: loop exit
PB: predicated region body
PF: predicated region fallthrough
CT: control target
= control target key end

     0   :  { %14 = vsyncpa [#allocation3], 0  ;;  %s3579_s0 = inlined_call_operand.hbm [shape: f32[16,20], index: 0, kind: input, shape index: {}]   ;;  %s3580_s1 = inlined_call_operand.hbm [shape: f32[3,5], index: 1, kind: input, shape index: {}]   ;;  %s3581_s2 = inlined_call_operand.vmem [shape: f32[3], index: 2, kind: input, shape index: {}]   ;;  %s3582_s3 = inlined_call_operand.vmem [shape: f32[3], index: 3, kind: input, shape index: {}]   ;;  %s3583_s4 = inlined_call_operand.vmem [shape: f32[3], index: 4, kind: input, shape index: {}]   ;;  %s3584_s5 = inlined_call_operand.vmem [shape: f32[6,15], index: 5, kind: input, shape index: {}]   ;;  %s3585_s6 = inlined_call_operand.vmem [shape: f32[6], index: 6, kind: input, shape index: {}]   ;;  %s3586_s7 = inlined_call_operand.vmem [shape: f32[6], index: 7, kind: input, shape index: {}]   ;;  %s3587_s8 = inlined_call_operand.vmem [shape: f32[6], index: 8, kind: input, shape index: {}]   ;;  %s3588_s9 = inlined_call_operand.hbm [shape: bf16[16,128], index: 9, kind: output, shape index: {}]  }
   0x1   :  { %15 = vsyncpa [#allocation5], 0 }
   0x2   :  { %16 = vsyncpa [#allocation6], 0 }
   0x3   :  { %17 = vsyncpa [#allocation10], 0 }
   0x4   :  { %18 = vsyncpa [#allocation13], 0 }
   0x5   :  { %19 = vsyncpa [#allocation16], 0  ;;  %s57_s11 = sshll.u32 %s3582_s3, 4  ;;  %s58_s11 = int_to_ptr.vmem [resolvable:$true] %s57_s11 }
   0x6   :  { %20 = vsyncpa [#allocation4], 0  ;;  %s77_s14 = sshll.u32 %s3584_s5, 4  ;;  %s2286_s15 = scalar_lea.vmem %s58_s11, 16  ;;  %s78_s14 = int_to_ptr.vmem [resolvable:$true] %s77_s14 }
   0x7   :  { %p2287_p0 = scmp.ne.s32.totalorder %s58_s11, %s2286_s15  ;;  %p2291_p1 = scmp.lt.s32.totalorder %s58_s11, %s58_s11 }
   0x8   :  { %p2292_p2 = scmp.lt.s32.totalorder %s2286_s15, %s2286_s15 }
   0xa   :  { %p2293_p3 = por %p2292_p2, %p2291_p1 }
   0xc   :  { %p2294_p4 = pnand %p2293_p3, %p2287_p0 }
   0xe   :  { %2297 = shalt.err (!%p2294_p4)
}
   0xf   :  { %s2438_s16 = smov [#allocation9]   ;;  %s2298_s17 = scalar_lea.vmem %s78_s14, 128 }
  0x10   :  { %60 = dma.vmem_to_smem %s58_s11, 16, %s2438_s16, [#allocation10]  }
  0x11   :  { %p2299_p5 = scmp.ne.s32.totalorder %s78_s14, %s2298_s17  ;;  %p2303_p6 = scmp.lt.s32.totalorder %s78_s14, %s78_s14 }
  0x12   :  { %p2304_p7 = scmp.lt.s32.totalorder %s2298_s17, %s2298_s17 }
  0x14   :  { %p2305_p8 = por %p2304_p7, %p2303_p6 }
  0x16   :  { %p2306_p9 = pnand %p2305_p8, %p2299_p5 }
  0x18   :  { %2309 = shalt.err (!%p2306_p9)
}
  0x19   :  { %s2439_s3 = smov [#allocation12]   ;;  %s97_s19 = sshll.u32 %s3586_s7, 4  ;;  %s98_s19 = int_to_ptr.vmem [resolvable:$true] %s97_s19 }
  0x1a   :  { %80 = dma.vmem_to_smem %s78_s14, 128, %s2439_s3, [#allocation13]  }
  0x1b   :  { %s2310_s20 = scalar_lea.vmem %s98_s19, 16  ;;  %p2315_p11 = scmp.lt.s32.totalorder %s98_s19, %s98_s19 }
  0x1c   :  { %p2311_p10 = scmp.ne.s32.totalorder %s98_s19, %s2310_s20  ;;  %p2316_p12 = scmp.lt.s32.totalorder %s2310_s20, %s2310_s20 }
  0x1e   :  { %p2317_p13 = por %p2316_p12, %p2315_p11 }
  0x20   :  { %p2318_p0 = pnand %p2317_p13, %p2311_p10 }
  0x22   :  { %2321 = shalt.err (!%p2318_p0)
}
  0x23   :  { %s2440_s21 = smov [#allocation15]   ;;  %s2441_s22 = smov [#allocation2]  }
  0x24   :  { %100 = dma.vmem_to_smem %s98_s19, 16, %s2440_s21, [#allocation16]  }
  0x25   :  { %s26_s23 = sshll.u32 %s2441_s22, 4  ;;  %s2322_s26 = scalar_lea.hbm %s3579_s0, 256  ;;  %s27_s23 = int_to_ptr.vmem [resolvable:$true] %s26_s23 }
  0x26   :  { %p2323_p1 = scmp.ne.s32.totalorder %s3579_s0, %s2322_s26  ;;  %p2326_p2 = scmp.lt.u32.totalorder %s2322_s26, %s3579_s0 }
  0x28   :  { %p2328_p3 = pnand %p2326_p2, %p2323_p1 }
  0x2a   :  { %2331 = shalt.err (!%p2328_p3)
}
  0x2b   :  { %s2332_s30 = scalar_lea.vmem %s27_s23, 256  ;;  %p2337_p5 = scmp.lt.s32.totalorder %s27_s23, %s27_s23 }
  0x2c   :  { %p2333_p4 = scmp.ne.s32.totalorder %s27_s23, %s2332_s30  ;;  %p2338_p6 = scmp.lt.s32.totalorder %s2332_s30, %s2332_s30 }
  0x2e   :  { %p2339_p7 = por %p2338_p6, %p2337_p5 }
  0x30   :  { %p2340_p8 = pnand %p2339_p7, %p2333_p4 }
  0x32   :  { %2343 = shalt.err (!%p2340_p8)
}
  0x33   :  { %s2442_s10 = smov 128   ;;  %s2443_s11 = smov 8  }
  0x34   :  { %32 = dma.hbm_to_vmem [thread:$0]  %s3579_s0, 256, %s27_s23, [#allocation3], %s2442_s10, %s2442_s10, %s2443_s11  }
  0x35   :  { %s47_s16 = sshll.u32 %s3581_s2, 4  ;;  %s2344_s5 = scalar_lea.hbm %s3580_s1, 64  ;;  %s48_s16 = int_to_ptr.vmem [resolvable:$true] %s47_s16 }
  0x36   :  { %p2345_p9 = scmp.ne.s32.totalorder %s3580_s1, %s2344_s5  ;;  %p2348_p10 = scmp.lt.u32.totalorder %s2344_s5, %s3580_s1 }
  0x38   :  { %p2350_p11 = pnand %p2348_p10, %p2345_p9 }
  0x3a   :  { %2353 = shalt.err (!%p2350_p11)
}
  0x3b   :  { %s2444_s22 = smov [#allocation7]   ;;  %s2354_s2 = scalar_lea.vmem %s48_s16, 16 }
  0x3c   :  { %40 = dma.hbm_to_smem %s3580_s1, 64, %s2444_s22, [#allocation5]  }
  0x3d   :  { %p2355_p12 = scmp.ne.s32.totalorder %s48_s16, %s2354_s2  ;;  %p2359_p13 = scmp.lt.s32.totalorder %s48_s16, %s48_s16 }
  0x3e   :  { %p2360_p0 = scmp.lt.s32.totalorder %s2354_s2, %s2354_s2 }
  0x40   :  { %p2361_p1 = por %p2360_p0, %p2359_p13 }
  0x42   :  { %p2362_p2 = pnand %p2361_p1, %p2355_p12 }
  0x44   :  { %2365 = shalt.err (!%p2362_p2)
}
  0x45   :  { %s2445_s24 = smov [#allocation8]   ;;  %s67_s27 = sshll.u32 %s3583_s4, 4  ;;  %s68_s27 = int_to_ptr.vmem [resolvable:$true] %s67_s27 }
  0x46   :  { %50 = dma.vmem_to_smem %s48_s16, 16, %s2445_s24, [#allocation6]  }
  0x47   :  { %s87_s29 = sshll.u32 %s3585_s6, 4  ;;  %s2366_s1 = scalar_lea.vmem %s68_s27, 16  ;;  %s88_s29 = int_to_ptr.vmem [resolvable:$true] %s87_s29 }
  0x48   :  { %p2367_p3 = scmp.ne.s32.totalorder %s68_s27, %s2366_s1  ;;  %p2371_p4 = scmp.lt.s32.totalorder %s68_s27, %s68_s27 }
  0x49   :  { %p2372_p5 = scmp.lt.s32.totalorder %s2366_s1, %s2366_s1 }
  0x4b   :  { %p2373_p6 = por %p2372_p5, %p2371_p4 }
  0x4d   :  { %p2374_p7 = pnand %p2373_p6, %p2367_p3 }
  0x4f   :  { %2377 = shalt.err (!%p2374_p7)
}
  0x50   :  { %s2446_s30 = smov [#allocation11]   ;;  %s2378_s10 = scalar_lea.vmem %s88_s29, 16 }
  0x51   :  { %70 = dma.vmem_to_smem %s68_s27, 16, %s2446_s30, [#allocation10]  }
  0x52   :  { %p2379_p8 = scmp.ne.s32.totalorder %s88_s29, %s2378_s10  ;;  %p2383_p9 = scmp.lt.s32.totalorder %s88_s29, %s88_s29 }
  0x53   :  { %p2384_p10 = scmp.lt.s32.totalorder %s2378_s10, %s2378_s10 }
  0x55   :  { %p2385_p11 = por %p2384_p10, %p2383_p9 }
  0x57   :  { %p2386_p12 = pnand %p2385_p11, %p2379_p8 }
  0x59   :  { %2389 = shalt.err (!%p2386_p12)
}
  0x5a   :  { %s2447_s4 = smov [#allocation14]   ;;  %s107_s12 = sshll.u32 %s3587_s8, 4  ;;  %s108_s12 = int_to_ptr.vmem [resolvable:$true] %s107_s12 }
  0x5b   :  { %90 = dma.vmem_to_smem %s88_s29, 16, %s2447_s4, [#allocation13]  }
  0x5c   :  { %s2390_s13 = scalar_lea.vmem %s108_s12, 16  ;;  %p2395_p0 = scmp.lt.s32.totalorder %s108_s12, %s108_s12 }
  0x5d   :  { %p2391_p13 = scmp.ne.s32.totalorder %s108_s12, %s2390_s13  ;;  %p2396_p1 = scmp.lt.s32.totalorder %s2390_s13, %s2390_s13 }
  0x5f   :  { %p2397_p2 = por %p2396_p1, %p2395_p0 }
  0x61   :  { %p2398_p3 = pnand %p2397_p2, %p2391_p13 }
  0x63   :  { %2401 = shalt.err (!%p2398_p3)
}
  0x64   :  { %s2448_s14 = smov [#allocation17]  }
  0x65   :  { %110 = dma.vmem_to_smem %s108_s12, 16, %s2448_s14, [#allocation16]  }
  0x66   :  { %2424 = dma.done.wait [#allocation3], 256  }
  0x67   :  { %2425 = vsyncadd [#allocation3], 4294967040 }
  0x68   :  { %2426 = dma.done.wait [#allocation5], 64  }
  0x69   :  { %2427 = vsyncadd [#allocation5], 4294967232 }
  0x6a   :  { %2428 = dma.done.wait [#allocation6], 16  }
  0x6b   :  { %2429 = vsyncadd [#allocation6], 4294967280 }
  0x6c   :  { %2430 = dma.done.wait [#allocation10], 32  }
  0x6d   :  { %2431 = vsyncadd [#allocation10], 4294967264 }
  0x6e   :  { %2432 = dma.done.wait [#allocation13], 144  }
  0x6f   :  { %2433 = vsyncadd [#allocation13], 4294967152 }
  0x70   :  { %2434 = dma.done.wait [#allocation16], 32  }
  0x71   :  { %2435 = vsyncadd [#allocation16], 4294967264 }
  0x72   :  { %138 = sfence }
  0x73   :  { %s2055_s8 = sld [smem:[#allocation7 + $0x2]]  ;;  %s2054_s15 = sld [smem:[#allocation7 + $0x1]]  ;;  %v2558_v0 = vld [vmem:[#allocation2] sm:$0xff]  ;;  %v2560_v1 = vld [vmem:[#allocation2 + $0x8] sm:$0xff]  ;;  %v142_v27 = vlaneseq  ;;  %v2453_v41 = vmov 0.0   ;;  %vm223_vm5 = vcmask 130048  }
  0x74   :  { %s2056_s16 = sld [smem:[#allocation7 + $0x3]]  ;;  %s2057_s17 = sld [smem:[#allocation7 + $0x4]]  ;;  %vm704_vm6 = vcmask 97280   ;;  %vm761_vm7 = vcmask 93184   ;;  %vm1014_vm8 = vcmask 191584   ;;  %vm1267_vm9 = vcmask 289984  }
  0x75   :  { %s2449_s3 = smov 126   ;;  %s2450_s5 = smov 127   ;;  %v143_v31 = vand.u32 127, %v142_v27  ;;  %v145_v32 = vshrl.u32 %v142_v27, 7  ;;  %vm1520_vm10 = vcmask 388384   ;;  %vm1773_vm11 = vcmask 486784  }
  0x76   :  { %s2059_s18 = sld [smem:[#allocation7 + $0x81]]  ;;  %s2060_s19 = sld [smem:[#allocation7 + $0x82]]  ;;  %vm2026_vm12 = vcmask 585184   ;;  %vm2029_vm13 = vcmask 1044032  }
  0x77   :  { %s2451_s20 = smov 125   ;;  %s2061_s21 = sld [smem:[#allocation7 + $0x83]]  ;;  %vm147_vm0 = vcmp.lt.s32.totalorder %v145_v32, 4  ;;  %vm149_vm1 = vcmp.ge.s32.totalorder %v143_v31, 1  ;;  %vm152_vm3 = vcmp.le.s32.totalorder %v143_v31, 14 }
  0x78   :  { %s2452_s22 = smov 124   ;;  %s2062_s0 = sld [smem:[#allocation7 + $0x84]]  ;;  %vm150_vm2 = vmand %vm147_vm0, %vm149_vm1 }
  0x79   :  { %v176_v2 = vstv %s2055_s8  ;;  %v162_v4 = vstv %s2054_s15  ;;  %s2067_s23 = sld [smem:[#allocation7 + $0x101]]  ;;  %s2068_s2 = sld [smem:[#allocation7 + $0x102]]  ;;  %vm153_vm4 = vmand %vm150_vm2, %vm152_vm3 }
  0x7a   :  { %v177_v3 = vmul.f32 %v176_v2, %v2558_v0  ;;  %v163_v5 = vmul.f32 %v162_v4, %v2558_v0  ;;  %v178_v6 = vmul.f32 %v176_v2, %v2560_v1  ;;  %v164_v7 = vmul.f32 %v162_v4, %v2560_v1  ;;  %s2069_s24 = sld [smem:[#allocation7 + $0x103]]  ;;  %s2070_s25 = sld [smem:[#allocation7 + $0x104]] }
  0x7b   :  { %v190_v8 = vstv %s2056_s16  ;;  %v204_v11 = vstv %s2057_s17  ;;  %v2608_v42 = vsel %vm153_vm4, 1.0, %v2453_v41  ;;  %s157_s26 = sld [smem:[#allocation7]]  ;;  %s2063_s29 = sld [smem:[#allocation8 + $0x1]] }
  0x7c   :  { %181 = vrot.lane.b32.xlu1 %v177_v3, %s2449_s3  ;;  %167 = vrot.lane.b32.xlu0 %v163_v5, %s2450_s5  ;;  %v192_v9 = vmul.f32 %v190_v8, %v2560_v1  ;;  %v191_v10 = vmul.f32 %v190_v8, %v2558_v0  ;;  %v206_v12 = vmul.f32 %v204_v11, %v2560_v1  ;;  %v279_v14 = vstv %s2059_s18  ;;  %s2058_s27 = sld [smem:[#allocation7 + $0x80]]  ;;  %s2071_s1 = sld [smem:[#allocation8 + $0x2]] }
  0x7d   :  { %v205_v13 = vmul.f32 %v204_v11, %v2558_v0  ;;  %v281_v15 = vmul.f32 %v279_v14, %v2560_v1  ;;  %v280_v16 = vmul.f32 %v279_v14, %v2558_v0  ;;  %v293_v17 = vstv %s2060_s19  ;;  %s217_s28 = sld [smem:[#allocation8]]  ;;  %s2074_s11 = sld [smem:[#allocation12 + $0x1]] }
  0x7e   :  { %v295_v18 = vmul.f32 %v293_v17, %v2560_v1  ;;  %v294_v19 = vmul.f32 %v293_v17, %v2558_v0  ;;  %v307_v20 = vstv %s2061_s21  ;;  %v321_v23 = vstv %s2062_s0  ;;  %s2066_s7 = sld [smem:[#allocation7 + $0x100]]  ;;  %s2076_s12 = sld [smem:[#allocation12 + $0x3]] }
  0x7f   :  { %v309_v21 = vmul.f32 %v307_v20, %v2560_v1  ;;  %v308_v22 = vmul.f32 %v307_v20, %v2558_v0  ;;  %v323_v24 = vmul.f32 %v321_v23, %v2560_v1  ;;  %v322_v25 = vmul.f32 %v321_v23, %v2558_v0  ;;  %s259_s4 = sld [smem:[#allocation9]]  ;;  %s2075_s13 = sld [smem:[#allocation12 + $0x2]] }
  0x80   :  { %183 = vrot.lane.b32.xlu1 %v178_v6, %s2449_s3  ;;  %169 = vrot.lane.b32.xlu0 %v164_v7, %s2450_s5  ;;  %v395_v26 = vstv %s2067_s23  ;;  %v409_v30 = vstv %s2068_s2  ;;  %v2263_v43 = vpack.i.bf16 %v2453_v41, %v2608_v42  ;;  %s266_s6 = sld [smem:[#allocation11]]  ;;  %s2077_s14 = sld [smem:[#allocation12 + $0x4]] }
  0x81   :  { %v397_v28 = vmul.f32 %v395_v26, %v2560_v1  ;;  %v396_v29 = vmul.f32 %v395_v26, %v2558_v0  ;;  %v411_v33 = vmul.f32 %v409_v30, %v2560_v1  ;;  %v410_v34 = vmul.f32 %v409_v30, %v2558_v0  ;;  %s2092_s8 = sld [smem:[#allocation12 + $0x81]]  ;;  %s2093_s15 = sld [smem:[#allocation12 + $0x82]] }
  0x82   :  { %v423_v35 = vstv %s2069_s24  ;;  %v437_v38 = vstv %s2070_s25  ;;  %v158_v44 = vstv %s157_s26  ;;  %v275_v57 = vstv %s2058_s27  ;;  %s2094_s16 = sld [smem:[#allocation12 + $0x83]]  ;;  %s2095_s17 = sld [smem:[#allocation12 + $0x84]] }
  0x83   :  { %v425_v36 = vmul.f32 %v423_v35, %v2560_v1  ;;  %v424_v37 = vmul.f32 %v423_v35, %v2558_v0  ;;  %v439_v39 = vmul.f32 %v437_v38, %v2560_v1  ;;  %v438_v40 = vmul.f32 %v437_v38, %v2558_v0  ;;  %s2112_s18 = sld [smem:[#allocation12 + $0x101]]  ;;  %s2696_s19 = sld [smem:[#allocation12 + $0x102]] }
  0x84   :  { %197 = vrot.lane.b32.xlu1 %v192_v9, %s2451_s20  ;;  %195 = vrot.lane.b32.xlu0 %v191_v10, %s2451_s20  ;;  %v159_v47 = vmul.f32 %v158_v44, %v2558_v0  ;;  %v160_v48 = vmul.f32 %v158_v44, %v2560_v1  ;;  %v218_v60 = vstv %s217_s28  ;;  %v277_v2 = vmul.f32 %v275_v57, %v2560_v1  ;;  %s2702_s21 = sld [smem:[#allocation12 + $0x103]]  ;;  %s2709_s0 = sld [smem:[#allocation12 + $0x104]] }
  0x85   :  { %v276_v4 = vmul.f32 %v275_v57, %v2558_v0  ;;  %v335_v30 = vstv %s2063_s29  ;;  %s2716_s2 = sld [smem:[#allocation12 + $0x181]]  ;;  %s2732_s26 = sld [smem:[#allocation12 + $0x182]] }
  0x86   :  { %s2723_s25 = sld [smem:[#allocation12 + $0x201]]  ;;  %s2741_s27 = sld [smem:[#allocation12 + $0x202]] }
  0x87   :  { %s2748_s28 = sld [smem:[#allocation12 + $0x281]] }
  0x88   :  { %211 = vrot.lane.b32.xlu1 %v206_v12, %s2452_s22  ;;  %209 = vrot.lane.b32.xlu0 %v205_v13, %s2452_s22 }
  0x8c   :  { %286 = vrot.lane.b32.xlu1 %v281_v15, %s2450_s5  ;;  %284 = vrot.lane.b32.xlu0 %v280_v16, %s2450_s5 }
  0x90   :  { %300 = vrot.lane.b32.xlu1 %v295_v18, %s2449_s3  ;;  %298 = vrot.lane.b32.xlu0 %v294_v19, %s2449_s3 }
  0x94   :  { %314 = vrot.lane.b32.xlu1 %v309_v21, %s2451_s20  ;;  %312 = vrot.lane.b32.xlu0 %v308_v22, %s2451_s20 }
  0x98   :  { %328 = vrot.lane.b32.xlu1 %v323_v24, %s2452_s22  ;;  %326 = vrot.lane.b32.xlu0 %v322_v25, %s2452_s22 }
  0x9c   :  { %402 = vrot.lane.b32.xlu1 %v397_v28, %s2450_s5  ;;  %400 = vrot.lane.b32.xlu0 %v396_v29, %s2450_s5  ;;  %v391_v29 = vstv %s2066_s7 }
  0xa0   :  { %416 = vrot.lane.b32.xlu1 %v411_v33, %s2449_s3  ;;  %414 = vrot.lane.b32.xlu0 %v410_v34, %s2449_s3  ;;  %v393_v34 = vmul.f32 %v391_v29, %v2560_v1 }
  0xa4   :  { %430 = vrot.lane.b32.xlu1 %v425_v36, %s2451_s20  ;;  %428 = vrot.lane.b32.xlu0 %v424_v37, %s2451_s20  ;;  %v392_v36 = vmul.f32 %v391_v29, %v2558_v0 }
  0xa8   :  { %444 = vrot.lane.b32.xlu1 %v439_v39, %s2452_s22  ;;  %442 = vrot.lane.b32.xlu0 %v438_v40, %s2452_s22 }
  0xac   :  { %2264 = vrot.lane.b32.xlu0 %v2263_v43, %s2449_s3 }
  0xee   :  { %v182_v45 = vpop.permute.xlu1 %181  ;;  %v168_v46 = vpop.permute.xlu0 %167 }
  0xef   :  { %v173_v51 = vadd.f32 %v168_v46, %v159_v47 }
  0xf1   :  { %v187_v56 = vadd.f32 %v182_v45, %v173_v51 }
  0xf2   :  { %v184_v49 = vpop.permute.xlu1 %183  ;;  %v170_v50 = vpop.permute.xlu0 %169 }
  0xf3   :  { %v174_v52 = vadd.f32 %v170_v50, %v160_v48 }
  0xf5   :  { %v188_v54 = vadd.f32 %v184_v49, %v174_v52 }
  0xf6   :  { %v198_v53 = vpop.permute.xlu1 %197  ;;  %v196_v55 = vpop.permute.xlu0 %195 }
  0xf7   :  { %v202_v58 = vadd.f32 %v198_v53, %v188_v54  ;;  %v201_v59 = vadd.f32 %v196_v55, %v187_v56 }
  0xfa   :  { %v212_v61 = vpop.permute.xlu1 %211  ;;  %v210_v63 = vpop.permute.xlu0 %209 }
  0xfb   :  { %v216_v62 = vadd.f32 %v212_v61, %v202_v58  ;;  %v215_v3 = vadd.f32 %v210_v63, %v201_v59 }
  0xfd   :  { %v220_v5 = vadd.f32 %v218_v60, %v216_v62  ;;  %v219_v6 = vadd.f32 %v218_v60, %v215_v3  ;;  %v451_v60 = vstv %s2071_s1  ;;  %s2755_s1 = sld [smem:[#allocation12 + $0x183]] }
  0xfe   :  { %v287_v7 = vpop.permute.xlu1 %286  ;;  %v285_v10 = vpop.permute.xlu0 %284 }
  0xff   :  { %v2618_v8 = vmul.f32 0.0, %v220_v5  ;;  %v291_v9 = vadd.f32 %v287_v7, %v277_v2  ;;  %v2621_v11 = vmul.f32 %v219_v6, %v2608_v42  ;;  %v290_v12 = vadd.f32 %v285_v10, %v276_v4 }
 0x101   :  { %v225_v13 = vsel %vm223_vm5, %v2618_v8, 0.0  ;;  %v238_v14 = vmul.f32 %v2618_v8, %v2618_v8  ;;  %v224_v16 = vsel %vm223_vm5, %v2621_v11, 0.0  ;;  %v237_v17 = vmul.f32 %v2621_v11, %v2621_v11 }
 0x102   :  { %v301_v15 = vpop.permute.xlu1 %300  ;;  %v299_v19 = vpop.permute.xlu0 %298  ;;  %v226_v20 = vadd.f32 %v225_v13, %v224_v16 }
 0x103   :  { %v305_v18 = vadd.f32 %v301_v15, %v291_v9  ;;  %v240_v21 = vsel %vm223_vm5, %v238_v14, 0.0  ;;  %v304_v22 = vadd.f32 %v299_v19, %v290_v12  ;;  %v239_v23 = vsel %vm223_vm5, %v237_v17, 0.0 }
 0x104   :  { %227 = vadd.xlane.f32.xlu0 %v226_v20  ;;  %v241_v24 = vadd.f32 %v240_v21, %v239_v23 }
 0x106   :  { %v315_v25 = vpop.permute.xlu1 %314  ;;  %v313_v27 = vpop.permute.xlu0 %312  ;;  %242 = vadd.xlane.f32.xlu1 %v241_v24 }
 0x107   :  { %v319_v26 = vadd.f32 %v315_v25, %v305_v18  ;;  %v318_v28 = vadd.f32 %v313_v27, %v304_v22 }
 0x10a   :  { %v329_v31 = vpop.permute.xlu1 %328  ;;  %v327_v33 = vpop.permute.xlu0 %326 }
 0x10b   :  { %v333_v32 = vadd.f32 %v329_v31, %v319_v26  ;;  %v332_v35 = vadd.f32 %v327_v33, %v318_v28 }
 0x10d   :  { %v337_v37 = vadd.f32 %v335_v30, %v333_v32  ;;  %v336_v38 = vadd.f32 %v335_v30, %v332_v35 }
 0x10e   :  { %v403_v39 = vpop.permute.xlu1 %402  ;;  %v401_v43 = vpop.permute.xlu0 %400 }
 0x10f   :  { %v2635_v40 = vmul.f32 0.0, %v337_v37  ;;  %v407_v41 = vadd.f32 %v403_v39, %v393_v34  ;;  %v2638_v44 = vmul.f32 %v336_v38, %v2608_v42  ;;  %v406_v45 = vadd.f32 %v401_v43, %v392_v36 }
 0x111   :  { %v341_v46 = vsel %vm223_vm5, %v2635_v40, 0.0  ;;  %v354_v1 = vmul.f32 %v2635_v40, %v2635_v40  ;;  %v340_v0 = vsel %vm223_vm5, %v2638_v44, 0.0  ;;  %v353_v48 = vmul.f32 %v2638_v44, %v2638_v44 }
 0x112   :  { %v417_v47 = vpop.permute.xlu1 %416  ;;  %v415_v50 = vpop.permute.xlu0 %414  ;;  %v342_v51 = vadd.f32 %v341_v46, %v340_v0 }
 0x113   :  { %v421_v49 = vadd.f32 %v417_v47, %v407_v41  ;;  %v356_v52 = vsel %vm223_vm5, %v354_v1, 0.0  ;;  %v420_v53 = vadd.f32 %v415_v50, %v406_v45  ;;  %v355_v54 = vsel %vm223_vm5, %v353_v48, 0.0 }
 0x114   :  { %343 = vadd.xlane.f32.xlu0 %v342_v51  ;;  %v357_v55 = vadd.f32 %v356_v52, %v355_v54 }
 0x116   :  { %v431_v56 = vpop.permute.xlu1 %430  ;;  %v429_v58 = vpop.permute.xlu0 %428  ;;  %358 = vadd.xlane.f32.xlu1 %v357_v55 }
 0x117   :  { %v435_v57 = vadd.f32 %v431_v56, %v421_v49  ;;  %v434_v59 = vadd.f32 %v429_v58, %v420_v53 }
 0x11a   :  { %v445_v61 = vpop.permute.xlu1 %444  ;;  %v443_v63 = vpop.permute.xlu0 %442 }
 0x11b   :  { %v449_v62 = vadd.f32 %v445_v61, %v435_v57  ;;  %v448_v2 = vadd.f32 %v443_v63, %v434_v59 }
 0x11d   :  { %v453_v3 = vadd.f32 %v451_v60, %v449_v62  ;;  %v452_v4 = vadd.f32 %v451_v60, %v448_v2 }
 0x11e   :  { %v2665_v17 = vpop.permute.xlu0 %2264 }
 0x11f   :  { %v2650_v5 = vmul.f32 0.0, %v453_v3  ;;  %v2653_v6 = vmul.f32 %v452_v4, %v2608_v42 }
 0x121   :  { %v457_v7 = vsel %vm223_vm5, %v2650_v5, 0.0  ;;  %v470_v9 = vmul.f32 %v2650_v5, %v2650_v5  ;;  %v456_v10 = vsel %vm223_vm5, %v2653_v6, 0.0  ;;  %v469_v12 = vmul.f32 %v2653_v6, %v2653_v6 }
 0x122   :  { %v458_v13 = vadd.f32 %v457_v7, %v456_v10  ;;  %v260_v10 = vstv %s259_s4  ;;  %s2773_s4 = sld [smem:[#allocation12 + $0x282]] }
 0x123   :  { %v472_v14 = vsel %vm223_vm5, %v470_v9, 0.0  ;;  %v471_v15 = vsel %vm223_vm5, %v469_v12, 0.0 }
 0x124   :  { %459 = vadd.xlane.f32.xlu0 %v458_v13  ;;  %v473_v16 = vadd.f32 %v472_v14, %v471_v15 }
 0x128   :  { %474 = vadd.xlane.f32.xlu0 %v473_v16  ;;  %v267_v16 = vstv %s266_s6  ;;  %s2780_s6 = sld [smem:[#allocation12 + $0x184]] }
 0x191   :  { %v228_v18 = vpop.xlane.xlu0 %227 }
 0x192   :  { %v229_v19 = vrot.slane %v228_v18, 4 }
 0x193   :  { %v243_v20 = vpop.xlane.xlu1 %242 }
 0x194   :  { %v230_v21 = vadd.f32 %v229_v19, %v228_v18  ;;  %v244_v22 = vrot.slane %v243_v20, 4 }
 0x196   :  { %v245_v23 = vadd.f32 %v244_v22, %v243_v20  ;;  %v231_v24 = vrot.slane %v230_v21, 2 }
 0x198   :  { %v232_v25 = vadd.f32 %v231_v24, %v230_v21  ;;  %v246_v26 = vrot.slane %v245_v23, 2  ;;  %v515_v24 = vstv %s2074_s11  ;;  %s2786_s11 = sld [smem:[#allocation11 + $0x1]] }
 0x19a   :  { %v233_v27 = vrot.slane %v232_v25, 1  ;;  %v247_v28 = vadd.f32 %v246_v26, %v245_v23 }
 0x19c   :  { %v234_v29 = vadd.f32 %v233_v27, %v232_v25  ;;  %v248_v30 = vrot.slane %v247_v28, 1  ;;  %v543_v27 = vstv %s2076_s12  ;;  %s2789_s12 = sld [smem:[#allocation12 + $0x204]] }
 0x19e   :  { %2202 = vpush %v234_v29  ;;  %v249_v31 = vadd.f32 %v248_v30, %v247_v28  ;;  %v529_v28 = vstv %s2075_s13  ;;  %s2796_s13 = sld [smem:[#allocation12 + $0x283]] }
 0x1a0   :  { %2204 = vpush %v249_v31  ;;  %v557_v31 = vstv %s2077_s14  ;;  %s2072_s14 = sld [smem:[#allocation9 + $0x2]] }
 0x1a1   :  { %v344_v32 = vpop.xlane.xlu0 %343 }
 0x1a2   :  { %v345_v33 = vrot.slane %v344_v32, 4 }
 0x1a3   :  { %v359_v34 = vpop.xlane.xlu1 %358 }
 0x1a4   :  { %v346_v35 = vadd.f32 %v345_v33, %v344_v32  ;;  %v360_v36 = vrot.slane %v359_v34, 4 }
 0x1a6   :  { %v361_v37 = vadd.f32 %v360_v36, %v359_v34  ;;  %v347_v38 = vrot.slane %v346_v35, 2  ;;  %v773_v34 = vstv %s2092_s8  ;;  %s2806_s8 = sld [smem:[#allocation12 + $0x284]] }
 0x1a8   :  { %v348_v39 = vadd.f32 %v347_v38, %v346_v35  ;;  %v362_v41 = vrot.slane %v361_v37, 2 }
 0x1aa   :  { %v349_v43 = vrot.slane %v348_v39, 1  ;;  %v363_v45 = vadd.f32 %v362_v41, %v361_v37  ;;  %v787_v37 = vstv %s2093_s15  ;;  %v801_v41 = vstv %s2094_s16  ;;  %s2815_s15 = sld [smem:[#allocation12 + $0x6]]  ;;  %s2821_s16 = sld [smem:[#allocation11 + $0x2]] }
 0x1ac   :  { %v350_v46 = vadd.f32 %v349_v43, %v348_v39  ;;  %v364_v1 = vrot.slane %v363_v45, 1 }
 0x1ae   :  { %2206 = vpush %v350_v46  ;;  %v365_v47 = vadd.f32 %v364_v1, %v363_v45  ;;  %v815_v46 = vstv %s2095_s17  ;;  %s2824_s17 = sld [smem:[#allocation12 + $0x7]] }
 0x1b0   :  { %2208 = vpush %v365_v47 }
 0x1b1   :  { %v460_v0 = vpop.xlane.xlu0 %459 }
 0x1b2   :  { %v461_v48 = vrot.slane %v460_v0, 4 }
 0x1b4   :  { %v462_v49 = vadd.f32 %v461_v48, %v460_v0  ;;  %v1026_v0 = vstv %s2112_s18  ;;  %s2834_s18 = sld [smem:[#allocation12 + $0x8]] }
 0x1b5   :  { %v475_v50 = vpop.xlane.xlu0 %474 }
 0x1b6   :  { %v476_v51 = vrot.slane %v475_v50, 4  ;;  %v463_v52 = vrot.slane %v462_v49, 2 }
 0x1b8   :  { %v477_v53 = vadd.f32 %v476_v51, %v475_v50  ;;  %v464_v54 = vadd.f32 %v463_v52, %v462_v49  ;;  %v1040_v50 = vstv %s2696_s19  ;;  %s2844_s19 = sld [smem:[#allocation12 + $0x9]] }
 0x1ba   :  { %v465_v55 = vrot.slane %v464_v54, 1  ;;  %v478_v56 = vrot.slane %v477_v53, 2 }
 0x1bc   :  { %v466_v57 = vadd.f32 %v465_v55, %v464_v54  ;;  %v479_v58 = vadd.f32 %v478_v56, %v477_v53  ;;  %v1054_v53 = vstv %s2702_s21  ;;  %s2853_s21 = sld [smem:[#allocation12 + $0xb]] }
 0x1be   :  { %2210 = vpush %v466_v57  ;;  %v480_v59 = vrot.slane %v479_v58, 1  ;;  %v1068_v57 = vstv %s2709_s0  ;;  %s2862_s0 = sld [smem:[#allocation12 + $0xc]] }
 0x1c0   :  { %v481_v60 = vadd.f32 %v480_v59, %v479_v58 }
 0x1c2   :  { %2212 = vpush %v481_v60 }
 0x1cf   :  { %s2203_s30 = spop %2202 }
 0x1d0   :  { %v236_v61 = vstv %s2203_s30  ;;  %s2764_s30 = sld [smem:[#allocation12 + $0x203]] }
 0x1d1   :  { %v252_v62 = vmul.f32 0.017857144, %v236_v61  ;;  %s2205_s10 = spop %2204 }
 0x1d2   :  { %v251_v63 = vstv %s2205_s10  ;;  %s2064_s10 = sld [smem:[#allocation9 + $0x1]] }
 0x1d3   :  { %v253_v2 = vmul.f32 0.017857144, %v251_v63  ;;  %v254_v3 = vmul.f32 %v252_v62, %v252_v62  ;;  %v262_v13 = vsub.f32 %v2621_v11, %v252_v62  ;;  %v263_v14 = vsub.f32 %v2618_v8, %v252_v62 }
 0x1d4   :  { %v1279_v62 = vstv %s2716_s2  ;;  %s2874_s2 = sld [smem:[#allocation12 + $0xd]] }
 0x1d5   :  { %v255_v4 = vsub.f32 %v253_v2, %v254_v3 }
 0x1d7   :  { %v256_v7 = vmax.f32 %v255_v4, 0.0 }
 0x1d9   :  { %v257_v9 = vadd.f32 1e-05, %v256_v7  ;;  %v1532_v7 = vstv %s2723_s25  ;;  %s2883_s25 = sld [smem:[#allocation12 + $0xe]] }
 0x1db   :  { %2268 = vrsqrt.f32 %v257_v9 }
 0x1df   :  { %s2207_s23 = spop %2206 }
 0x1e0   :  { %v352_v54 = vstv %s2207_s23  ;;  %s2866_s23 = sld [smem:[#allocation12]] }
 0x1e1   :  { %s2209_s24 = spop %2208  ;;  %v2727_v58 = vmul.f32 0.017857144, %v352_v54 }
 0x1e2   :  { %v367_v59 = vstv %s2209_s24  ;;  %s2878_s24 = sld [smem:[#allocation14]] }
 0x1e3   :  { %v369_v63 = vmul.f32 0.017857144, %v367_v59  ;;  %v370_v2 = vmul.f32 %v2727_v58, %v2727_v58 }
 0x1e5   :  { %v2269_v12 = vpop.eup %2268  ;;  %v371_v9 = vsub.f32 %v369_v63, %v370_v2  ;;  %v492_v63 = vstv %s2072_s14  ;;  %v1827_v2 = vstv %s2806_s8  ;;  %s2969_s14 = sld [smem:[#allocation12 + $0x8e]] }
 0x1e6   :  { %v261_v15 = vmul.f32 %v2269_v12, %v260_v10  ;;  %s2979_s8 = sld [smem:[#allocation12 + $0x106]] }
 0x1e8   :  { %v264_v18 = vmul.f32 %v262_v13, %v261_v15  ;;  %v265_v19 = vmul.f32 %v263_v14, %v261_v15  ;;  %v1293_v13 = vstv %s2732_s26  ;;  %v372_v14 = vmax.f32 %v371_v9, 0.0  ;;  %s2894_s26 = sld [smem:[#allocation12 + $0x86]] }
 0x1e9   :  { %v577_v9 = vstv %s2815_s15  ;;  %s2986_s15 = sld [smem:[#allocation12 + $0x105]] }
 0x1ea   :  { %v268_v20 = vadd.f32 %v267_v16, %v264_v18  ;;  %v269_v21 = vadd.f32 %v267_v16, %v265_v19  ;;  %v1546_v18 = vstv %s2741_s27  ;;  %s2899_s27 = sld [smem:[#allocation12 + $0x5]] }
 0x1ec   :  { %v270_v22 = vmax.f32 %v268_v20, 0.0  ;;  %v271_v23 = vmax.f32 %v269_v21, 0.0  ;;  %v373_v20 = vadd.f32 1e-05, %v372_v14 }
 0x1ee   :  { %v2670_v25 = vmul.f32 %v270_v22, %v2608_v42  ;;  %v2672_v26 = vmul.f32 0.0, %v271_v23  ;;  %2270 = vrsqrt.f32 %v373_v20 }
 0x1ef   :  { %s2211_s7 = spop %2210 }
 0x1f0   :  { %v517_v11 = vmul.f32 %v515_v24, %v2672_v26  ;;  %v516_v8 = vmul.f32 %v515_v24, %v2670_v25  ;;  %v544_v29 = vmul.f32 %v543_v27, %v2670_v25  ;;  %v530_v30 = vmul.f32 %v529_v28, %v2670_v25 }
 0x1f1   :  { %v558_v32 = vmul.f32 %v557_v31, %v2670_v25  ;;  %v531_v33 = vmul.f32 %v529_v28, %v2672_v26  ;;  %v774_v35 = vmul.f32 %v773_v34, %v2670_v25  ;;  %v545_v36 = vmul.f32 %v543_v27, %v2672_v26 }
 0x1f2   :  { %522 = vrot.lane.b32.xlu0 %v517_v11, %s2450_s5  ;;  %520 = vrot.lane.b32.xlu1 %v516_v8, %s2450_s5  ;;  %v789_v38 = vmul.f32 %v787_v37, %v2672_v26  ;;  %v559_v39 = vmul.f32 %v557_v31, %v2672_v26  ;;  %v803_v43 = vmul.f32 %v801_v41, %v2672_v26  ;;  %v468_v19 = vstv %s2211_s7  ;;  %s2910_s7 = sld [smem:[#allocation12 + $0x80]] }
 0x1f3   :  { %v775_v45 = vmul.f32 %v773_v34, %v2672_v26  ;;  %v817_v1 = vmul.f32 %v815_v46, %v2672_v26  ;;  %v788_v47 = vmul.f32 %v787_v37, %v2670_v25  ;;  %v1028_v48 = vmul.f32 %v1026_v0, %v2672_v26  ;;  %s2213_s29 = spop %2212 }
 0x1f4   :  { %v802_v49 = vmul.f32 %v801_v41, %v2670_v25  ;;  %v1042_v51 = vmul.f32 %v1040_v50, %v2672_v26  ;;  %v816_v52 = vmul.f32 %v815_v46, %v2670_v25  ;;  %v1056_v55 = vmul.f32 %v1054_v53, %v2672_v26 }
 0x1f5   :  { %v1027_v56 = vmul.f32 %v1026_v0, %v2670_v25  ;;  %v1070_v60 = vmul.f32 %v1068_v57, %v2672_v26  ;;  %v1041_v61 = vmul.f32 %v1040_v50, %v2670_v25  ;;  %v1281_v3 = vmul.f32 %v1279_v62, %v2672_v26 }
 0x1f6   :  { %548 = vrot.lane.b32.xlu0 %v544_v29, %s2451_s20  ;;  %534 = vrot.lane.b32.xlu1 %v530_v30, %s2449_s3  ;;  %v1055_v4 = vmul.f32 %v1054_v53, %v2670_v25  ;;  %v1534_v10 = vmul.f32 %v1532_v7, %v2672_v26  ;;  %v1069_v12 = vmul.f32 %v1068_v57, %v2670_v25  ;;  %v483_v21 = vstv %s2213_s29  ;;  %s2914_s29 = sld [smem:[#allocation12 + $0x88]] }
 0x1f7   :  { %v1295_v15 = vmul.f32 %v1293_v13, %v2672_v26  ;;  %v1280_v16 = vmul.f32 %v1279_v62, %v2670_v25  ;;  %v1548_v22 = vmul.f32 %v1546_v18, %v2672_v26  ;;  %v1533_v23 = vmul.f32 %v1532_v7, %v2670_v25 }
 0x1f8   :  { %v2761_v24 = vmul.f32 0.017857144, %v468_v19  ;;  %v1785_v11 = vstv %s2748_s28  ;;  %v485_v8 = vmul.f32 0.017857144, %v483_v21  ;;  %v1294_v29 = vmul.f32 %v1293_v13, %v2670_v25  ;;  %s2904_s28 = sld [smem:[#allocation12 + $0x87]] }
 0x1f9   :  { %v1787_v28 = vmul.f32 %v1785_v11, %v2672_v26  ;;  %v1307_v30 = vstv %s2755_s1  ;;  %v1560_v34 = vstv %s2764_s30  ;;  %v1786_v37 = vmul.f32 %v1785_v11, %v2670_v25  ;;  %s2921_s1 = sld [smem:[#allocation14 + $0x1]] }
 0x1fa   :  { %562 = vrot.lane.b32.xlu0 %v558_v32, %s2452_s22  ;;  %536 = vrot.lane.b32.xlu1 %v531_v33, %s2449_s3  ;;  %v486_v27 = vmul.f32 %v2761_v24, %v2761_v24  ;;  %v1309_v32 = vmul.f32 %v1307_v30, %v2672_v26  ;;  %v1547_v33 = vmul.f32 %v1546_v18, %v2670_v25  ;;  %v1799_v41 = vstv %s2773_s4  ;;  %s2924_s30 = sld [smem:[#allocation12 + $0x89]]  ;;  %s2943_s4 = sld [smem:[#allocation12 + $0x85]] }
 0x1fb   :  { %v1801_v46 = vmul.f32 %v1799_v41, %v2672_v26  ;;  %v378_v0 = vsub.f32 %v2638_v44, %v2727_v58  ;;  %v1561_v50 = vmul.f32 %v1560_v34, %v2670_v25  ;;  %v1800_v54 = vmul.f32 %v1799_v41, %v2670_v25 }
 0x1fc   :  { %v487_v31 = vsub.f32 %v485_v8, %v486_v27  ;;  %v591_v18 = vstv %s2824_s17  ;;  %v1828_v20 = vmul.f32 %v1827_v2, %v2670_v25  ;;  %s3002_s17 = sld [smem:[#allocation12 + $0x107]] }
 0x1fe   :  { %778 = vrot.lane.b32.xlu0 %v774_v35, %s2450_s5  ;;  %550 = vrot.lane.b32.xlu1 %v545_v36, %s2451_s20  ;;  %v488_v35 = vmax.f32 %v487_v31, 0.0  ;;  %v1562_v36 = vmul.f32 %v1560_v34, %v2672_v26 }
 0x202   :  { %794 = vrot.lane.b32.xlu0 %v789_v38, %s2449_s3  ;;  %564 = vrot.lane.b32.xlu1 %v559_v39, %s2452_s22  ;;  %v2271_v38 = vpop.eup %2270  ;;  %v376_v39 = vstv %s2064_s10  ;;  %s2935_s10 = sld [smem:[#allocation12 + $0x8b]] }
 0x206   :  { %808 = vrot.lane.b32.xlu0 %v803_v43, %s2451_s20  ;;  %780 = vrot.lane.b32.xlu1 %v775_v45, %s2450_s5  ;;  %v489_v43 = vadd.f32 1e-05, %v488_v35  ;;  %v377_v45 = vmul.f32 %v2271_v38, %v376_v39  ;;  %v653_v35 = vstv %s2862_s0  ;;  %s3043_s0 = sld [smem:[#allocation12 + $0x207]] }
 0x208   :  { %2272 = vrsqrt.f32 %v489_v43  ;;  %v667_v43 = vstv %s2874_s2  ;;  %s3056_s2 = sld [smem:[#allocation12 + $0x286]] }
 0x20a   :  { %822 = vrot.lane.b32.xlu0 %v817_v1, %s2452_s22  ;;  %792 = vrot.lane.b32.xlu1 %v788_v47, %s2449_s3  ;;  %v1308_v1 = vmul.f32 %v1307_v30, %v2670_v25  ;;  %v1321_v47 = vstv %s2780_s6  ;;  %s2946_s6 = sld [smem:[#allocation12 + $0x8c]] }
 0x20e   :  { %1033 = vrot.lane.b32.xlu0 %v1028_v48, %s2450_s5  ;;  %806 = vrot.lane.b32.xlu1 %v802_v49, %s2451_s20  ;;  %v380_v48 = vmul.f32 %v378_v0, %v377_v45  ;;  %v1323_v49 = vmul.f32 %v1321_v47, %v2672_v26 }
 0x212   :  { %1047 = vrot.lane.b32.xlu0 %v1042_v51, %s2449_s3  ;;  %820 = vrot.lane.b32.xlu1 %v816_v52, %s2452_s22  ;;  %v383_v51 = vstv %s2786_s11  ;;  %v1574_v52 = vstv %s2789_s12  ;;  %v2273_v62 = vpop.eup %2272  ;;  %s2951_s11 = sld [smem:[#allocation12 + $0x100]]  ;;  %s2959_s12 = sld [smem:[#allocation12 + $0x8d]] }
 0x213   :  { %v384_v44 = vadd.f32 %v383_v51, %v380_v48  ;;  %v1576_v53 = vmul.f32 %v1574_v52, %v2672_v26  ;;  %v1575_v7 = vmul.f32 %v1574_v52, %v2670_v25 }
 0x215   :  { %v386_v59 = vmax.f32 %v384_v44, 0.0 }
 0x216   :  { %1061 = vrot.lane.b32.xlu0 %v1056_v55, %s2451_s20  ;;  %1031 = vrot.lane.b32.xlu1 %v1027_v56, %s2450_s5  ;;  %v379_v55 = vsub.f32 %v2635_v40, %v2727_v58  ;;  %v1813_v56 = vstv %s2796_s13  ;;  %s2963_s13 = sld [smem:[#allocation14 + $0x2]] }
 0x217   :  { %v2829_v58 = vmul.f32 %v386_v59, %v2608_v42  ;;  %v1814_v14 = vmul.f32 %v1813_v56, %v2670_v25 }
 0x218   :  { %v381_v57 = vmul.f32 %v379_v55, %v377_v45  ;;  %v511_v45 = vstv %s2878_s24  ;;  %s3058_s24 = sld [smem:[#allocation14 + $0x3]] }
 0x219   :  { %v592_v21 = vmul.f32 %v591_v18, %v2829_v58 }
 0x21a   :  { %1075 = vrot.lane.b32.xlu0 %v1070_v60, %s2452_s22  ;;  %1045 = vrot.lane.b32.xlu1 %v1041_v61, %s2449_s3  ;;  %v1815_v60 = vmul.f32 %v1813_v56, %v2672_v26  ;;  %v1322_v61 = vmul.f32 %v1321_v47, %v2670_v25  ;;  %v385_v40 = vadd.f32 %v383_v51, %v381_v57  ;;  %v835_v56 = vstv %s2894_s26  ;;  %s3071_s26 = sld [smem:[#allocation12 + $0x188]] }
 0x21b   :  { %v571_v57 = vstv %s2899_s27  ;;  %s3074_s27 = sld [smem:[#allocation14 + $0x4]] }
 0x21e   :  { %1286 = vrot.lane.b32.xlu0 %v1281_v3, %s2450_s5  ;;  %1059 = vrot.lane.b32.xlu1 %v1055_v4, %s2451_s20  ;;  %v493_v3 = vmul.f32 %v2273_v62, %v492_v63  ;;  %v1829_v4 = vmul.f32 %v1827_v2, %v2672_v26 }
 0x222   :  { %1539 = vrot.lane.b32.xlu0 %v1534_v10, %s2450_s5  ;;  %1073 = vrot.lane.b32.xlu1 %v1069_v12, %s2452_s22  ;;  %v494_v10 = vsub.f32 %v2653_v6, %v2761_v24  ;;  %v387_v12 = vmax.f32 %v385_v40, 0.0 }
 0x224   :  { %v496_v13 = vmul.f32 %v494_v10, %v493_v3  ;;  %v2848_v6 = vmul.f32 0.0, %v387_v12  ;;  %v765_v12 = vstv %s2910_s7  ;;  %s3088_s7 = sld [smem:[#allocation12 + $0x280]] }
 0x226   :  { %1300 = vrot.lane.b32.xlu0 %v1295_v15, %s2449_s3  ;;  %1284 = vrot.lane.b32.xlu1 %v1280_v16, %s2450_s5  ;;  %v578_v15 = vmul.f32 %v577_v9, %v2829_v58  ;;  %v499_v16 = vstv %s2821_s16  ;;  %v579_v27 = vmul.f32 %v577_v9, %v2848_v6  ;;  %v593_v30 = vmul.f32 %v591_v18, %v2848_v6  ;;  %s2991_s16 = sld [smem:[#allocation12 + $0x186]] }
 0x227   :  { %v500_v19 = vadd.f32 %v499_v16, %v496_v13  ;;  %v837_v63 = vmul.f32 %v835_v56, %v2848_v6  ;;  %v863_v18 = vstv %s2914_s29  ;;  %s3092_s29 = sld [smem:[#allocation12 + $0x185]] }
 0x229   :  { %v502_v8 = vmax.f32 %v500_v19, 0.0 }
 0x22a   :  { %1553 = vrot.lane.b32.xlu0 %v1548_v22, %s2449_s3  ;;  %1537 = vrot.lane.b32.xlu1 %v1533_v23, %s2450_s5  ;;  %v605_v22 = vstv %s2834_s18  ;;  %v495_v23 = vsub.f32 %v2650_v5, %v2761_v24  ;;  %s3010_s18 = sld [smem:[#allocation12 + $0x206]] }
 0x22b   :  { %v2869_v24 = vmul.f32 %v502_v8, %v2608_v42  ;;  %v607_v34 = vmul.f32 %v605_v22, %v2848_v6  ;;  %v865_v8 = vmul.f32 %v863_v18, %v2848_v6 }
 0x22c   :  { %v497_v11 = vmul.f32 %v495_v23, %v493_v3  ;;  %v849_v3 = vstv %s2904_s28  ;;  %s3084_s28 = sld [smem:[#allocation12 + $0x109]] }
 0x22d   :  { %v654_v39 = vmul.f32 %v653_v35, %v2869_v24  ;;  %v668_v0 = vmul.f32 %v667_v43, %v2869_v24 }
 0x22e   :  { %1792 = vrot.lane.b32.xlu0 %v1787_v28, %s2450_s5  ;;  %1298 = vrot.lane.b32.xlu1 %v1294_v29, %s2449_s3  ;;  %v606_v28 = vmul.f32 %v605_v22, %v2829_v58  ;;  %v619_v29 = vstv %s2844_s19  ;;  %v501_v5 = vadd.f32 %v499_v16, %v497_v11  ;;  %v836_v11 = vmul.f32 %v835_v56, %v2829_v58  ;;  %s3022_s19 = sld [smem:[#allocation12 + $0x187]] }
 0x22f   :  { %v620_v31 = vmul.f32 %v619_v29, %v2829_v58  ;;  %v621_v38 = vmul.f32 %v619_v29, %v2848_v6  ;;  %v573_v29 = vmul.f32 %v571_v57, %v2848_v6 }
 0x232   :  { %1314 = vrot.lane.b32.xlu0 %v1309_v32, %s2451_s20  ;;  %1551 = vrot.lane.b32.xlu1 %v1547_v33, %s2449_s3  ;;  %v639_v32 = vstv %s2853_s21  ;;  %v503_v33 = vmax.f32 %v501_v5, 0.0  ;;  %s3031_s21 = sld [smem:[#allocation12 + $0x108]] }
 0x233   :  { %v640_v42 = vmul.f32 %v639_v32, %v2869_v24 }
 0x236   :  { %1567 = vrot.lane.b32.xlu0 %v1562_v36, %s2451_s20  ;;  %1790 = vrot.lane.b32.xlu1 %v1786_v37, %s2450_s5  ;;  %v507_v36 = vstv %s2866_s23  ;;  %v2888_v37 = vmul.f32 0.0, %v503_v33  ;;  %v850_v33 = vmul.f32 %v849_v3, %v2829_v58  ;;  %s3045_s23 = sld [smem:[#allocation12 + $0x180]] }
 0x237   :  { %v508_v41 = vmul.f32 %v507_v36, %v2670_v25 }
 0x238   :  { %v641_v47 = vmul.f32 %v639_v32, %v2888_v37  ;;  %v655_v44 = vmul.f32 %v653_v35, %v2888_v37  ;;  %v669_v62 = vmul.f32 %v667_v43, %v2888_v37  ;;  %v864_v43 = vmul.f32 %v863_v18, %v2829_v58 }
 0x239   :  { %v512_v48 = vadd.f32 %v511_v45, %v508_v41 }
 0x23a   :  { %1806 = vrot.lane.b32.xlu0 %v1801_v46, %s2449_s3  ;;  %1312 = vrot.lane.b32.xlu1 %v1308_v1, %s2451_s20 }
 0x23e   :  { %1328 = vrot.lane.b32.xlu0 %v1323_v49, %s2452_s22  ;;  %1565 = vrot.lane.b32.xlu1 %v1561_v50, %s2451_s20  ;;  %v681_v49 = vstv %s2883_s25  ;;  %s3060_s25 = sld [smem:[#allocation12 + $0x200]] }
 0x242   :  { %1581 = vrot.lane.b32.xlu0 %v1576_v53, %s2452_s22  ;;  %1804 = vrot.lane.b32.xlu1 %v1800_v54, %s2449_s3  ;;  %v682_v53 = vmul.f32 %v681_v49, %v2869_v24  ;;  %v509_v54 = vmul.f32 %v507_v36, %v2672_v26  ;;  %v897_v36 = vstv %s2935_s10  ;;  %s3107_s10 = sld [smem:[#allocation12 + $0x205]] }
 0x244   :  { %v513_v2 = vadd.f32 %v511_v45, %v509_v54  ;;  %v899_v45 = vmul.f32 %v897_v36, %v2888_v37 }
 0x246   :  { %1820 = vrot.lane.b32.xlu0 %v1815_v60, %s2451_s20  ;;  %1326 = vrot.lane.b32.xlu1 %v1322_v61, %s2452_s22 }
 0x24a   :  { %1834 = vrot.lane.b32.xlu0 %v1829_v4, %s2452_s22  ;;  %1579 = vrot.lane.b32.xlu1 %v1575_v7, %s2452_s22  ;;  %v572_v4 = vmul.f32 %v571_v57, %v2829_v58  ;;  %v925_v57 = vstv %s2959_s12  ;;  %s3142_s12 = sld [smem:[#allocation12 + $0x209]] }
 0x24e   :  { %1818 = vrot.lane.b32.xlu1 %v1814_v14, %s2451_s20  ;;  %582 = vrot.lane.b32.xlu0 %v578_v15, %s2450_s5  ;;  %v683_v14 = vmul.f32 %v681_v49, %v2888_v37  ;;  %v851_v15 = vmul.f32 %v849_v3, %v2848_v6 }
 0x252   :  { %1832 = vrot.lane.b32.xlu1 %v1828_v20, %s2452_s22  ;;  %596 = vrot.lane.b32.xlu0 %v592_v21, %s2449_s3  ;;  %v767_v20 = vmul.f32 %v765_v12, %v2672_v26  ;;  %v769_v21 = vstv %s2921_s1  ;;  %s3094_s1 = sld [smem:[#allocation12 + $0x208]] }
 0x254   :  { %v771_v5 = vadd.f32 %v769_v21, %v767_v20 }
 0x256   :  { %584 = vrot.lane.b32.xlu1 %v579_v27, %s2450_s5  ;;  %610 = vrot.lane.b32.xlu0 %v606_v28, %s2451_s20  ;;  %v877_v28 = vstv %s2924_s30  ;;  %s3103_s30 = sld [smem:[#allocation14 + $0x5]] }
 0x25a   :  { %598 = vrot.lane.b32.xlu1 %v593_v30, %s2449_s3  ;;  %624 = vrot.lane.b32.xlu0 %v620_v31, %s2452_s22 }
 0x25e   :  { %612 = vrot.lane.b32.xlu1 %v607_v34, %s2451_s20  ;;  %644 = vrot.lane.b32.xlu0 %v640_v42, %s2450_s5  ;;  %v879_v34 = vmul.f32 %v877_v28, %v2848_v6  ;;  %v766_v42 = vmul.f32 %v765_v12, %v2670_v25 }
 0x262   :  { %626 = vrot.lane.b32.xlu1 %v621_v38, %s2452_s22  ;;  %658 = vrot.lane.b32.xlu0 %v654_v39, %s2449_s3 }
 0x264   :  { %v521_v46 = vpop.permute.xlu1 %520  ;;  %v523_v1 = vpop.permute.xlu0 %522 }
 0x265   :  { %v526_v50 = vadd.f32 %v521_v46, %v512_v48  ;;  %v527_v7 = vadd.f32 %v523_v1, %v513_v2  ;;  %v829_v46 = vstv %s2943_s4  ;;  %v770_v1 = vadd.f32 %v769_v21, %v766_v42  ;;  %s3113_s4 = sld [smem:[#allocation12 + $0x287]] }
 0x266   :  { %646 = vrot.lane.b32.xlu1 %v641_v47, %s2450_s5  ;;  %672 = vrot.lane.b32.xlu0 %v668_v0, %s2451_s20  ;;  %v911_v0 = vstv %s2946_s6  ;;  %v1018_v48 = vstv %s2951_s11  ;;  %v898_v2 = vmul.f32 %v897_v36, %v2869_v24  ;;  %s3125_s6 = sld [smem:[#allocation12 + $0x189]]  ;;  %s3134_s11 = sld [smem:[#allocation12 + $0x285]] }
 0x267   :  { %v913_v54 = vmul.f32 %v911_v0, %v2888_v37  ;;  %v1020_v56 = vmul.f32 %v1018_v48, %v2672_v26  ;;  %v1019_v20 = vmul.f32 %v1018_v48, %v2670_v25  ;;  %v1088_v21 = vstv %s2979_s8  ;;  %s3182_s8 = sld [smem:[#allocation12 + $0x289]] }
 0x268   :  { %v535_v51 = vpop.permute.xlu1 %534  ;;  %v549_v52 = vpop.permute.xlu0 %548  ;;  %v1594_v48 = vstv %s3010_s18  ;;  %s3211_s18 = sld [smem:[#allocation12 + $0x20b]] }
 0x269   :  { %v540_v55 = vadd.f32 %v535_v51, %v526_v50  ;;  %v831_v51 = vmul.f32 %v829_v46, %v2848_v6 }
 0x26a   :  { %660 = vrot.lane.b32.xlu1 %v655_v44, %s2449_s3  ;;  %686 = vrot.lane.b32.xlu0 %v682_v53, %s2452_s22  ;;  %v878_v53 = vmul.f32 %v877_v28, %v2829_v58  ;;  %v1090_v28 = vmul.f32 %v1088_v21, %v2848_v6 }
 0x26b   :  { %v554_v59 = vadd.f32 %v549_v52, %v540_v55 }
 0x26c   :  { %v537_v60 = vpop.permute.xlu1 %536  ;;  %v563_v61 = vpop.permute.xlu0 %562 }
 0x26d   :  { %v568_v40 = vadd.f32 %v563_v61, %v554_v59  ;;  %v541_v16 = vadd.f32 %v537_v60, %v527_v7  ;;  %v1022_v60 = vstv %s2963_s13  ;;  %v939_v7 = vstv %s2969_s14  ;;  %s3157_s13 = sld [smem:[#allocation12 + $0x288]]  ;;  %s3168_s14 = sld [smem:[#allocation12 + $0x10b]] }
 0x26e   :  { %674 = vrot.lane.b32.xlu1 %v669_v62, %s2451_s20  ;;  %842 = vrot.lane.b32.xlu0 %v837_v63, %s2450_s5  ;;  %v1024_v3 = vadd.f32 %v1022_v60, %v1020_v56  ;;  %v941_v18 = vmul.f32 %v939_v7, %v2888_v37  ;;  %v940_v36 = vmul.f32 %v939_v7, %v2869_v24 }
 0x26f   :  { %v2929_v9 = vadd.f32 %v572_v4, %v568_v40  ;;  %v927_v40 = vmul.f32 %v925_v57, %v2888_v37 }
 0x270   :  { %v551_v10 = vpop.permute.xlu1 %550  ;;  %v779_v13 = vpop.permute.xlu0 %778 }
 0x271   :  { %v555_v19 = vadd.f32 %v551_v10, %v541_v16  ;;  %v784_v49 = vadd.f32 %v779_v13, %v770_v1  ;;  %v830_v10 = vmul.f32 %v829_v46, %v2829_v58  ;;  %v912_v16 = vmul.f32 %v911_v0, %v2869_v24 }
 0x272   :  { %688 = vrot.lane.b32.xlu1 %v683_v14, %s2452_s22  ;;  %856 = vrot.lane.b32.xlu0 %v851_v15, %s2449_s3  ;;  %v1089_v1 = vmul.f32 %v1088_v21, %v2829_v58 }
 0x274   :  { %v565_v22 = vpop.permute.xlu1 %564  ;;  %v795_v23 = vpop.permute.xlu0 %794 }
 0x275   :  { %v569_v27 = vadd.f32 %v565_v22, %v555_v19  ;;  %v1082_v22 = vstv %s2986_s15  ;;  %s3186_s15 = sld [smem:[#allocation12 + $0xa]] }
 0x276   :  { %840 = vrot.lane.b32.xlu1 %v836_v11, %s2450_s5  ;;  %870 = vrot.lane.b32.xlu0 %v865_v8, %s2451_s20 }
 0x277   :  { %v2953_v30 = vadd.f32 %v573_v29, %v569_v27  ;;  %v926_v27 = vmul.f32 %v925_v57, %v2869_v24  ;;  %v1023_v29 = vadd.f32 %v1022_v60, %v1019_v20 }
 0x278   :  { %v781_v31 = vpop.permute.xlu1 %780  ;;  %v809_v32 = vpop.permute.xlu0 %808 }
 0x279   :  { %v785_v35 = vadd.f32 %v781_v31, %v771_v5  ;;  %v1341_v31 = vstv %s2991_s16  ;;  %s3191_s16 = sld [smem:[#allocation12 + $0x18b]] }
 0x27a   :  { %854 = vrot.lane.b32.xlu1 %v850_v33, %s2449_s3  ;;  %884 = vrot.lane.b32.xlu0 %v879_v34, %s2452_s22 }
 0x27b   :  { %v799_v38 = vadd.f32 %v795_v23, %v785_v35 }
 0x27c   :  { %v793_v39 = vpop.permute.xlu1 %792  ;;  %v823_v41 = vpop.permute.xlu0 %822 }
 0x27d   :  { %v813_v47 = vadd.f32 %v809_v32, %v799_v38  ;;  %v798_v55 = vadd.f32 %v793_v39, %v784_v49  ;;  %v1084_v32 = vmul.f32 %v1082_v22, %v2848_v6  ;;  %v1343_v38 = vmul.f32 %v1341_v31, %v2848_v6 }
 0x27e   :  { %868 = vrot.lane.b32.xlu1 %v864_v43, %s2451_s20  ;;  %904 = vrot.lane.b32.xlu0 %v899_v45, %s2450_s5  ;;  %v1083_v49 = vmul.f32 %v1082_v22, %v2829_v58 }
 0x27f   :  { %v827_v50 = vadd.f32 %v823_v41, %v813_v47  ;;  %v1102_v41 = vstv %s3002_s17  ;;  %s3202_s17 = sld [smem:[#allocation12 + $0x10c]] }
 0x280   :  { %v807_v52 = vpop.permute.xlu1 %806  ;;  %v1034_v44 = vpop.permute.xlu0 %1033  ;;  %v1104_v47 = vmul.f32 %v1102_v41, %v2848_v6  ;;  %v1103_v57 = vmul.f32 %v1102_v41, %v2829_v58  ;;  %v1777_v41 = vstv %s3088_s7  ;;  %s3316_s7 = sld [smem:[#allocation12 + $0x20e]] }
 0x281   :  { %v2981_v59 = vadd.f32 %v831_v51, %v827_v50  ;;  %v812_v61 = vadd.f32 %v807_v52, %v798_v55  ;;  %v1038_v12 = vadd.f32 %v1034_v44, %v1024_v3  ;;  %v1342_v44 = vmul.f32 %v1341_v31, %v2829_v58 }
 0x282   :  { %882 = vrot.lane.b32.xlu1 %v878_v53, %s2452_s22  ;;  %918 = vrot.lane.b32.xlu0 %v913_v54, %s2449_s3  ;;  %v1596_v53 = vmul.f32 %v1594_v48, %v2848_v6  ;;  %v1355_v54 = vstv %s3022_s19  ;;  %v1608_v3 = vstv %s3043_s0  ;;  %s3223_s19 = sld [smem:[#allocation12 + $0x18c]] }
 0x283   :  { %v1357_v60 = vmul.f32 %v1355_v54, %v2848_v6  ;;  %s3246_s0 = sld [smem:[#allocation12 + $0x20c]] }
 0x284   :  { %v821_v62 = vpop.permute.xlu1 %820  ;;  %v1048_v63 = vpop.permute.xlu0 %1047 }
 0x285   :  { %v826_v4 = vadd.f32 %v821_v62, %v812_v61  ;;  %v1052_v19 = vadd.f32 %v1048_v63, %v1038_v12  ;;  %v1116_v61 = vstv %s3031_s21  ;;  %v1356_v12 = vmul.f32 %v1355_v54, %v2829_v58  ;;  %s3233_s21 = sld [smem:[#allocation12 + $0x10d]] }
 0x286   :  { %902 = vrot.lane.b32.xlu1 %v898_v2, %s2450_s5  ;;  %932 = vrot.lane.b32.xlu0 %v927_v40, %s2451_s20  ;;  %v1595_v2 = vmul.f32 %v1594_v48, %v2829_v58  ;;  %v1118_v40 = vmul.f32 %v1116_v61, %v2848_v6  ;;  %v1117_v22 = vmul.f32 %v1116_v61, %v2829_v58  ;;  %v1588_v61 = vstv %s3107_s10 }
 0x287   :  { %v2996_v13 = vadd.f32 %v830_v10, %v826_v4  ;;  %v1271_v4 = vstv %s3045_s23  ;;  %v1779_v54 = vmul.f32 %v1777_v41, %v2672_v26  ;;  %s3257_s23 = sld [smem:[#allocation12 + $0x28b]] }
 0x288   :  { %v1032_v14 = vpop.permute.xlu1 %1031  ;;  %v1062_v15 = vpop.permute.xlu0 %1061 }
 0x289   :  { %v1066_v23 = vadd.f32 %v1062_v15, %v1052_v19  ;;  %v1037_v33 = vadd.f32 %v1032_v14, %v1023_v29  ;;  %v1610_v14 = vmul.f32 %v1608_v3, %v2848_v6  ;;  %v1273_v15 = vmul.f32 %v1271_v4, %v2672_v26 }
 0x28a   :  { %916 = vrot.lane.b32.xlu1 %v912_v16, %s2449_s3  ;;  %946 = vrot.lane.b32.xlu0 %v941_v18, %s2452_s22  ;;  %v1847_v16 = vstv %s3056_s2  ;;  %v1275_v18 = vstv %s3058_s24  ;;  %s3266_s2 = sld [smem:[#allocation12 + $0x18d]]  ;;  %s3270_s24 = sld [smem:[#allocation12 + $0x8a]] }
 0x28b   :  { %v1524_v19 = vstv %s3060_s25  ;;  %s3277_s25 = sld [smem:[#allocation12 + $0x10e]] }
 0x28c   :  { %v1046_v11 = vpop.permute.xlu1 %1045  ;;  %v1076_v8 = vpop.permute.xlu0 %1075 }
 0x28d   :  { %v1080_v5 = vadd.f32 %v1076_v8, %v1066_v23  ;;  %v1051_v39 = vadd.f32 %v1046_v11, %v1037_v33  ;;  %v1849_v23 = vmul.f32 %v1847_v16, %v2848_v6  ;;  %v1277_v11 = vadd.f32 %v1275_v18, %v1273_v15 }
 0x28e   :  { %930 = vrot.lane.b32.xlu1 %v926_v27, %s2451_s20  ;;  %1095 = vrot.lane.b32.xlu0 %v1090_v28, %s2450_s5  ;;  %v1526_v8 = vmul.f32 %v1524_v19, %v2672_v26  ;;  %v1369_v27 = vstv %s3071_s26  ;;  %v1528_v28 = vstv %s3074_s27  ;;  %v1609_v33 = vmul.f32 %v1608_v3, %v2829_v58  ;;  %s3285_s26 = sld [smem:[#allocation12 + $0x20d]]  ;;  %s3294_s27 = sld [smem:[#allocation12 + $0x28c]] }
 0x28f   :  { %v3015_v34 = vadd.f32 %v1084_v32, %v1080_v5  ;;  %v1272_v5 = vmul.f32 %v1271_v4, %v2670_v25 }
 0x290   :  { %v1060_v42 = vpop.permute.xlu1 %1059  ;;  %v3017_v35 = vpop.permute.xlu0 %1286 }
 0x291   :  { %v1065_v43 = vadd.f32 %v1060_v42, %v1051_v39  ;;  %v1291_v29 = vadd.f32 %v3017_v35, %v1277_v11  ;;  %v1371_v42 = vmul.f32 %v1369_v27, %v2848_v6  ;;  %v1130_v39 = vstv %s3084_s28  ;;  %s3306_s28 = sld [smem:[#allocation12 + $0x18e]] }
 0x292   :  { %944 = vrot.lane.b32.xlu1 %v940_v36, %s2452_s22  ;;  %1348 = vrot.lane.b32.xlu0 %v1343_v38, %s2450_s5  ;;  %v1530_v36 = vadd.f32 %v1528_v28, %v1526_v8  ;;  %v1335_v35 = vstv %s3092_s29  ;;  %v1778_v11 = vmul.f32 %v1777_v41, %v2670_v25  ;;  %s3334_s29 = sld [smem:[#allocation12 + $0x28e]] }
 0x294   :  { %v1074_v45 = vpop.permute.xlu1 %1073  ;;  %v3026_v46 = vpop.permute.xlu0 %1539 }
 0x295   :  { %v1079_v0 = vadd.f32 %v1074_v45, %v1065_v43  ;;  %v1544_v43 = vadd.f32 %v3026_v46, %v1530_v36 }
 0x296   :  { %1093 = vrot.lane.b32.xlu1 %v1089_v1, %s2450_s5  ;;  %1109 = vrot.lane.b32.xlu0 %v1104_v47, %s2449_s3  ;;  %v1622_v1 = vstv %s3094_s1  ;;  %v1276_v47 = vadd.f32 %v1275_v18, %v1272_v5  ;;  %s2181_s1 = sld [smem:[#allocation12 + $0x28a]] }
 0x297   :  { %v3036_v50 = vadd.f32 %v1083_v49, %v1079_v0  ;;  %v1525_v0 = vmul.f32 %v1524_v19, %v2670_v25  ;;  %v1841_v25 = vstv %s3134_s11  ;;  %s3524_s11 = sld [smem:[#allocation15]] }
 0x298   :  { %v3038_v51 = vpop.permute.xlu1 %1284  ;;  %v1301_v52 = vpop.permute.xlu0 %1300 }
 0x299   :  { %v1305_v38 = vadd.f32 %v1301_v52, %v1291_v29  ;;  %v1848_v52 = vmul.f32 %v1847_v16, %v2829_v58  ;;  %v1383_v29 = vstv %s3125_s6 }
 0x29a   :  { %1346 = vrot.lane.b32.xlu1 %v1342_v44, %s2450_s5  ;;  %1601 = vrot.lane.b32.xlu0 %v1596_v53, %s2450_s5  ;;  %v1132_v44 = vmul.f32 %v1130_v39, %v2848_v6 }
 0x29c   :  { %v3049_v55 = vpop.permute.xlu1 %1537  ;;  %v3051_v56 = vpop.permute.xlu0 %1553 }
 0x29d   :  { %v1558_v53 = vadd.f32 %v3051_v56, %v1544_v43  ;;  %v1529_v56 = vadd.f32 %v1528_v28, %v1525_v0  ;;  %v1636_v43 = vstv %s3142_s12  ;;  %v1843_v0 = vmul.f32 %v1841_v25, %v2848_v6  ;;  %s3526_s12 = sld [smem:[#allocation15 + $0x1]] }
 0x29e   :  { %1107 = vrot.lane.b32.xlu1 %v1103_v57, %s2449_s3  ;;  %1362 = vrot.lane.b32.xlu0 %v1357_v60, %s2449_s3  ;;  %v1337_v57 = vmul.f32 %v1335_v35, %v2848_v6  ;;  %v1781_v60 = vstv %s3103_s30 }
 0x29f   :  { %v1783_v16 = vadd.f32 %v1781_v60, %v1779_v54  ;;  %v1543_v19 = vadd.f32 %v3049_v55, %v1529_v56  ;;  %v1638_v54 = vmul.f32 %v1636_v43, %v2848_v6 }
 0x2a0   :  { %v3064_v62 = vpop.permute.xlu1 %1298  ;;  %v3066_v63 = vpop.permute.xlu0 %1792 }
 0x2a2   :  { %1599 = vrot.lane.b32.xlu1 %v1595_v2, %s2450_s5  ;;  %1123 = vrot.lane.b32.xlu0 %v1118_v40, %s2451_s20  ;;  %v1290_v2 = vadd.f32 %v3038_v51, %v1276_v47  ;;  %v1590_v51 = vmul.f32 %v1588_v61, %v2848_v6  ;;  %v1589_v47 = vmul.f32 %v1588_v61, %v2829_v58 }
 0x2a4   :  { %v3078_v7 = vpop.permute.xlu1 %1551  ;;  %v1315_v10 = vpop.permute.xlu0 %1314  ;;  %v1304_v15 = vadd.f32 %v3064_v62, %v1290_v2  ;;  %v1384_v2 = vmul.f32 %v1383_v29, %v2829_v58 }
 0x2a5   :  { %v1319_v45 = vadd.f32 %v1315_v10, %v1305_v38  ;;  %v1370_v10 = vmul.f32 %v1369_v27, %v2829_v58  ;;  %v1131_v27 = vmul.f32 %v1130_v39, %v2829_v58  ;;  %v1557_v5 = vadd.f32 %v3078_v7, %v1543_v19 }
 0x2a6   :  { %1360 = vrot.lane.b32.xlu1 %v1356_v12, %s2449_s3  ;;  %1615 = vrot.lane.b32.xlu0 %v1610_v14, %s2449_s3  ;;  %v1624_v12 = vmul.f32 %v1622_v1, %v2848_v6  ;;  %v1861_v14 = vstv %s3113_s4  ;;  %v1782_v38 = vadd.f32 %v1781_v60, %v1778_v11  ;;  %v1623_v7 = vmul.f32 %v1622_v1, %v2829_v58 }
 0x2a7   :  { %v1863_v28 = vmul.f32 %v1861_v14, %v2848_v6  ;;  %v1889_v19 = vstv %s3182_s8  ;;  %s2454_s8 = smov 12  }
 0x2a8   :  { %v3096_v20 = vpop.permute.xlu1 %1790  ;;  %v1568_v21 = vpop.permute.xlu0 %1567 }
 0x2a9   :  { %v1572_v40 = vadd.f32 %v1568_v21, %v1558_v53  ;;  %v1797_v21 = vadd.f32 %v3066_v63, %v1783_v16  ;;  %v1336_v63 = vmul.f32 %v1335_v35, %v2829_v58  ;;  %v1862_v53 = vmul.f32 %v1861_v14, %v2829_v58 }
 0x2aa   :  { %1121 = vrot.lane.b32.xlu1 %v1117_v22, %s2451_s20  ;;  %1854 = vrot.lane.b32.xlu0 %v1849_v23, %s2450_s5  ;;  %v1637_v16 = vmul.f32 %v1636_v43, %v2829_v58 }
 0x2ac   :  { %v1313_v31 = vpop.permute.xlu1 %1312  ;;  %v1807_v32 = vpop.permute.xlu0 %1806 }
 0x2ad   :  { %v1318_v22 = vadd.f32 %v1313_v31, %v1304_v15 }
 0x2ae   :  { %1613 = vrot.lane.b32.xlu1 %v1609_v33, %s2449_s3  ;;  %1376 = vrot.lane.b32.xlu0 %v1371_v42, %s2451_s20  ;;  %v1811_v33 = vadd.f32 %v1807_v32, %v1797_v21  ;;  %v1385_v32 = vmul.f32 %v1383_v29, %v2848_v6  ;;  %v633_v21 = vstv %s3186_s15  ;;  %v1403_v29 = vstv %s3191_s16 }
 0x2af   :  { %v635_v43 = vmul.f32 %v633_v21, %v2888_v37 }
 0x2b0   :  { %v1566_v48 = vpop.permute.xlu1 %1565  ;;  %v1329_v49 = vpop.permute.xlu0 %1328 }
 0x2b1   :  { %v1333_v46 = vadd.f32 %v1329_v49, %v1319_v45  ;;  %v1571_v31 = vadd.f32 %v1566_v48, %v1557_v5  ;;  %v1796_v48 = vadd.f32 %v3096_v20, %v1782_v38 }
 0x2b2   :  { %1852 = vrot.lane.b32.xlu1 %v1848_v52, %s2450_s5  ;;  %1137 = vrot.lane.b32.xlu0 %v1132_v44, %s2452_s22 }
 0x2b3   :  { %v3137_v3 = vadd.f32 %v1337_v57, %v1333_v46  ;;  %v1875_v57 = vstv %s3157_s13  ;;  %s3528_s13 = sld [smem:[#allocation17]] }
 0x2b4   :  { %v1805_v4 = vpop.permute.xlu1 %1804  ;;  %v1582_v26 = vpop.permute.xlu0 %1581 }
 0x2b5   :  { %v1586_v18 = vadd.f32 %v1582_v26, %v1572_v40  ;;  %v1810_v46 = vadd.f32 %v1805_v4, %v1796_v48  ;;  %v1877_v40 = vmul.f32 %v1875_v57, %v2848_v6  ;;  %v1150_v26 = vstv %s3168_s14  ;;  %s3531_s14 = sld [smem:[#allocation17 + $0x1]] }
 0x2b6   :  { %1374 = vrot.lane.b32.xlu1 %v1370_v10, %s2451_s20  ;;  %1629 = vrot.lane.b32.xlu0 %v1624_v12, %s2451_s20  ;;  %v1842_v4 = vmul.f32 %v1841_v25, %v2829_v58  ;;  %v1405_v25 = vmul.f32 %v1403_v29, %v2888_v37 }
 0x2b7   :  { %v3150_v23 = vadd.f32 %v1590_v51, %v1586_v18  ;;  %v1152_v18 = vmul.f32 %v1150_v26, %v2888_v37 }
 0x2b8   :  { %v1327_v8 = vpop.permute.xlu1 %1326  ;;  %v1821_v62 = vpop.permute.xlu0 %1820 }
 0x2b9   :  { %v1332_v55 = vadd.f32 %v1327_v8, %v1318_v22  ;;  %v1825_v42 = vadd.f32 %v1821_v62, %v1811_v33  ;;  %v1876_v8 = vmul.f32 %v1875_v57, %v2829_v58  ;;  %v1891_v62 = vmul.f32 %v1889_v19, %v2848_v6 }
 0x2ba   :  { %1135 = vrot.lane.b32.xlu1 %v1131_v27, %s2452_s22  ;;  %1868 = vrot.lane.b32.xlu0 %v1863_v28, %s2449_s3  ;;  %v634_v28 = vmul.f32 %v633_v21, %v2869_v24  ;;  %v1151_v6 = vmul.f32 %v1150_v26, %v2869_v24  ;;  %v1178_v57 = vstv %s3233_s21 }
 0x2bb   :  { %v3163_v36 = vadd.f32 %v1336_v63, %v1332_v55 }
 0x2bc   :  { %v1580_v39 = vpop.permute.xlu1 %1579  ;;  %v1835_v41 = vpop.permute.xlu0 %1834 }
 0x2bd   :  { %v1585_v45 = vadd.f32 %v1580_v39, %v1571_v31  ;;  %v1839_v35 = vadd.f32 %v1835_v41, %v1825_v42  ;;  %v1164_v42 = vstv %s3202_s17  ;;  %v1890_v41 = vmul.f32 %v1889_v19, %v2829_v58 }
 0x2be   :  { %1627 = vrot.lane.b32.xlu1 %v1623_v7, %s2451_s20  ;;  %1390 = vrot.lane.b32.xlu0 %v1385_v32, %s2452_s22  ;;  %v1166_v7 = vmul.f32 %v1164_v42, %v2888_v37  ;;  %v1404_v58 = vmul.f32 %v1403_v29, %v2869_v24 }
 0x2bf   :  { %v3175_v49 = vadd.f32 %v1589_v47, %v1585_v45  ;;  %v3177_v1 = vadd.f32 %v1843_v0, %v1839_v35  ;;  %v1656_v45 = vstv %s3211_s18  ;;  %s2126_s18 = sld [smem:[#allocation15 + $0x2]] }
 0x2c0   :  { %v1819_v52 = vpop.permute.xlu1 %1818  ;;  %v583_v44 = vpop.permute.xlu0 %582  ;;  %v1658_v48 = vmul.f32 %v1656_v45, %v2888_v37 }
 0x2c1   :  { %v1824_v20 = vadd.f32 %v1819_v52, %v1810_v46  ;;  %v588_v10 = vadd.f32 %v583_v44, %v2929_v9  ;;  %v1417_v52 = vstv %s3223_s19 }
 0x2c2   :  { %1866 = vrot.lane.b32.xlu1 %v1862_v53, %s2449_s3  ;;  %1643 = vrot.lane.b32.xlu0 %v1638_v54, %s2452_s22  ;;  %v1165_v54 = vmul.f32 %v1164_v42, %v2869_v24  ;;  %v1419_v46 = vmul.f32 %v1417_v52, %v2888_v37 }
 0x2c4   :  { %v1833_v60 = vpop.permute.xlu1 %1832  ;;  %v597_v61 = vpop.permute.xlu0 %596 }
 0x2c5   :  { %v1838_v56 = vadd.f32 %v1833_v60, %v1824_v20  ;;  %v602_v51 = vadd.f32 %v597_v61, %v588_v10  ;;  %v1657_v61 = vmul.f32 %v1656_v45, %v2869_v24 }
 0x2c6   :  { %1388 = vrot.lane.b32.xlu1 %v1384_v2, %s2452_s22  ;;  %1882 = vrot.lane.b32.xlu0 %v1877_v40, %s2451_s20  ;;  %v1180_v2 = vmul.f32 %v1178_v57, %v2888_v37  ;;  %v1670_v40 = vstv %s3246_s0  ;;  %s2127_s0 = sld [smem:[#allocation17 + $0x2]] }
 0x2c7   :  { %v3197_v12 = vadd.f32 %v1842_v4, %v1838_v56  ;;  %v1418_v4 = vmul.f32 %v1417_v52, %v2869_v24  ;;  %v1672_v10 = vmul.f32 %v1670_v40, %v2888_v37  ;;  %v1923_v52 = vstv %s3294_s27  ;;  %s2166_s27 = sld [smem:[#allocation15 + $0x4]] }
 0x2c8   :  { %v585_v14 = vpop.permute.xlu1 %584  ;;  %v611_v15 = vpop.permute.xlu0 %610 }
 0x2c9   :  { %v616_v22 = vadd.f32 %v611_v15, %v602_v51  ;;  %v589_v5 = vadd.f32 %v585_v14, %v2953_v30  ;;  %v1909_v14 = vstv %s3257_s23  ;;  %v1179_v51 = vmul.f32 %v1178_v57, %v2869_v24 }
 0x2ca   :  { %1641 = vrot.lane.b32.xlu1 %v1637_v16, %s2452_s22  ;;  %1157 = vrot.lane.b32.xlu0 %v1152_v18, %s2450_s5  ;;  %v1911_v19 = vmul.f32 %v1909_v14, %v2888_v37  ;;  %v1910_v42 = vmul.f32 %v1909_v14, %v2869_v24  ;;  %v1698_v14 = vstv %s3316_s7  ;;  %s2167_s7 = sld [smem:[#allocation17 + $0x4]] }
 0x2cc   :  { %v599_v9 = vpop.permute.xlu1 %598  ;;  %v625_v11 = vpop.permute.xlu0 %624 }
 0x2cd   :  { %v630_v27 = vadd.f32 %v625_v11, %v616_v22  ;;  %v603_v31 = vadd.f32 %v599_v9, %v589_v5  ;;  %v1431_v22 = vstv %s3266_s2  ;;  %v891_v9 = vstv %s3270_s24  ;;  %s3550_s24 = sld [smem:[#allocation15 + $0x3]] }
 0x2ce   :  { %1880 = vrot.lane.b32.xlu1 %v1876_v8, %s2451_s20  ;;  %1896 = vrot.lane.b32.xlu0 %v1891_v62, %s2452_s22  ;;  %v893_v29 = vmul.f32 %v891_v9, %v2888_v37  ;;  %v1192_v5 = vstv %s3277_s25 }
 0x2cf   :  { %v3216_v33 = vadd.f32 %v634_v28, %v630_v27  ;;  %v1433_v27 = vmul.f32 %v1431_v22, %v2888_v37 }
 0x2d0   :  { %v613_v55 = vpop.permute.xlu1 %612  ;;  %v3218_v63 = vpop.permute.xlu0 %644 }
 0x2d1   :  { %v617_v38 = vadd.f32 %v613_v55, %v603_v31 }
 0x2d2   :  { %1155 = vrot.lane.b32.xlu1 %v1151_v6, %s2450_s5  ;;  %1410 = vrot.lane.b32.xlu0 %v1405_v25, %s2450_s5 }
 0x2d4   :  { %v627_v30 = vpop.permute.xlu1 %626  ;;  %v3227_v39 = vpop.permute.xlu0 %658 }
 0x2d5   :  { %v631_v32 = vadd.f32 %v627_v30, %v617_v38  ;;  %v1194_v38 = vmul.f32 %v1192_v5, %v2888_v37 }
 0x2d6   :  { %1894 = vrot.lane.b32.xlu1 %v1890_v41, %s2452_s22  ;;  %1171 = vrot.lane.b32.xlu0 %v1166_v7, %s2449_s3  ;;  %v1684_v41 = vstv %s3285_s26  ;;  %s2147_s26 = sld [smem:[#allocation17 + $0x3]] }
 0x2d7   :  { %v3237_v35 = vadd.f32 %v635_v43, %v631_v32  ;;  %v1432_v43 = vmul.f32 %v1431_v22, %v2869_v24  ;;  %v1686_v45 = vmul.f32 %v1684_v41, %v2888_v37 }
 0x2d8   :  { %v3239_v47 = vpop.permute.xlu1 %646  ;;  %v3241_v0 = vpop.permute.xlu0 %672 }
 0x2da   :  { %1408 = vrot.lane.b32.xlu1 %v1404_v58, %s2450_s5  ;;  %1663 = vrot.lane.b32.xlu0 %v1658_v48, %s2450_s5  ;;  %v892_v48 = vmul.f32 %v891_v9, %v2869_v24 }
 0x2dc   :  { %v3250_v44 = vpop.permute.xlu1 %660  ;;  %v3252_v53 = vpop.permute.xlu0 %686 }
 0x2de   :  { %1169 = vrot.lane.b32.xlu1 %v1165_v54, %s2449_s3  ;;  %1424 = vrot.lane.b32.xlu0 %v1419_v46, %s2449_s3 }
 0x2e0   :  { %v3261_v20 = vpop.permute.xlu1 %674  ;;  %v843_v60 = vpop.permute.xlu0 %842 }
 0x2e1   :  { %v847_v15 = vadd.f32 %v843_v60, %v2981_v59  ;;  %v1671_v59 = vmul.f32 %v1670_v40, %v2869_v24  ;;  %v1193_v60 = vmul.f32 %v1192_v5, %v2869_v24 }
 0x2e2   :  { %1661 = vrot.lane.b32.xlu1 %v1657_v61, %s2450_s5  ;;  %1185 = vrot.lane.b32.xlu0 %v1180_v2, %s2451_s20  ;;  %v1925_v61 = vmul.f32 %v1923_v52, %v2888_v37  ;;  %v1445_v2 = vstv %s3306_s28  ;;  %s2455_s28 = smov 24  }
 0x2e4   :  { %v3272_v56 = vpop.permute.xlu1 %688  ;;  %v857_v26 = vpop.permute.xlu0 %856 }
 0x2e5   :  { %v861_v21 = vadd.f32 %v857_v26, %v847_v15 }
 0x2e6   :  { %1422 = vrot.lane.b32.xlu1 %v1418_v4, %s2449_s3  ;;  %1677 = vrot.lane.b32.xlu0 %v1672_v10, %s2449_s3  ;;  %v1685_v4 = vmul.f32 %v1684_v41, %v2869_v24  ;;  %v1447_v10 = vmul.f32 %v1445_v2, %v2888_v37 }
 0x2e8   :  { %v841_v16 = vpop.permute.xlu1 %840  ;;  %v871_v18 = vpop.permute.xlu0 %870 }
 0x2e9   :  { %v875_v11 = vadd.f32 %v871_v18, %v861_v21  ;;  %v846_v55 = vadd.f32 %v841_v16, %v2996_v13  ;;  %v1924_v18 = vmul.f32 %v1923_v52, %v2869_v24 }
 0x2ea   :  { %1183 = vrot.lane.b32.xlu1 %v1179_v51, %s2451_s20  ;;  %1916 = vrot.lane.b32.xlu0 %v1911_v19, %s2450_s5  ;;  %v1700_v51 = vmul.f32 %v1698_v14, %v2888_v37 }
 0x2ec   :  { %v855_v8 = vpop.permute.xlu1 %854  ;;  %v885_v62 = vpop.permute.xlu0 %884 }
 0x2ed   :  { %v889_v28 = vadd.f32 %v885_v62, %v875_v11  ;;  %v860_v30 = vadd.f32 %v855_v8, %v846_v55  ;;  %v1446_v11 = vmul.f32 %v1445_v2, %v2869_v24 }
 0x2ee   :  { %1675 = vrot.lane.b32.xlu1 %v1671_v59, %s2449_s3  ;;  %1438 = vrot.lane.b32.xlu0 %v1433_v27, %s2451_s20  ;;  %v1951_v59 = vstv %s3334_s29  ;;  %s2187_s29 = sld [smem:[#allocation17 + $0x5]] }
 0x2ef   :  { %v3299_v6 = vadd.f32 %v893_v29, %v889_v28  ;;  %v1699_v28 = vmul.f32 %v1698_v14, %v2869_v24  ;;  %v1953_v29 = vmul.f32 %v1951_v59, %v2888_v37 }
 0x2f0   :  { %v869_v25 = vpop.permute.xlu1 %868  ;;  %v3301_v31 = vpop.permute.xlu0 %904 }
 0x2f1   :  { %v874_v7 = vadd.f32 %v869_v25, %v860_v30 }
 0x2f2   :  { %1914 = vrot.lane.b32.xlu1 %v1910_v42, %s2450_s5  ;;  %1199 = vrot.lane.b32.xlu0 %v1194_v38, %s2452_s22  ;;  %s3325_s5 = sld [smem:[#allocation12 + $0x28d]] }
 0x2f4   :  { %v883_v13 = vpop.permute.xlu1 %882  ;;  %v3310_v32 = vpop.permute.xlu0 %918 }
 0x2f5   :  { %v888_v58 = vadd.f32 %v883_v13, %v874_v7  ;;  %v1952_v13 = vmul.f32 %v1951_v59, %v2869_v24 }
 0x2f6   :  { %1436 = vrot.lane.b32.xlu1 %v1432_v43, %s2451_s20  ;;  %1691 = vrot.lane.b32.xlu0 %v1686_v45, %s2451_s20  ;;  %v651_v45 = vadd.f32 %v3239_v47, %v3237_v35  ;;  %v909_v47 = vadd.f32 %v3301_v31, %v3299_v6 }
 0x2f7   :  { %v894_v54 = vadd.f32 %v892_v48, %v888_v58  ;;  %v650_v58 = vadd.f32 %v3218_v63, %v3216_v33 }
 0x2f8   :  { %v903_v46 = vpop.permute.xlu1 %902  ;;  %v3320_v57 = vpop.permute.xlu0 %932  ;;  %v1937_v21 = vstv %s3325_s5  ;;  %s2186_s5 = sld [smem:[#allocation15 + $0x5]] }
 0x2f9   :  { %v1939_v8 = vmul.f32 %v1937_v21, %v2888_v37  ;;  %v1938_v42 = vmul.f32 %v1937_v21, %v2869_v24 }
 0x2fa   :  { %1197 = vrot.lane.b32.xlu1 %v1193_v60, %s2452_s22  ;;  %1930 = vrot.lane.b32.xlu0 %v1925_v61, %s2449_s3  ;;  %v664_v61 = vadd.f32 %v3227_v39, %v650_v58 }
 0x2fc   :  { %v917_v40 = vpop.permute.xlu1 %916  ;;  %v3329_v26 = vpop.permute.xlu0 %946 }
 0x2fe   :  { %1689 = vrot.lane.b32.xlu1 %v1685_v4, %s2451_s20  ;;  %1452 = vrot.lane.b32.xlu0 %v1447_v10, %s2452_s22  ;;  %v908_v4 = vadd.f32 %v903_v46, %v894_v54  ;;  %v678_v10 = vadd.f32 %v3241_v0, %v664_v61  ;;  %v3381_v0 = vunpack.i.l.bf16 %v2665_v17 }
 0x300   :  { %v931_v15 = vpop.permute.xlu1 %930  ;;  %v1096_v16 = vpop.permute.xlu0 %1095  ;;  %v922_v33 = vadd.f32 %v917_v40, %v908_v4  ;;  %v692_v39 = vadd.f32 %v3252_v53, %v678_v10 }
 0x301   :  { %v1100_v19 = vadd.f32 %v1096_v16, %v3015_v34 }
 0x302   :  { %1928 = vrot.lane.b32.xlu1 %v1924_v18, %s2449_s3  ;;  %1705 = vrot.lane.b32.xlu0 %v1700_v51, %s2452_s22  ;;  %v936_v54 = vadd.f32 %v931_v15, %v922_v33  ;;  %s3378_s3 = sld [smem:[#allocation12 + $0x10a]] }
 0x304   :  { %v945_v22 = vpop.permute.xlu1 %944  ;;  %v1349_v9 = vpop.permute.xlu0 %1348 }
 0x305   :  { %v1353_v62 = vadd.f32 %v1349_v9, %v3137_v3  ;;  %v950_v31 = vadd.f32 %v945_v22, %v936_v54 }
 0x306   :  { %1450 = vrot.lane.b32.xlu1 %v1446_v11, %s2452_s22  ;;  %1944 = vrot.lane.b32.xlu0 %v1939_v8, %s2451_s20 }
 0x308   :  { %v1094_v27 = vpop.permute.xlu1 %1093  ;;  %v1110_v34 = vpop.permute.xlu0 %1109  ;;  %v1144_v11 = vstv %s3378_s3  ;;  %s2456_s3 = smov 36  }
 0x309   :  { %v1099_v5 = vadd.f32 %v1094_v27, %v3036_v50  ;;  %v1114_v55 = vadd.f32 %v1110_v34, %v1100_v19  ;;  %v1145_v58 = vmul.f32 %v1144_v11, %v2869_v24 }
 0x30a   :  { %1703 = vrot.lane.b32.xlu1 %v1699_v28, %s2452_s22  ;;  %1958 = vrot.lane.b32.xlu0 %v1953_v29, %s2452_s22  ;;  %v1146_v28 = vmul.f32 %v1144_v11, %v2888_v37 }
 0x30c   :  { %v1347_v25 = vpop.permute.xlu1 %1346  ;;  %v1602_v3 = vpop.permute.xlu0 %1601 }
 0x30d   :  { %v1352_v38 = vadd.f32 %v1347_v25, %v3163_v36  ;;  %v1606_v30 = vadd.f32 %v1602_v3, %v3150_v23  ;;  %v665_v36 = vadd.f32 %v3250_v44, %v651_v45 }
 0x30e   :  { %1942 = vrot.lane.b32.xlu1 %v1938_v42, %s2451_s20  ;;  %s3411_s20 = sld [smem:[#allocation12 + $0x18a]] }
 0x30f   :  { %v679_v2 = vadd.f32 %v3261_v20, %v665_v36  ;;  %v923_v20 = vadd.f32 %v3310_v32, %v909_v47  ;;  %v3389_v32 = vmul.f32 %v3381_v0, %v692_v39 }
 0x310   :  { %v1108_v41 = vpop.permute.xlu1 %1107  ;;  %v1363_v7 = vpop.permute.xlu0 %1362 }
 0x311   :  { %v1113_v50 = vadd.f32 %v1108_v41, %v1099_v5  ;;  %v1367_v43 = vadd.f32 %v1363_v7, %v1353_v62  ;;  %v693_v35 = vadd.f32 %v3272_v56, %v679_v2  ;;  %v937_v6 = vadd.f32 %v3320_v57, %v923_v20 }
 0x312   :  { %1956 = vrot.lane.b32.xlu1 %v1952_v13, %s2452_s22  ;;  %s3417_s22 = sld [smem:[#allocation12 + $0x20a]] }
 0x313   :  { %v951_v15 = vadd.f32 %v3329_v26, %v937_v6 }
 0x314   :  { %v1600_v48 = vpop.permute.xlu1 %1599  ;;  %v1124_v23 = vpop.permute.xlu0 %1123  ;;  %v1397_v36 = vstv %s3411_s20  ;;  %s2457_s20 = smov 48  }
 0x315   :  { %v1605_v52 = vadd.f32 %v1600_v48, %v3175_v49  ;;  %v1128_v60 = vadd.f32 %v1124_v23, %v1114_v55  ;;  %v3374_v49 = vunpack.i.h.bf16 %v2665_v17  ;;  %v3393_v17 = vmul.f32 %v3381_v0, %v950_v31 }
 0x316   :  { %v1399_v4 = vmul.f32 %v1397_v36, %v2888_v37 }
 0x317   :  { %v3384_v56 = vmul.f32 %v3374_v49, %v693_v35  ;;  %v3398_v9 = vmul.f32 %v3374_v49, %v951_v15  ;;  %v967_v59 = vmul.f32 %v3393_v17, %v3393_v17  ;;  %v705_v35 = vsel %vm704_vm6, %v3389_v32, 0.0 }
 0x318   :  { %v1361_v63 = vpop.permute.xlu1 %1360  ;;  %v1616_v44 = vpop.permute.xlu0 %1615  ;;  %v1650_v10 = vstv %s3417_s22  ;;  %v954_v39 = vsel %vm704_vm6, %v3393_v17, 0.0  ;;  %s2458_s22 = smov 60  }
 0x319   :  { %v1366_v14 = vadd.f32 %v1361_v63, %v1352_v38  ;;  %v1620_v16 = vadd.f32 %v1616_v44, %v1606_v30  ;;  %v719_v57 = vmul.f32 %v3384_v56, %v3384_v56  ;;  %v968_v5 = vmul.f32 %v3398_v9, %v3398_v9 }
 0x31a   :  { %v969_v38 = vsel %vm704_vm6, %v967_v59, 0.0  ;;  %v706_v2 = vsel %vm704_vm6, %v3384_v56, 0.0  ;;  %v1652_v20 = vmul.f32 %v1650_v10, %v2888_v37  ;;  %v955_v54 = vsel %vm704_vm6, %v3398_v9, 0.0 }
 0x31b   :  { %v721_v62 = vsel %vm704_vm6, %v719_v57, 0.0  ;;  %v970_v41 = vsel %vm704_vm6, %v968_v5, 0.0  ;;  %v707_v44 = vadd.f32 %v706_v2, %v705_v35 }
 0x31c   :  { %v1122_v46 = vpop.permute.xlu1 %1121  ;;  %v1855_v40 = vpop.permute.xlu0 %1854  ;;  %v971_v7 = vadd.f32 %v970_v41, %v969_v38 }
 0x31d   :  { %v1127_v18 = vadd.f32 %v1122_v46, %v1113_v50  ;;  %v1859_v53 = vadd.f32 %v1855_v40, %v3177_v1  ;;  %v718_v1 = vmul.f32 %v3389_v32, %v3389_v32  ;;  %v956_v40 = vadd.f32 %v955_v54, %v954_v39 }
 0x31f   :  { %v720_v29 = vsel %vm704_vm6, %v718_v1, 0.0 }
 0x320   :  { %v1614_v51 = vpop.permute.xlu1 %1613  ;;  %v1377_v19 = vpop.permute.xlu0 %1376  ;;  %v722_v55 = vadd.f32 %v721_v62, %v720_v29 }
 0x321   :  { %v1619_v21 = vadd.f32 %v1614_v51, %v1605_v52  ;;  %v1381_v22 = vadd.f32 %v1377_v19, %v1367_v43 }
 0x324   :  { %v1853_v8 = vpop.permute.xlu1 %1852  ;;  %v1138_v26 = vpop.permute.xlu0 %1137 }
 0x325   :  { %v1858_v27 = vadd.f32 %v1853_v8, %v3197_v12  ;;  %v1142_v34 = vadd.f32 %v1138_v26, %v1128_v60 }
 0x327   :  { %v3413_v25 = vadd.f32 %v1146_v28, %v1142_v34 }
 0x328   :  { %v1375_v3 = vpop.permute.xlu1 %1374  ;;  %v1630_v42 = vpop.permute.xlu0 %1629 }
 0x329   :  { %v1380_v30 = vadd.f32 %v1375_v3, %v1366_v14  ;;  %v1634_v12 = vadd.f32 %v1630_v42, %v1620_v16  ;;  %723 = vadd.xlane.f32.xlu0 %v722_v55 }
 0x32c   :  { %v1136_v13 = vpop.permute.xlu1 %1135  ;;  %v1869_v50 = vpop.permute.xlu0 %1868 }
 0x32d   :  { %v1141_v43 = vadd.f32 %v1136_v13, %v1127_v18  ;;  %v1873_v45 = vadd.f32 %v1869_v50, %v1859_v53  ;;  %972 = vadd.xlane.f32.xlu0 %v971_v7  ;;  %v1398_v53 = vmul.f32 %v1397_v36, %v2869_v24 }
 0x32f   :  { %v3421_v48 = vadd.f32 %v1145_v58, %v1141_v43 }
 0x330   :  { %v1628_v23 = vpop.permute.xlu1 %1627  ;;  %v1391_v52 = vpop.permute.xlu0 %1390 }
 0x331   :  { %v1633_v60 = vadd.f32 %v1628_v23, %v1619_v21  ;;  %v1395_v61 = vadd.f32 %v1391_v52, %v1381_v22  ;;  %v1651_v21 = vmul.f32 %v1650_v10, %v2869_v24  ;;  %v1903_v22 = vstv %s2181_s1  ;;  %s2459_s1 = smov [#allocation18]  }
 0x332   :  { %v1905_v59 = vmul.f32 %v1903_v22, %v2888_v37  ;;  %v1904_v42 = vmul.f32 %v1903_v22, %v2869_v24 }
 0x333   :  { %v3429_v47 = vadd.f32 %v1399_v4, %v1395_v61 }
 0x334   :  { %v1867_v33 = vpop.permute.xlu1 %1866  ;;  %v1644_v63 = vpop.permute.xlu0 %1643 }
 0x335   :  { %v1872_v14 = vadd.f32 %v1867_v33, %v1858_v27  ;;  %v1648_v16 = vadd.f32 %v1644_v63, %v1634_v12 }
 0x336   :  { %708 = vadd.xlane.f32.xlu1 %v707_v44 }
 0x337   :  { %v1654_v6 = vadd.f32 %v1652_v20, %v1648_v16 }
 0x338   :  { %v1389_v31 = vpop.permute.xlu1 %1388  ;;  %v1883_v46 = vpop.permute.xlu0 %1882 }
 0x339   :  { %v1394_v18 = vadd.f32 %v1389_v31, %v1380_v30  ;;  %v1887_v1 = vadd.f32 %v1883_v46, %v1873_v45 }
 0x33a   :  { %957 = vadd.xlane.f32.xlu1 %v956_v40 }
 0x33b   :  { %v1400_v15 = vadd.f32 %v1398_v53, %v1394_v18 }
 0x33c   :  { %v1642_v51 = vpop.permute.xlu1 %1641  ;;  %v1158_v19 = vpop.permute.xlu0 %1157 }
 0x33d   :  { %v1647_v57 = vadd.f32 %v1642_v51, %v1633_v60  ;;  %v1162_v52 = vadd.f32 %v1158_v19, %v3413_v25 }
 0x33f   :  { %v3438_v11 = vadd.f32 %v1651_v21, %v1647_v57 }
 0x340   :  { %v1881_v8 = vpop.permute.xlu1 %1880  ;;  %v1897_v26 = vpop.permute.xlu0 %1896 }
 0x341   :  { %v1901_v62 = vadd.f32 %v1897_v26, %v1887_v1  ;;  %v1886_v29 = vadd.f32 %v1881_v8, %v1872_v14 }
 0x343   :  { %v3441_v27 = vadd.f32 %v1905_v59, %v1901_v62 }
 0x344   :  { %v1156_v34 = vpop.permute.xlu1 %1155  ;;  %v1411_v28 = vpop.permute.xlu0 %1410 }
 0x345   :  { %v1161_v4 = vadd.f32 %v1156_v34, %v3421_v48  ;;  %v1415_v16 = vadd.f32 %v1411_v28, %v3429_v47 }
 0x348   :  { %v1895_v5 = vpop.permute.xlu1 %1894  ;;  %v1172_v55 = vpop.permute.xlu0 %1171 }
 0x349   :  { %v1900_v3 = vadd.f32 %v1895_v5, %v1886_v29  ;;  %v1176_v60 = vadd.f32 %v1172_v55, %v1162_v52 }
 0x34b   :  { %v3444_v38 = vadd.f32 %v1904_v42, %v1900_v3 }
 0x34c   :  { %v1409_v30 = vpop.permute.xlu1 %1408  ;;  %v1664_v12 = vpop.permute.xlu0 %1663 }
 0x34d   :  { %v1668_v53 = vadd.f32 %v1664_v12, %v1654_v6  ;;  %v1414_v22 = vadd.f32 %v1409_v30, %v1400_v15 }
 0x350   :  { %v1170_v41 = vpop.permute.xlu1 %1169  ;;  %v1425_v7 = vpop.permute.xlu0 %1424 }
 0x351   :  { %v1175_v63 = vadd.f32 %v1170_v41, %v1161_v4  ;;  %v1429_v25 = vadd.f32 %v1425_v7, %v1415_v16 }
 0x354   :  { %v1662_v13 = vpop.permute.xlu1 %1661  ;;  %v1186_v50 = vpop.permute.xlu0 %1185 }
 0x355   :  { %v1190_v24 = vadd.f32 %v1186_v50, %v1176_v60  ;;  %v1667_v5 = vadd.f32 %v1662_v13, %v3438_v11 }
 0x358   :  { %v1423_v43 = vpop.permute.xlu1 %1422  ;;  %v1678_v37 = vpop.permute.xlu0 %1677 }
 0x359   :  { %v1682_v1 = vadd.f32 %v1678_v37, %v1668_v53  ;;  %v1428_v34 = vadd.f32 %v1423_v43, %v1414_v22 }
 0x35c   :  { %v1184_v45 = vpop.permute.xlu1 %1183  ;;  %v1917_v58 = vpop.permute.xlu0 %1916 }
 0x35d   :  { %v1189_v44 = vadd.f32 %v1184_v45, %v1175_v63  ;;  %v1921_v30 = vadd.f32 %v1917_v58, %v3441_v27 }
 0x360   :  { %v1676_v36 = vpop.permute.xlu1 %1675  ;;  %v1439_v23 = vpop.permute.xlu0 %1438 }
 0x361   :  { %v1443_v46 = vadd.f32 %v1439_v23, %v1429_v25  ;;  %v1681_v12 = vadd.f32 %v1676_v36, %v1667_v5 }
 0x364   :  { %v1915_v61 = vpop.permute.xlu1 %1914  ;;  %v1200_v2 = vpop.permute.xlu0 %1199 }
 0x365   :  { %v1204_v10 = vadd.f32 %v1200_v2, %v1190_v24  ;;  %v1920_v60 = vadd.f32 %v1915_v61, %v3444_v38 }
 0x367   :  { %v3449_v14 = vmul.f32 %v3374_v49, %v1204_v10 }
 0x368   :  { %v1437_v35 = vpop.permute.xlu1 %1436  ;;  %v1692_v33 = vpop.permute.xlu0 %1691 }
 0x369   :  { %v1221_v48 = vmul.f32 %v3449_v14, %v3449_v14  ;;  %v1208_v47 = vsel %vm704_vm6, %v3449_v14, 0.0  ;;  %v1696_v28 = vadd.f32 %v1692_v33, %v1682_v1  ;;  %v1442_v55 = vadd.f32 %v1437_v35, %v1428_v34 }
 0x36b   :  { %v1223_v26 = vsel %vm704_vm6, %v1221_v48, 0.0 }
 0x36c   :  { %v1198_v39 = vpop.permute.xlu1 %1197  ;;  %v1931_v20 = vpop.permute.xlu0 %1930 }
 0x36d   :  { %v1203_v54 = vadd.f32 %v1198_v39, %v1189_v44  ;;  %v1935_v50 = vadd.f32 %v1931_v20, %v1921_v30 }
 0x36f   :  { %v3453_v31 = vmul.f32 %v3381_v0, %v1203_v54 }
 0x370   :  { %v1690_v40 = vpop.permute.xlu1 %1689  ;;  %v1453_v18 = vpop.permute.xlu0 %1452 }
 0x371   :  { %v1207_v51 = vsel %vm704_vm6, %v3453_v31, 0.0  ;;  %v1220_v19 = vmul.f32 %v3453_v31, %v3453_v31  ;;  %v1457_v57 = vadd.f32 %v1453_v18, %v1443_v46  ;;  %v1695_v43 = vadd.f32 %v1690_v40, %v1681_v12 }
 0x372   :  { %v1209_v21 = vadd.f32 %v1208_v47, %v1207_v51 }
 0x373   :  { %v1222_v8 = vsel %vm704_vm6, %v1220_v19, 0.0  ;;  %v3466_v29 = vmul.f32 %v3374_v49, %v1457_v57 }
 0x374   :  { %v1929_v62 = vpop.permute.xlu1 %1928  ;;  %1210 = vadd.xlane.f32.xlu1 %v1209_v21  ;;  %v1706_v6 = vpop.permute.xlu0 %1705  ;;  %v1224_v59 = vadd.f32 %v1223_v26, %v1222_v8 }
 0x375   :  { %v1710_v3 = vadd.f32 %v1706_v6, %v1696_v28  ;;  %v1474_v7 = vmul.f32 %v3466_v29, %v3466_v29  ;;  %v1461_v23 = vsel %vm704_vm6, %v3466_v29, 0.0  ;;  %v1934_v16 = vadd.f32 %v1929_v62, %v1920_v60 }
 0x376   :  { %1225 = vadd.xlane.f32.xlu0 %v1224_v59 }
 0x377   :  { %v3473_v37 = vmul.f32 %v3374_v49, %v1710_v3  ;;  %v1476_v24 = vsel %vm704_vm6, %v1474_v7, 0.0 }
 0x378   :  { %v1451_v15 = vpop.permute.xlu1 %1450  ;;  %v1945_v42 = vpop.permute.xlu0 %1944 }
 0x379   :  { %v1456_v41 = vadd.f32 %v1451_v15, %v1442_v55  ;;  %v1949_v52 = vadd.f32 %v1945_v42, %v1935_v50  ;;  %v1727_v33 = vmul.f32 %v3473_v37, %v3473_v37  ;;  %v1714_v38 = vsel %vm704_vm6, %v3473_v37, 0.0 }
 0x37b   :  { %v3476_v45 = vmul.f32 %v3381_v0, %v1456_v41  ;;  %v1729_v46 = vsel %vm704_vm6, %v1727_v33, 0.0 }
 0x37c   :  { %v1704_v11 = vpop.permute.xlu1 %1703  ;;  %v1959_v13 = vpop.permute.xlu0 %1958 }
 0x37d   :  { %v1709_v27 = vadd.f32 %v1704_v11, %v1695_v43  ;;  %v1460_v58 = vsel %vm704_vm6, %v3476_v45, 0.0  ;;  %v1473_v36 = vmul.f32 %v3476_v45, %v3476_v45  ;;  %v1963_v10 = vadd.f32 %v1959_v13, %v1949_v52 }
 0x37e   :  { %v1462_v2 = vadd.f32 %v1461_v23, %v1460_v58 }
 0x37f   :  { %v3487_v4 = vmul.f32 %v3381_v0, %v1709_v27  ;;  %v1475_v35 = vsel %vm704_vm6, %v1473_v36, 0.0  ;;  %v3499_v54 = vmul.f32 %v3374_v49, %v1963_v10 }
 0x380   :  { %v1943_v63 = vpop.permute.xlu1 %1942  ;;  %1463 = vadd.xlane.f32.xlu0 %v1462_v2  ;;  %v1477_v44 = vadd.f32 %v1476_v24, %v1475_v35 }
 0x381   :  { %v1713_v39 = vsel %vm704_vm6, %v3487_v4, 0.0  ;;  %v1726_v61 = vmul.f32 %v3487_v4, %v3487_v4  ;;  %v1948_v25 = vadd.f32 %v1943_v63, %v1934_v16  ;;  %v1980_v47 = vmul.f32 %v3499_v54, %v3499_v54 }
 0x382   :  { %1478 = vadd.xlane.f32.xlu1 %v1477_v44  ;;  %v1715_v20 = vadd.f32 %v1714_v38, %v1713_v39  ;;  %v1967_v19 = vsel %vm704_vm6, %v3499_v54, 0.0 }
 0x383   :  { %v1728_v48 = vsel %vm704_vm6, %v1726_v61, 0.0  ;;  %v1982_v1 = vsel %vm704_vm6, %v1980_v47, 0.0 }
 0x384   :  { %v1957_v40 = vpop.permute.xlu1 %1956  ;;  %1716 = vadd.xlane.f32.xlu0 %v1715_v20  ;;  %v1730_v18 = vadd.f32 %v1729_v46, %v1728_v48 }
 0x385   :  { %v1962_v53 = vadd.f32 %v1957_v40, %v1948_v25 }
 0x386   :  { %1731 = vadd.xlane.f32.xlu1 %v1730_v18 }
 0x387   :  { %v3504_v51 = vmul.f32 %v3381_v0, %v1962_v53 }
 0x389   :  { %v1966_v49 = vsel %vm704_vm6, %v3504_v51, 0.0  ;;  %v1979_v57 = vmul.f32 %v3504_v51, %v3504_v51 }
 0x38a   :  { %v1968_v21 = vadd.f32 %v1967_v19, %v1966_v49 }
 0x38b   :  { %v1981_v22 = vsel %vm704_vm6, %v1979_v57, 0.0 }
 0x38c   :  { %1969 = vadd.xlane.f32.xlu0 %v1968_v21  ;;  %v1983_v0 = vadd.f32 %v1982_v1, %v1981_v22 }
 0x38e   :  { %1984 = vadd.xlane.f32.xlu1 %v1983_v0 }
 0x3b6   :  { %v724_v8 = vpop.xlane.xlu0 %723 }
 0x3b7   :  { %v725_v26 = vrot.slane %v724_v8, 4 }
 0x3b9   :  { %v726_v6 = vadd.f32 %v725_v26, %v724_v8 }
 0x3ba   :  { %v973_v62 = vpop.xlane.xlu0 %972 }
 0x3bb   :  { %v974_v59 = vrot.slane %v973_v62, 4  ;;  %v727_v34 = vrot.slane %v726_v6, 2 }
 0x3bd   :  { %v975_v28 = vadd.f32 %v974_v59, %v973_v62  ;;  %v728_v30 = vadd.f32 %v727_v34, %v726_v6 }
 0x3bf   :  { %v976_v15 = vrot.slane %v975_v28, 2  ;;  %v729_v43 = vrot.slane %v728_v30, 1 }
 0x3c1   :  { %v977_v11 = vadd.f32 %v976_v15, %v975_v28  ;;  %v730_v58 = vadd.f32 %v729_v43, %v728_v30 }
 0x3c3   :  { %v709_v5 = vpop.xlane.xlu1 %708  ;;  %v978_v36 = vrot.slane %v977_v11, 1 }
 0x3c4   :  { %v710_v55 = vrot.slane %v709_v5, 4 }
 0x3c5   :  { %v979_v24 = vadd.f32 %v978_v36, %v977_v11 }
 0x3c6   :  { %v711_v3 = vadd.f32 %v710_v55, %v709_v5 }
 0x3c7   :  { %v958_v42 = vpop.xlane.xlu1 %957 }
 0x3c8   :  { %v712_v12 = vrot.slane %v711_v3, 2  ;;  %v959_v41 = vrot.slane %v958_v42, 4 }
 0x3ca   :  { %v960_v7 = vadd.f32 %v959_v41, %v958_v42  ;;  %v713_v50 = vadd.f32 %v712_v12, %v711_v3 }
 0x3cc   :  { %v961_v13 = vrot.slane %v960_v7, 2  ;;  %v714_v23 = vrot.slane %v713_v50, 1 }
 0x3ce   :  { %v715_v52 = vadd.f32 %v714_v23, %v713_v50  ;;  %v962_v27 = vadd.f32 %v961_v13, %v960_v7  ;;  %v741_v23 = vstv %s3524_s11 }
 0x3d0   :  { %2214 = vpush %v715_v52  ;;  %v963_v60 = vrot.slane %v962_v27, 1 }
 0x3d1   :  { %2216 = vpush %v730_v58 }
 0x3d2   :  { %v964_v2 = vadd.f32 %v963_v60, %v962_v27 }
 0x3d4   :  { %2218 = vpush %v964_v2  ;;  %v990_v2 = vstv %s3526_s12 }
 0x3d5   :  { %2220 = vpush %v979_v24 }
 0x401   :  { %s2215_s30 = spop %2214  ;;  %v1211_v10 = vpop.xlane.xlu1 %1210 }
 0x402   :  { %v717_v35 = vstv %s2215_s30  ;;  %v1212_v33 = vrot.slane %v1211_v10, 4  ;;  %s2217_s10 = spop %2216  ;;  %s2037_s30 = sshll.u32 %s2459_s1, 4  ;;  %s2038_s30 = int_to_ptr.vmem [resolvable:$true] %s2037_s30 }
 0x403   :  { %v3516_v63 = vmul.f32 0.020833334, %v717_v35  ;;  %v732_v44 = vstv %s2217_s10  ;;  %v1226_v16 = vpop.xlane.xlu0 %1225  ;;  %s2402_s10 = scalar_lea.vmem %s2038_s30, 128  ;;  %p2407_p5 = scmp.lt.s32.totalorder %s2038_s30, %s2038_s30 }
 0x404   :  { %v1213_v39 = vadd.f32 %v1212_v33, %v1211_v10  ;;  %v1227_v38 = vrot.slane %v1226_v16, 4  ;;  %v734_v61 = vmul.f32 0.020833334, %v732_v44  ;;  %p2403_p4 = scmp.ne.s32.totalorder %s2038_s30, %s2402_s10  ;;  %p2408_p6 = scmp.lt.s32.totalorder %s2402_s10, %s2402_s10 }
 0x405   :  { %v735_v20 = vmul.f32 %v3516_v63, %v3516_v63  ;;  %s2219_s4 = spop %2218  ;;  %v743_v44 = vsub.f32 %v3389_v32, %v3516_v63 }
 0x406   :  { %v1214_v25 = vrot.slane %v1213_v39, 2  ;;  %v1228_v48 = vadd.f32 %v1227_v38, %v1226_v16  ;;  %v966_v46 = vstv %s2219_s4  ;;  %s2221_s6 = spop %2220  ;;  %v744_v16 = vsub.f32 %v3384_v56, %v3516_v63  ;;  %p2409_p7 = por %p2408_p6, %p2407_p5 }
 0x407   :  { %v736_v40 = vsub.f32 %v734_v61, %v735_v20  ;;  %v3520_v18 = vmul.f32 0.020833334, %v966_v46  ;;  %v981_v53 = vstv %s2221_s6  ;;  %v748_v61 = vstv %s3528_s13 }
 0x408   :  { %v1229_v47 = vrot.slane %v1228_v48, 2  ;;  %v1215_v49 = vadd.f32 %v1214_v25, %v1213_v39  ;;  %v983_v57 = vmul.f32 0.020833334, %v981_v53  ;;  %p2410_p8 = pnand %p2409_p7, %p2403_p4 }
 0x409   :  { %v737_v19 = vmax.f32 %v736_v40, 0.0  ;;  %v984_v21 = vmul.f32 %v3520_v18, %v3520_v18  ;;  %v992_v53 = vsub.f32 %v3393_v17, %v3520_v18  ;;  %v997_v17 = vstv %s3531_s14 }
 0x40a   :  { %v1216_v22 = vrot.slane %v1215_v49, 1  ;;  %v1230_v1 = vadd.f32 %v1229_v47, %v1228_v48 }
 0x40b   :  { %v738_v0 = vadd.f32 1e-05, %v737_v19  ;;  %v985_v8 = vsub.f32 %v983_v57, %v984_v21  ;;  %v993_v21 = vsub.f32 %v3398_v9, %v3520_v18 }
 0x40c   :  { %v1217_v26 = vadd.f32 %v1216_v22, %v1215_v49  ;;  %v1231_v62 = vrot.slane %v1230_v1, 1 }
 0x40d   :  { %2274 = vrsqrt.f32 %v738_v0  ;;  %v986_v6 = vmax.f32 %v985_v8, 0.0  ;;  %v1464_v59 = vpop.xlane.xlu0 %1463 }
 0x40e   :  { %v1465_v34 = vrot.slane %v1464_v59, 4  ;;  %2222 = vpush %v1217_v26  ;;  %v1232_v28 = vadd.f32 %v1231_v62, %v1230_v1 }
 0x40f   :  { %v987_v5 = vadd.f32 1e-05, %v986_v6  ;;  %v1479_v55 = vpop.xlane.xlu1 %1478 }
 0x410   :  { %v1466_v3 = vadd.f32 %v1465_v34, %v1464_v59  ;;  %v1480_v15 = vrot.slane %v1479_v55, 4  ;;  %2224 = vpush %v1232_v28 }
 0x411   :  { %2276 = vrsqrt.f32 %v987_v5  ;;  %v1717_v42 = vpop.xlane.xlu0 %1716 }
 0x412   :  { %v1467_v30 = vrot.slane %v1466_v3, 2  ;;  %v1481_v12 = vadd.f32 %v1480_v15, %v1479_v55  ;;  %v1718_v41 = vrot.slane %v1717_v42, 4 }
 0x413   :  { %v1732_v7 = vpop.xlane.xlu1 %1731 }
 0x414   :  { %v1482_v50 = vrot.slane %v1481_v12, 2  ;;  %v1719_v43 = vadd.f32 %v1718_v41, %v1717_v42  ;;  %v1733_v11 = vrot.slane %v1732_v7, 4  ;;  %v1468_v13 = vadd.f32 %v1467_v30, %v1466_v3 }
 0x416   :  { %v1720_v52 = vrot.slane %v1719_v43, 2  ;;  %v1734_v27 = vadd.f32 %v1733_v11, %v1732_v7  ;;  %v1469_v58 = vrot.slane %v1468_v13, 1  ;;  %v1483_v36 = vadd.f32 %v1482_v50, %v1481_v12 }
 0x417   :  { %v2275_v60 = vpop.eup %2274 }
 0x418   :  { %v1735_v24 = vrot.slane %v1734_v27, 2  ;;  %v1470_v10 = vadd.f32 %v1469_v58, %v1468_v13  ;;  %v1484_v35 = vrot.slane %v1483_v36, 1  ;;  %v1721_v33 = vadd.f32 %v1720_v52, %v1719_v43 }
 0x419   :  { %v1970_v39 = vpop.xlane.xlu0 %1969  ;;  %v742_v38 = vmul.f32 %v2275_v60, %v741_v23 }
 0x41a   :  { %v1971_v20 = vrot.slane %v1970_v39, 4  ;;  %2226 = vpush %v1470_v10  ;;  %v1485_v25 = vadd.f32 %v1484_v35, %v1483_v36  ;;  %v1722_v48 = vrot.slane %v1721_v33, 1  ;;  %v1736_v46 = vadd.f32 %v1735_v24, %v1734_v27 }
 0x41b   :  { %v2277_v40 = vpop.eup %2276  ;;  %v1985_v47 = vpop.xlane.xlu1 %1984  ;;  %v746_v49 = vmul.f32 %v744_v16, %v742_v38  ;;  %v745_v19 = vmul.f32 %v743_v44, %v742_v38 }
 0x41c   :  { %v1972_v32 = vadd.f32 %v1971_v20, %v1970_v39  ;;  %v1986_v57 = vrot.slane %v1985_v47, 4  ;;  %2228 = vpush %v1485_v25  ;;  %v1723_v56 = vadd.f32 %v1722_v48, %v1721_v33  ;;  %v1737_v63 = vrot.slane %v1736_v46, 1 }
 0x41d   :  { %v991_v22 = vmul.f32 %v2277_v40, %v990_v2  ;;  %v750_v1 = vadd.f32 %v748_v61, %v746_v49  ;;  %v749_v0 = vadd.f32 %v748_v61, %v745_v19 }
 0x41e   :  { %v1973_v8 = vrot.slane %v1972_v32, 2  ;;  %v1987_v26 = vadd.f32 %v1986_v57, %v1985_v47  ;;  %2230 = vpush %v1723_v56  ;;  %v1738_v62 = vadd.f32 %v1737_v63, %v1736_v46  ;;  %v1243_v46 = vstv %s2126_s18 }
 0x41f   :  { %v995_v6 = vmul.f32 %v993_v21, %v991_v22  ;;  %v994_v59 = vmul.f32 %v992_v53, %v991_v22  ;;  %v752_v34 = vmax.f32 %v750_v1, 0.0  ;;  %v751_v28 = vmax.f32 %v749_v0, 0.0 }
 0x420   :  { %v1988_v5 = vrot.slane %v1987_v26, 2  ;;  %2232 = vpush %v1738_v62  ;;  %v1974_v55 = vadd.f32 %v1973_v8, %v1972_v32  ;;  %v1250_v56 = vstv %s2127_s0 }
 0x421   :  { %v999_v3 = vadd.f32 %v997_v17, %v995_v6  ;;  %v998_v15 = vadd.f32 %v997_v17, %v994_v59  ;;  %v2191_v42 = vpack.c.bf16 %v752_v34, %v752_v34  ;;  %v2190_v9 = vpack.c.bf16 %v751_v28, %v751_v28 }
 0x422   :  { %v1975_v18 = vrot.slane %v1974_v55, 1  ;;  %v1989_v30 = vadd.f32 %v1988_v5, %v1987_v26 }
 0x423   :  { %v1001_v12 = vmax.f32 %v999_v3, 0.0  ;;  %v1000_v41 = vmax.f32 %v998_v15, 0.0  ;;  %763 = vst.msk [vmem:[#allocation18 + $0x4] sm:$0xf] %vm761_vm7, %v2191_v42  ;;  %762 = vst.msk [vmem:[#allocation18] sm:$0xf] %vm761_vm7, %v2190_v9  ;;  %v1496_v3 = vstv %s3550_s24 }
 0x424   :  { %v1976_v7 = vadd.f32 %v1975_v18, %v1974_v55  ;;  %v1990_v50 = vrot.slane %v1989_v30, 1 }
 0x425   :  { %v2193_v43 = vpack.c.bf16 %v1001_v12, %v1001_v12  ;;  %v2192_v11 = vpack.c.bf16 %v1000_v41, %v1000_v41  ;;  %v1503_v12 = vstv %s2147_s26 }
 0x426   :  { %2234 = vpush %v1976_v7  ;;  %v1991_v13 = vadd.f32 %v1990_v50, %v1989_v30  ;;  %v1749_v50 = vstv %s2166_s27 }
 0x427   :  { %1010 = vrot.lane.b32.xlu1 %v2193_v43, %s2454_s8  ;;  %1008 = vrot.lane.b32.xlu0 %v2192_v11, %s2454_s8 }
 0x428   :  { %2236 = vpush %v1991_v13 }
 0x43f   :  { %s2223_s15 = spop %2222 }
 0x440   :  { %v1219_v23 = vstv %s2223_s15 }
 0x441   :  { %v1235_v52 = vmul.f32 0.020833334, %v1219_v23  ;;  %s2225_s16 = spop %2224 }
 0x442   :  { %v1234_v27 = vstv %s2225_s16 }
 0x443   :  { %v1236_v58 = vmul.f32 0.020833334, %v1234_v27  ;;  %v1237_v36 = vmul.f32 %v1235_v52, %v1235_v52  ;;  %v1245_v49 = vsub.f32 %v3453_v31, %v1235_v52  ;;  %v1246_v19 = vsub.f32 %v3449_v14, %v1235_v52 }
 0x445   :  { %v1238_v60 = vsub.f32 %v1236_v58, %v1237_v36  ;;  %v1756_v58 = vstv %s2167_s7 }
 0x447   :  { %v1239_v2 = vmax.f32 %v1238_v60, 0.0 }
 0x449   :  { %v1240_v24 = vadd.f32 1e-05, %v1239_v2 }
 0x44b   :  { %2278 = vrsqrt.f32 %v1240_v24  ;;  %s2227_s17 = spop %2226 }
 0x44c   :  { %v1472_v10 = vstv %s2227_s17 }
 0x44d   :  { %v1488_v35 = vmul.f32 0.020833334, %v1472_v10  ;;  %s2229_s19 = spop %2228 }
 0x44e   :  { %v1487_v33 = vstv %s2229_s19 }
 0x44f   :  { %v1489_v44 = vmul.f32 0.020833334, %v1487_v33  ;;  %v1490_v16 = vmul.f32 %v1488_v35, %v1488_v35  ;;  %s2231_s21 = spop %2230  ;;  %v1498_v9 = vsub.f32 %v3476_v45, %v1488_v35  ;;  %v1499_v18 = vsub.f32 %v3466_v29, %v1488_v35 }
 0x450   :  { %v1725_v39 = vstv %s2231_s21  ;;  %v2002_v33 = vstv %s2186_s5 }
 0x451   :  { %v1491_v38 = vsub.f32 %v1489_v44, %v1490_v16  ;;  %v3544_v61 = vmul.f32 0.020833334, %v1725_v39  ;;  %s2233_s23 = spop %2232 }
 0x452   :  { %v1740_v20 = vstv %s2233_s23 }
 0x453   :  { %v1492_v25 = vmax.f32 %v1491_v38, 0.0  ;;  %v1742_v48 = vmul.f32 0.020833334, %v1740_v20  ;;  %v1743_v40 = vmul.f32 %v3544_v61, %v3544_v61  ;;  %v1751_v23 = vsub.f32 %v3487_v4, %v3544_v61 }
 0x454   :  { %v1752_v52 = vsub.f32 %v3473_v37, %v3544_v61 }
 0x455   :  { %v2279_v53 = vpop.eup %2278  ;;  %v1493_v47 = vadd.f32 1e-05, %v1492_v25  ;;  %v1744_v32 = vsub.f32 %v1742_v48, %v1743_v40  ;;  %v2009_v25 = vstv %s2187_s29 }
 0x456   :  { %v1244_v57 = vmul.f32 %v2279_v53, %v1243_v46 }
 0x457   :  { %2280 = vrsqrt.f32 %v1493_v47  ;;  %s2235_s2 = spop %2234  ;;  %v1745_v63 = vmax.f32 %v1744_v32, 0.0 }
 0x458   :  { %v1978_v21 = vstv %s2235_s2  ;;  %v1248_v22 = vmul.f32 %v1246_v19, %v1244_v57  ;;  %v1247_v1 = vmul.f32 %v1245_v49, %v1244_v57 }
 0x459   :  { %v3552_v0 = vmul.f32 0.020833334, %v1978_v21  ;;  %s2237_s25 = spop %2236  ;;  %v1746_v8 = vadd.f32 1e-05, %v1745_v63 }
 0x45a   :  { %v1993_v26 = vstv %s2237_s25  ;;  %v1252_v31 = vadd.f32 %v1250_v56, %v1248_v22  ;;  %v1251_v62 = vadd.f32 %v1250_v56, %v1247_v1 }
 0x45b   :  { %v1995_v14 = vmul.f32 0.020833334, %v1993_v26  ;;  %v1996_v17 = vmul.f32 %v3552_v0, %v3552_v0  ;;  %2282 = vrsqrt.f32 %v1746_v8  ;;  %v2004_v37 = vsub.f32 %v3504_v51, %v3552_v0 }
 0x45c   :  { %v1254_v6 = vmax.f32 %v1252_v31, 0.0  ;;  %v1253_v59 = vmax.f32 %v1251_v62, 0.0  ;;  %v2005_v39 = vsub.f32 %v3499_v54, %v3552_v0  ;;  %v2460_v26 = vmov 0  }
 0x45d   :  { %v1997_v34 = vsub.f32 %v1995_v14, %v1996_v17 }
 0x45e   :  { %v2195_v28 = vpack.c.bf16 %v1254_v6, %v1254_v6  ;;  %v2194_v5 = vpack.c.bf16 %v1253_v59, %v1253_v59 }
 0x45f   :  { %v1998_v55 = vmax.f32 %v1997_v34, 0.0 }
 0x460   :  { %1263 = vrot.lane.b32.xlu1 %v2195_v28, %s2455_s28  ;;  %1261 = vrot.lane.b32.xlu0 %v2194_v5, %s2455_s28 }
 0x461   :  { %v2281_v15 = vpop.eup %2280  ;;  %v1999_v42 = vadd.f32 1e-05, %v1998_v55 }
 0x462   :  { %v1497_v30 = vmul.f32 %v2281_v15, %v1496_v3 }
 0x463   :  { %2284 = vrsqrt.f32 %v1999_v42 }
 0x464   :  { %v1501_v41 = vmul.f32 %v1499_v18, %v1497_v30  ;;  %v1500_v7 = vmul.f32 %v1498_v9, %v1497_v30 }
 0x465   :  { %v2283_v43 = vpop.eup %2282 }
 0x466   :  { %v1505_v11 = vadd.f32 %v1503_v12, %v1501_v41  ;;  %v1504_v13 = vadd.f32 %v1503_v12, %v1500_v7  ;;  %v1750_v27 = vmul.f32 %v2283_v43, %v1749_v50 }
 0x468   :  { %v1507_v45 = vmax.f32 %v1505_v11, 0.0  ;;  %v1506_v29 = vmax.f32 %v1504_v13, 0.0  ;;  %v1754_v36 = vmul.f32 %v1752_v52, %v1750_v27  ;;  %v1753_v60 = vmul.f32 %v1751_v23, %v1750_v27 }
 0x46a   :  { %v2197_v2 = vpack.c.bf16 %v1507_v45, %v1507_v45  ;;  %v2196_v24 = vpack.c.bf16 %v1506_v29, %v1506_v29  ;;  %v1758_v10 = vadd.f32 %v1756_v58, %v1754_v36  ;;  %v1757_v35 = vadd.f32 %v1756_v58, %v1753_v60 }
 0x46c   :  { %1516 = vrot.lane.b32.xlu0 %v2197_v2, %s2456_s3  ;;  %1514 = vrot.lane.b32.xlu1 %v2196_v24, %s2456_s3  ;;  %v1760_v4 = vmax.f32 %v1758_v10, 0.0  ;;  %v1759_v16 = vmax.f32 %v1757_v35, 0.0 }
 0x46d   :  { %v2285_v44 = vpop.eup %2284 }
 0x46e   :  { %v2003_v38 = vmul.f32 %v2285_v44, %v2002_v33  ;;  %v2199_v61 = vpack.c.bf16 %v1760_v4, %v1760_v4  ;;  %v2198_v20 = vpack.c.bf16 %v1759_v16, %v1759_v16 }
 0x470   :  { %v2007_v48 = vmul.f32 %v2005_v39, %v2003_v38  ;;  %v2006_v46 = vmul.f32 %v2004_v37, %v2003_v38  ;;  %1769 = vrot.lane.b32.xlu0 %v2199_v61, %s2457_s20  ;;  %1767 = vrot.lane.b32.xlu1 %v2198_v20, %s2457_s20 }
 0x472   :  { %v2011_v40 = vadd.f32 %v2009_v25, %v2007_v48  ;;  %v2010_v53 = vadd.f32 %v2009_v25, %v2006_v46 }
 0x474   :  { %v2013_v47 = vmax.f32 %v2011_v40, 0.0  ;;  %v2012_v49 = vmax.f32 %v2010_v53, 0.0 }
 0x476   :  { %v2201_v19 = vpack.c.bf16 %v2013_v47, %v2013_v47  ;;  %v2200_v32 = vpack.c.bf16 %v2012_v49, %v2012_v49 }
 0x478   :  { %2022 = vrot.lane.b32.xlu0 %v2201_v19, %s2458_s22  ;;  %2020 = vrot.lane.b32.xlu1 %v2200_v32, %s2458_s22 }
 0x499   :  { %v1011_v54 = vpop.permute.xlu1 %1010  ;;  %v1009_v51 = vpop.permute.xlu0 %1008 }
 0x49a   :  { %1016 = vst.msk [vmem:[#allocation18 + $0x4] sm:$0xf] %vm1014_vm8, %v1011_v54  ;;  %1015 = vst.msk [vmem:[#allocation18] sm:$0xf] %vm1014_vm8, %v1009_v51 }
 0x4d2   :  { %v1264_v57 = vpop.permute.xlu1 %1263  ;;  %v1262_v56 = vpop.permute.xlu0 %1261 }
 0x4d3   :  { %1269 = vst.msk [vmem:[#allocation18 + $0x4] sm:$0xf] %vm1267_vm9, %v1264_v57  ;;  %1268 = vst.msk [vmem:[#allocation18] sm:$0xf] %vm1267_vm9, %v1262_v56 }
 0x4de   :  { %v1515_v63 = vpop.permute.xlu1 %1514  ;;  %v1517_v21 = vpop.permute.xlu0 %1516 }
 0x4df   :  { %1521 = vst.msk [vmem:[#allocation18] sm:$0xf] %vm1520_vm10, %v1515_v63  ;;  %1522 = vst.msk [vmem:[#allocation18 + $0x4] sm:$0xf] %vm1520_vm10, %v1517_v21 }
 0x4e2   :  { %v1768_v22 = vpop.permute.xlu1 %1767  ;;  %v1770_v1 = vpop.permute.xlu0 %1769 }
 0x4e3   :  { %1774 = vst.msk [vmem:[#allocation18] sm:$0xf] %vm1773_vm11, %v1768_v22  ;;  %1775 = vst.msk [vmem:[#allocation18 + $0x4] sm:$0xf] %vm1773_vm11, %v1770_v1 }
 0x4ea   :  { %v2021_v0 = vpop.permute.xlu1 %2020  ;;  %v2023_v8 = vpop.permute.xlu0 %2022 }
 0x4eb   :  { %2027 = vst.msk [vmem:[#allocation18] sm:$0xf] %vm2026_vm12, %v2021_v0  ;;  %2028 = vst.msk [vmem:[#allocation18 + $0x4] sm:$0xf] %vm2026_vm12, %v2023_v8 }
 0x4ec   :  { %2030 = vst.msk [vmem:[#allocation18] sm:$0xf] %vm2029_vm13, %v2460_v26  ;;  %2031 = vst.msk [vmem:[#allocation18 + $0x4] sm:$0xf] %vm2029_vm13, %v2460_v26 }
 0x4ed   :  { %2413 = shalt.err (!%p2410_p8)
}
 0x4ee   :  { %s2414_s11 = scalar_lea.hbm %s3588_s9, 128 }
 0x4ef   :  { %p2415_p9 = scmp.ne.s32.totalorder %s3588_s9, %s2414_s11  ;;  %p2418_p10 = scmp.lt.u32.totalorder %s2414_s11, %s3588_s9 }
 0x4f1   :  { %p2420_p11 = pnand %p2418_p10, %p2415_p9 }
 0x4f3   :  { %2423 = shalt.err (!%p2420_p11)
}
 0x4f4   :  { %s2461_s15 = smov 64   ;;  %s2462_s16 = smov 4  }
 0x4f5   :  { %2043 = dma.vmem_to_hbm [thread:$0]  %s2038_s30, 128, %s3588_s9, [#allocation4], %s2461_s15, %s2461_s15, %s2462_s16  }
 0x4f6   :  { %2436 = dma.done.wait [#allocation4], 128  }
 0x4f7   :  { %2437 = vsyncadd [#allocation4], 4294967168 }
 0x4f8   :  { %2047 = vsyncpa [#allocation3], 1 }
 0x4f9   :  { %2048 = vsyncpa [#allocation4], 1 }
 0x4fa   :  { %2049 = vsyncpa [#allocation5], 1 }
 0x4fb   :  { %2050 = vsyncpa [#allocation6], 1 }
 0x4fc   :  { %2051 = vsyncpa [#allocation10], 1 }
 0x4fd   :  { %2052 = vsyncpa [#allocation13], 1 }
 0x4fe   :  { %2053 = vsyncpa [#allocation16], 1 }

</bundles_post_ra>
